<compile_context>
chip_gen: v7x
topology: tpu7x:2x2x1
jax: 0.10.0
libtpu: 0.0.40
codegen_flags: <defaults>
</compile_context>

<pallas_src>
import functools

import jax
import jax.numpy as jnp
import numpy as np
from jax import lax
from jax.experimental import pallas as pl
from jax.experimental.pallas import tpu as pltpu


def _fused_attention_kernel(scale, mxu_dtype,
                            q_ref, qc_ref, kvt_ref, kct_ref,
                            wq_ref, wkv_ref, wsum_ref, wproj_ref, bproj_ref,
                            out_ref,
                            ekp_scr, ekn_scr, vt_scr, koff_scr):
    iters = wq_ref.shape[0]
    TQ = q_ref.shape[1]
    C = q_ref.shape[2]
    Nk = kvt_ref.shape[2]
    qt = pl.program_id(1)

    # ------------------------------------------------------------------
    # Per-batch K/V preparation, once per batch (first query tile only).
    # Scratch persists across the (sequential, "arbitrary") query-tile axis.
    # ------------------------------------------------------------------
    @pl.when(qt == 0)
    def _prepare_kv():
        kvt = kvt_ref[0]                                            # (ICO, Nk)
        for i in range(iters):                                      # static unroll
            # (2C, ICO) @ (ICO, Nk) -> (2C, Nk): keys/values lane-dense on Nk,
            # no in-kernel transpose needed.
            kvp = jnp.dot(wkv_ref[i].astype(mxu_dtype), kvt.astype(mxu_dtype),
                          preferred_element_type=jnp.float32)
            kT = kvp[:C, :]                                         # (C, Nk)
            vt_scr[i] = kvp[C:, :]                                  # (C, Nk)
            # Scalar mid-range offset keeps the factored exponentials bounded.
            off = 0.5 * (jnp.max(kT) + jnp.min(kT))
            koff_scr[i] = jnp.reshape(off, (1, 1))
            ekp_scr[i] = jnp.exp(kT - off)
            ekn_scr[i] = jnp.exp(off - kT)

    # ------------------------------------------------------------------
    # Iteration-invariant coordinate affinity maps (once per query tile).
    # ------------------------------------------------------------------
    qc = qc_ref[0]                                                  # (TQ, 3)
    kct = kct_ref[0]                                                # (3, Nk)
    coord_maps = [jnp.exp(-jnp.abs(qc[:, d:d + 1] - kct[d:d + 1, :]))  # (TQ, Nk)
                  for d in range(3)]

    # ------------------------------------------------------------------
    # Fused iteration loop.
    # ------------------------------------------------------------------
    x = q_ref[0]                                                    # (TQ, C)
    for i in range(iters):                                          # static unroll
        q_ = jnp.dot(x.astype(mxu_dtype), wq_ref[i].astype(mxu_dtype),
                     preferred_element_type=jnp.float32)            # (TQ, C)
        off = koff_scr[i]                                           # (1, 1)
        eqp = jnp.exp(q_ - off)                                     # (TQ, C)
        eqn = jnp.exp(off - q_)
        ekp = ekp_scr[i]                                            # (C, Nk)
        ekn = ekn_scr[i]

        # affinity[q,k] = sum_c exp(-|q_[q,c] - k[c,k]|)
        #               = sum_c min(eqp[q,c]*ekn[c,k], eqn[q,c]*ekp[c,k])
        # accumulated channel-by-channel: no (TQ, Nk, C) intermediate, Nk on
        # lanes, no EUP exps in the pairwise part.
        aff = jnp.zeros((TQ, Nk), jnp.float32)
        for c in range(C):                                          # static unroll
            a = eqp[:, c:c + 1] * ekn[c:c + 1, :]
            b = eqn[:, c:c + 1] * ekp[c:c + 1, :]
            aff = aff + jnp.minimum(a, b)

        # Positional term reduced over C analytically (fc_delta is linear,
        # bias-free): sum_c fc_delta(E)_c = sum_d (sum_c W[c,d]) * E_d.
        pos = (wsum_ref[i, 0] * coord_maps[0]
               + wsum_ref[i, 1] * coord_maps[1]
               + wsum_ref[i, 2] * coord_maps[2])

        logits = (aff + pos) * scale                                # (TQ, Nk)
        m = jnp.max(logits, axis=-1, keepdims=True)
        p = jnp.exp(logits - m)
        l = jnp.sum(p, axis=-1, keepdims=True)                      # (TQ, 1)

        # attn @ v with v stored transposed (C, Nk); softmax normalization
        # folded into the epilogue (one reciprocal per row, not per element).
        unnorm = lax.dot_general(
            p.astype(mxu_dtype), vt_scr[i].astype(mxu_dtype),
            (((1,), (1,)), ((), ())),
            preferred_element_type=jnp.float32)                     # (TQ, C)
        x = unnorm * pl.reciprocal(l, approx=True)

    # Fused output projection (+ bias).
    out = jnp.dot(x.astype(mxu_dtype), wproj_ref[...].astype(mxu_dtype),
                  preferred_element_type=jnp.float32) + bproj_ref[...]
    out_ref[0] = out.astype(out_ref.dtype)


def da_affinity_attention(q, q_coord, kv, kv_coord, params, scale,
                          tq=None, mxu_dtype=jnp.float32):
    """Pallas implementation of DA_affinity_attention.forward (eval mode).

    mxu_dtype: set to jnp.bfloat16 on v6e/v7x for ~2x MXU density; float32
    (default) matches the PyTorch fp32 reference bit-closely.
    """
    B, Nq, C = q.shape
    _, Nk, ICO = kv.shape
    iters = len(params["q_w"])

    if tq is None:
        tq = Nq if Nq <= 128 else 128
    assert Nq % tq == 0 and (tq % 8 == 0 or tq == Nq), \
        "query tile must divide Nq and be a multiple of 8"

    # One-time layout plumbing in XLA (no in-kernel transposes needed).
    kvt = jnp.transpose(kv, (0, 2, 1))                              # (B, ICO, Nk)
    kct = jnp.transpose(kv_coord, (0, 2, 1))                        # (B, 3, Nk)
    wq_t = jnp.stack([w.T for w in params["q_w"]], axis=0)          # (iters, C, C)  (in,out)
    wkv = jnp.stack(params["kv_w"], axis=0)                         # (iters, 2C, ICO) (out,in)
    wsum = jnp.stack([w.sum(axis=0) for w in params["delta_w"]], 0) # (iters, 3)
    wproj_t = params["proj_w"].T                                    # (C, C)  (in,out)
    bproj = params["proj_b"].reshape(1, C)

    kernel = functools.partial(_fused_attention_kernel, scale, mxu_dtype)

    return pl.pallas_call(
        kernel,
        out_shape=jax.ShapeDtypeStruct((B, Nq, C), jnp.float32),
        grid=(B, Nq // tq),
        in_specs=[
            pl.BlockSpec((1, tq, C), lambda b, t: (b, t, 0)),       # q tile
            pl.BlockSpec((1, tq, 3), lambda b, t: (b, t, 0)),       # q_coord tile
            pl.BlockSpec((1, ICO, Nk), lambda b, t: (b, 0, 0)),     # kv^T (per batch)
            pl.BlockSpec((1, 3, Nk), lambda b, t: (b, 0, 0)),       # kv_coord^T
            pl.BlockSpec((iters, C, C), lambda b, t: (0, 0, 0)),    # stacked Wq^T
            pl.BlockSpec((iters, 2 * C, ICO), lambda b, t: (0, 0, 0)),  # stacked Wkv
            pl.BlockSpec(memory_space=pltpu.MemorySpace.SMEM),      # fc_delta column sums
            pl.BlockSpec((C, C), lambda b, t: (0, 0)),              # Wproj^T
            pl.BlockSpec((1, C), lambda b, t: (0, 0)),              # proj bias
        ],
        out_specs=pl.BlockSpec((1, tq, C), lambda b, t: (b, t, 0)),
        scratch_shapes=[
            pltpu.VMEM((iters, C, Nk), jnp.float32),   # exp(+(k - off))
            pltpu.VMEM((iters, C, Nk), jnp.float32),   # exp(-(k - off))
            pltpu.VMEM((iters, C, Nk), jnp.float32),   # v^T
            pltpu.VMEM((iters, 1, 1), jnp.float32),    # per-iteration offset
        ],
        compiler_params=pltpu.CompilerParams(
            dimension_semantics=("parallel", "arbitrary"),
            vmem_limit_bytes=64 * 1024 * 1024),
    )(q, q_coord, kvt, kct, wq_t, wkv, wsum, wproj_t, bproj)


def _reference(q, q_coord, kv, kv_coord, params, scale):
    """Pure-jnp transcription of the PyTorch forward (for verification)."""
    iters = len(params["q_w"])
    for i in range(iters):
        q_ = q @ params["q_w"][i].T
        kv_ = kv @ params["kv_w"][i].T
        B, Nk, C2 = kv_.shape
        C = C2 // 2
        kv_r = kv_.reshape(B, Nk, 2, C).transpose(2, 0, 1, 3)
        k, v = kv_r[0], kv_r[1]
        pos_enc = jnp.exp(-jnp.abs(q_coord[:, :, None] - kv_coord[:, None])) @ params["delta_w"][i].T
        attn = jnp.exp(-jnp.abs(q_[:, :, None] - k[:, None])) + pos_enc
        attn = jax.nn.softmax(attn.sum(-1) * scale, axis=-1)
        q = attn @ v
    return q @ params["proj_w"].T + params["proj_b"]


if __name__ == "__main__":
    B, Nq, Nk = 2, 64, 16
    erp_dim, ico_dim, iters = 32, 16, 2
    tq = 16                          # 4 query tiles per batch -> exercises tiling
    scale = erp_dim ** (-1)          # matches `qk_scale or erp_dim ** (-1)`

    key = jax.random.PRNGKey(0)
    keys = jax.random.split(key, 9)
    q = jax.random.normal(keys[0], (B, Nq, erp_dim), jnp.float32)
    q_coord = jax.random.normal(keys[1], (B, Nq, 3), jnp.float32)
    kv = jax.random.normal(keys[2], (B, Nk, ico_dim), jnp.float32)
    kv_coord = jax.random.normal(keys[3], (B, Nk, 3), jnp.float32)

    params = {
        "q_w": [0.1 * jax.random.normal(jax.random.fold_in(keys[4], i),
                                        (erp_dim, erp_dim), jnp.float32)
                for i in range(iters)],
        "kv_w": [0.1 * jax.random.normal(jax.random.fold_in(keys[5], i),
                                         (2 * erp_dim, ico_dim), jnp.float32)
                 for i in range(iters)],
        "delta_w": [0.1 * jax.random.normal(jax.random.fold_in(keys[6], i),
                                            (erp_dim, 3), jnp.float32)
                    for i in range(iters)],
        "proj_w": 0.1 * jax.random.normal(keys[7], (erp_dim, erp_dim), jnp.float32),
        "proj_b": 0.01 * jax.random.normal(keys[8], (erp_dim,), jnp.float32),
    }

    out = da_affinity_attention(q, q_coord, kv, kv_coord, params, scale, tq=tq)
    out = jax.block_until_ready(out)

    ref = _reference(q, q_coord, kv, kv_coord, params, scale)
    # Tolerance covers the approximate softmax-denominator reciprocal (~1e-4 rel).
    np.testing.assert_allclose(np.asarray(out), np.asarray(ref), rtol=1e-3, atol=1e-3)
    print("KERNEL_OK")
</pallas_src>

<mosaic_0001>
module attributes {stable_mosaic.version = 11 : i64} {
  func.func @_fused_attention_kernel(%arg0: i32, %arg1: i32, %arg2: memref<1x16x32xf32, #tpu.memory_space<vmem>>, %arg3: memref<1x16x3xf32, #tpu.memory_space<vmem>>, %arg4: memref<1x16x16xf32, #tpu.memory_space<vmem>>, %arg5: memref<1x3x16xf32, #tpu.memory_space<vmem>>, %arg6: memref<2x32x32xf32, #tpu.memory_space<vmem>>, %arg7: memref<2x64x16xf32, #tpu.memory_space<vmem>>, %arg8: memref<2x3xf32, #tpu.memory_space<smem>>, %arg9: memref<32x32xf32, #tpu.memory_space<vmem>>, %arg10: memref<1x32xf32, #tpu.memory_space<vmem>>, %arg11: memref<1x16x32xf32, #tpu.memory_space<vmem>>, %arg12: memref<2x32x16xf32, #tpu.memory_space<vmem>>, %arg13: memref<2x32x16xf32, #tpu.memory_space<vmem>>, %arg14: memref<2x32x16xf32, #tpu.memory_space<vmem>>, %arg15: memref<2x1x1xf32, #tpu.memory_space<vmem>>) attributes {dimension_semantics = [#tpu.dimension_semantics<parallel>, #tpu.dimension_semantics<arbitrary>], iteration_bounds = array<i64: 2, 4>, scalar_prefetch = 0 : i64, scratch_operands = 4 : i64, tpu.core_type = #tpu.core_type<tc>, window_params = [{transform_indices = @transform_0, window_bounds = array<i64: 1, 16, 32>}, {transform_indices = @transform_1, window_bounds = array<i64: 1, 16, 3>}, {transform_indices = @transform_2, window_bounds = array<i64: 1, 16, 16>}, {transform_indices = @transform_3, window_bounds = array<i64: 1, 3, 16>}, {pipeline_mode = #tpu.pipeline_mode<synchronous>, transform_indices = @transform_4, window_bounds = array<i64: 2, 32, 32>}, {pipeline_mode = #tpu.pipeline_mode<synchronous>, transform_indices = @transform_5, window_bounds = array<i64: 2, 64, 16>}, {transform_indices = @transform_6, window_bounds = array<i64: 2, 3>}, {pipeline_mode = #tpu.pipeline_mode<synchronous>, transform_indices = @transform_7, window_bounds = array<i64: 32, 32>}, {pipeline_mode = #tpu.pipeline_mode<synchronous>, transform_indices = @transform_8, window_bounds = array<i64: 1, 32>}, {transform_indices = @transform_9, window_bounds = array<i64: 1, 16, 32>}]} {
    %c0_i32 = arith.constant 0 : i32
    %0 = arith.cmpi eq, %arg1, %c0_i32 : i32
    %1 = arith.extui %0 : i1 to i32
    %c0_i32_0 = arith.constant 0 : i32
    %2 = arith.cmpi ne, %1, %c0_i32_0 : i32
    scf.if %2 {
      %c0_71 = arith.constant 0 : index
      %c0_72 = arith.constant 0 : index
      %c0_73 = arith.constant 0 : index
      %898 = vector.load %arg4[%c0_71, %c0_72, %c0_73] : memref<1x16x16xf32, #tpu.memory_space<vmem>>, vector<1x16x16xf32>
      %899 = vector.shape_cast %898 : vector<1x16x16xf32> to vector<16x16xf32>
      %c0_74 = arith.constant 0 : index
      %c0_75 = arith.constant 0 : index
      %c0_76 = arith.constant 0 : index
      %900 = vector.load %arg7[%c0_74, %c0_75, %c0_76] : memref<2x64x16xf32, #tpu.memory_space<vmem>>, vector<1x64x16xf32>
      %901 = vector.shape_cast %900 : vector<1x64x16xf32> to vector<64x16xf32>
      %cst_77 = arith.constant dense<0.000000e+00> : vector<64x16xf32>
      %902 = tpu.matmul %901, %899, %cst_77 {dimension_numbers = #tpu.dot_dimension_numbers<[1], [0], [0], [1], [0, 0, 1, 1], [], []>} : vector<64x16xf32>, vector<16x16xf32>, vector<64x16xf32> -> vector<64x16xf32>
      %903 = vector.extract_strided_slice %902 {offsets = [0, 0], sizes = [32, 16], strides = [1, 1]} : vector<64x16xf32> to vector<32x16xf32>
      %904 = vector.extract_strided_slice %902 {offsets = [32, 0], sizes = [32, 16], strides = [1, 1]} : vector<64x16xf32> to vector<32x16xf32>
      %c0_78 = arith.constant 0 : index
      %c0_79 = arith.constant 0 : index
      %c0_80 = arith.constant 0 : index
      %905 = vector.load %arg14[%c0_78, %c0_79, %c0_80] : memref<2x32x16xf32, #tpu.memory_space<vmem>>, vector<1x32x16xf32>
      %906 = vector.shape_cast %905 : vector<1x32x16xf32> to vector<32x16xf32>
      %907 = vector.shape_cast %904 : vector<32x16xf32> to vector<1x32x16xf32>
      tpu.vector_store %arg14[%c0_78, %c0_79, %c0_80], %907 {strides = array<i32>} : memref<2x32x16xf32, #tpu.memory_space<vmem>>, vector<1x32x16xf32>,
      %908 = vector.shape_cast %903 : vector<32x16xf32> to vector<1x32x16xf32>
      %cst_81 = arith.constant dense<0xFF800000> : vector<1xf32>
      %909 = vector.multi_reduction <maximumf>, %908, %cst_81 [1, 2] : vector<1x32x16xf32> to vector<1xf32>
      %910 = vector.shape_cast %909 : vector<1xf32> to vector<1x1x1xf32>
      %911 = vector.extract %910[0, 0, 0] : f32 from vector<1x1x1xf32>
      %912 = vector.shape_cast %903 : vector<32x16xf32> to vector<1x32x16xf32>
      %cst_82 = arith.constant dense<0x7F800000> : vector<1xf32>
      %913 = vector.multi_reduction <minimumf>, %912, %cst_82 [1, 2] : vector<1x32x16xf32> to vector<1xf32>
      %914 = vector.shape_cast %913 : vector<1xf32> to vector<1x1x1xf32>
      %915 = vector.extract %914[0, 0, 0] : f32 from vector<1x1x1xf32>
      %916 = arith.addf %911, %915 : f32
      %cst_83 = arith.constant 5.000000e-01 : f32
      %917 = arith.mulf %cst_83, %916 : f32
      %918 = vector.broadcast %917 : f32 to vector<1x1xf32>
      %c0_84 = arith.constant 0 : index
      %c0_85 = arith.constant 0 : index
      %c0_86 = arith.constant 0 : index
      %919 = vector.load %arg15[%c0_84, %c0_85, %c0_86] : memref<2x1x1xf32, #tpu.memory_space<vmem>>, vector<1x1x1xf32>
      %920 = vector.shape_cast %919 : vector<1x1x1xf32> to vector<1x1xf32>
      %921 = vector.shape_cast %918 : vector<1x1xf32> to vector<1x1x1xf32>
      tpu.vector_store %arg15[%c0_84, %c0_85, %c0_86], %921 {strides = array<i32>} : memref<2x1x1xf32, #tpu.memory_space<vmem>>, vector<1x1x1xf32>,
      %922 = vector.broadcast %917 : f32 to vector<32x16xf32>
      %923 = arith.subf %903, %922 : vector<32x16xf32>
      %924 = math.exp %923 : vector<32x16xf32>
      %c0_87 = arith.constant 0 : index
      %c0_88 = arith.constant 0 : index
      %c0_89 = arith.constant 0 : index
      %925 = vector.load %arg12[%c0_87, %c0_88, %c0_89] : memref<2x32x16xf32, #tpu.memory_space<vmem>>, vector<1x32x16xf32>
      %926 = vector.shape_cast %925 : vector<1x32x16xf32> to vector<32x16xf32>
      %927 = vector.shape_cast %924 : vector<32x16xf32> to vector<1x32x16xf32>
      tpu.vector_store %arg12[%c0_87, %c0_88, %c0_89], %927 {strides = array<i32>} : memref<2x32x16xf32, #tpu.memory_space<vmem>>, vector<1x32x16xf32>,
      %928 = vector.broadcast %917 : f32 to vector<32x16xf32>
      %929 = arith.subf %928, %903 : vector<32x16xf32>
      %930 = math.exp %929 : vector<32x16xf32>
      %c0_90 = arith.constant 0 : index
      %c0_91 = arith.constant 0 : index
      %c0_92 = arith.constant 0 : index
      %931 = vector.load %arg13[%c0_90, %c0_91, %c0_92] : memref<2x32x16xf32, #tpu.memory_space<vmem>>, vector<1x32x16xf32>
      %932 = vector.shape_cast %931 : vector<1x32x16xf32> to vector<32x16xf32>
      %933 = vector.shape_cast %930 : vector<32x16xf32> to vector<1x32x16xf32>
      tpu.vector_store %arg13[%c0_90, %c0_91, %c0_92], %933 {strides = array<i32>} : memref<2x32x16xf32, #tpu.memory_space<vmem>>, vector<1x32x16xf32>,
      %c1_93 = arith.constant 1 : index
      %c0_94 = arith.constant 0 : index
      %c0_95 = arith.constant 0 : index
      %934 = vector.load %arg7[%c1_93, %c0_94, %c0_95] : memref<2x64x16xf32, #tpu.memory_space<vmem>>, vector<1x64x16xf32>
      %935 = vector.shape_cast %934 : vector<1x64x16xf32> to vector<64x16xf32>
      %cst_96 = arith.constant dense<0.000000e+00> : vector<64x16xf32>
      %936 = tpu.matmul %935, %899, %cst_96 {dimension_numbers = #tpu.dot_dimension_numbers<[1], [0], [0], [1], [0, 0, 1, 1], [], []>} : vector<64x16xf32>, vector<16x16xf32>, vector<64x16xf32> -> vector<64x16xf32>
      %937 = vector.extract_strided_slice %936 {offsets = [0, 0], sizes = [32, 16], strides = [1, 1]} : vector<64x16xf32> to vector<32x16xf32>
      %938 = vector.extract_strided_slice %936 {offsets = [32, 0], sizes = [32, 16], strides = [1, 1]} : vector<64x16xf32> to vector<32x16xf32>
      %c1_97 = arith.constant 1 : index
      %c0_98 = arith.constant 0 : index
      %c0_99 = arith.constant 0 : index
      %939 = vector.load %arg14[%c1_97, %c0_98, %c0_99] : memref<2x32x16xf32, #tpu.memory_space<vmem>>, vector<1x32x16xf32>
      %940 = vector.shape_cast %939 : vector<1x32x16xf32> to vector<32x16xf32>
      %941 = vector.shape_cast %938 : vector<32x16xf32> to vector<1x32x16xf32>
      tpu.vector_store %arg14[%c1_97, %c0_98, %c0_99], %941 {strides = array<i32>} : memref<2x32x16xf32, #tpu.memory_space<vmem>>, vector<1x32x16xf32>,
      %942 = vector.shape_cast %937 : vector<32x16xf32> to vector<1x32x16xf32>
      %cst_100 = arith.constant dense<0xFF800000> : vector<1xf32>
      %943 = vector.multi_reduction <maximumf>, %942, %cst_100 [1, 2] : vector<1x32x16xf32> to vector<1xf32>
      %944 = vector.shape_cast %943 : vector<1xf32> to vector<1x1x1xf32>
      %945 = vector.extract %944[0, 0, 0] : f32 from vector<1x1x1xf32>
      %946 = vector.shape_cast %937 : vector<32x16xf32> to vector<1x32x16xf32>
      %cst_101 = arith.constant dense<0x7F800000> : vector<1xf32>
      %947 = vector.multi_reduction <minimumf>, %946, %cst_101 [1, 2] : vector<1x32x16xf32> to vector<1xf32>
      %948 = vector.shape_cast %947 : vector<1xf32> to vector<1x1x1xf32>
      %949 = vector.extract %948[0, 0, 0] : f32 from vector<1x1x1xf32>
      %950 = arith.addf %945, %949 : f32
      %cst_102 = arith.constant 5.000000e-01 : f32
      %951 = arith.mulf %cst_102, %950 : f32
      %952 = vector.broadcast %951 : f32 to vector<1x1xf32>
      %c1_103 = arith.constant 1 : index
      %c0_104 = arith.constant 0 : index
      %c0_105 = arith.constant 0 : index
      %953 = vector.load %arg15[%c1_103, %c0_104, %c0_105] : memref<2x1x1xf32, #tpu.memory_space<vmem>>, vector<1x1x1xf32>
      %954 = vector.shape_cast %953 : vector<1x1x1xf32> to vector<1x1xf32>
      %955 = vector.shape_cast %952 : vector<1x1xf32> to vector<1x1x1xf32>
      tpu.vector_store %arg15[%c1_103, %c0_104, %c0_105], %955 {strides = array<i32>} : memref<2x1x1xf32, #tpu.memory_space<vmem>>, vector<1x1x1xf32>,
      %956 = vector.broadcast %951 : f32 to vector<32x16xf32>
      %957 = arith.subf %937, %956 : vector<32x16xf32>
      %958 = math.exp %957 : vector<32x16xf32>
      %c1_106 = arith.constant 1 : index
      %c0_107 = arith.constant 0 : index
      %c0_108 = arith.constant 0 : index
      %959 = vector.load %arg12[%c1_106, %c0_107, %c0_108] : memref<2x32x16xf32, #tpu.memory_space<vmem>>, vector<1x32x16xf32>
      %960 = vector.shape_cast %959 : vector<1x32x16xf32> to vector<32x16xf32>
      %961 = vector.shape_cast %958 : vector<32x16xf32> to vector<1x32x16xf32>
      tpu.vector_store %arg12[%c1_106, %c0_107, %c0_108], %961 {strides = array<i32>} : memref<2x32x16xf32, #tpu.memory_space<vmem>>, vector<1x32x16xf32>,
      %962 = vector.broadcast %951 : f32 to vector<32x16xf32>
      %963 = arith.subf %962, %937 : vector<32x16xf32>
      %964 = math.exp %963 : vector<32x16xf32>
      %c1_109 = arith.constant 1 : index
      %c0_110 = arith.constant 0 : index
      %c0_111 = arith.constant 0 : index
      %965 = vector.load %arg13[%c1_109, %c0_110, %c0_111] : memref<2x32x16xf32, #tpu.memory_space<vmem>>, vector<1x32x16xf32>
      %966 = vector.shape_cast %965 : vector<1x32x16xf32> to vector<32x16xf32>
      %967 = vector.shape_cast %964 : vector<32x16xf32> to vector<1x32x16xf32>
      tpu.vector_store %arg13[%c1_109, %c0_110, %c0_111], %967 {strides = array<i32>} : memref<2x32x16xf32, #tpu.memory_space<vmem>>, vector<1x32x16xf32>,
    } else {
    }
    %c0 = arith.constant 0 : index
    %c0_1 = arith.constant 0 : index
    %c0_2 = arith.constant 0 : index
    %3 = vector.load %arg3[%c0, %c0_1, %c0_2] : memref<1x16x3xf32, #tpu.memory_space<vmem>>, vector<1x16x3xf32>
    %4 = vector.shape_cast %3 : vector<1x16x3xf32> to vector<16x3xf32>
    %c0_3 = arith.constant 0 : index
    %c0_4 = arith.constant 0 : index
    %c0_5 = arith.constant 0 : index
    %5 = vector.load %arg5[%c0_3, %c0_4, %c0_5] : memref<1x3x16xf32, #tpu.memory_space<vmem>>, vector<1x3x16xf32>
    %6 = vector.shape_cast %5 : vector<1x3x16xf32> to vector<3x16xf32>
    %7 = vector.extract_strided_slice %4 {offsets = [0, 0], sizes = [16, 1], strides = [1, 1]} : vector<16x3xf32> to vector<16x1xf32>
    %8 = vector.extract_strided_slice %6 {offsets = [0, 0], sizes = [1, 16], strides = [1, 1]} : vector<3x16xf32> to vector<1x16xf32>
    %9 = vector.broadcast %7 : vector<16x1xf32> to vector<16x16xf32>
    %10 = vector.broadcast %8 : vector<1x16xf32> to vector<16x16xf32>
    %11 = arith.subf %9, %10 : vector<16x16xf32>
    %12 = math.absf %11 : vector<16x16xf32>
    %cst = arith.constant 0.000000e+00 : f32
    %13 = vector.broadcast %cst : f32 to vector<16x16xf32>
    %14 = arith.subf %13, %12 : vector<16x16xf32>
    %15 = math.exp %14 : vector<16x16xf32>
    %16 = vector.extract_strided_slice %4 {offsets = [0, 1], sizes = [16, 1], strides = [1, 1]} : vector<16x3xf32> to vector<16x1xf32>
    %17 = vector.extract_strided_slice %6 {offsets = [1, 0], sizes = [1, 16], strides = [1, 1]} : vector<3x16xf32> to vector<1x16xf32>
    %18 = vector.broadcast %16 : vector<16x1xf32> to vector<16x16xf32>
    %19 = vector.broadcast %17 : vector<1x16xf32> to vector<16x16xf32>
    %20 = arith.subf %18, %19 : vector<16x16xf32>
    %21 = math.absf %20 : vector<16x16xf32>
    %cst_6 = arith.constant 0.000000e+00 : f32
    %22 = vector.broadcast %cst_6 : f32 to vector<16x16xf32>
    %23 = arith.subf %22, %21 : vector<16x16xf32>
    %24 = math.exp %23 : vector<16x16xf32>
    %25 = vector.extract_strided_slice %4 {offsets = [0, 2], sizes = [16, 1], strides = [1, 1]} : vector<16x3xf32> to vector<16x1xf32>
    %26 = vector.extract_strided_slice %6 {offsets = [2, 0], sizes = [1, 16], strides = [1, 1]} : vector<3x16xf32> to vector<1x16xf32>
    %27 = vector.broadcast %25 : vector<16x1xf32> to vector<16x16xf32>
    %28 = vector.broadcast %26 : vector<1x16xf32> to vector<16x16xf32>
    %29 = arith.subf %27, %28 : vector<16x16xf32>
    %30 = math.absf %29 : vector<16x16xf32>
    %cst_7 = arith.constant 0.000000e+00 : f32
    %31 = vector.broadcast %cst_7 : f32 to vector<16x16xf32>
    %32 = arith.subf %31, %30 : vector<16x16xf32>
    %33 = math.exp %32 : vector<16x16xf32>
    %c0_8 = arith.constant 0 : index
    %c0_9 = arith.constant 0 : index
    %c0_10 = arith.constant 0 : index
    %34 = vector.load %arg2[%c0_8, %c0_9, %c0_10] : memref<1x16x32xf32, #tpu.memory_space<vmem>>, vector<1x16x32xf32>
    %35 = vector.shape_cast %34 : vector<1x16x32xf32> to vector<16x32xf32>
    %c0_11 = arith.constant 0 : index
    %c0_12 = arith.constant 0 : index
    %c0_13 = arith.constant 0 : index
    %36 = vector.load %arg6[%c0_11, %c0_12, %c0_13] : memref<2x32x32xf32, #tpu.memory_space<vmem>>, vector<1x32x32xf32>
    %37 = vector.shape_cast %36 : vector<1x32x32xf32> to vector<32x32xf32>
    %cst_14 = arith.constant dense<0.000000e+00> : vector<16x32xf32>
    %38 = tpu.matmul %35, %37, %cst_14 {dimension_numbers = #tpu.dot_dimension_numbers<[1], [0], [0], [1], [0, 0, 1, 1], [], []>} : vector<16x32xf32>, vector<32x32xf32>, vector<16x32xf32> -> vector<16x32xf32>
    %c0_15 = arith.constant 0 : index
    %c0_16 = arith.constant 0 : index
    %c0_17 = arith.constant 0 : index
    %39 = vector.load %arg15[%c0_15, %c0_16, %c0_17] : memref<2x1x1xf32, #tpu.memory_space<vmem>>, vector<1x1x1xf32>
    %40 = vector.shape_cast %39 : vector<1x1x1xf32> to vector<1x1xf32>
    %41 = vector.broadcast %40 : vector<1x1xf32> to vector<16x32xf32>
    %42 = arith.subf %38, %41 : vector<16x32xf32>
    %43 = math.exp %42 : vector<16x32xf32>
    %44 = vector.broadcast %40 : vector<1x1xf32> to vector<16x32xf32>
    %45 = arith.subf %44, %38 : vector<16x32xf32>
    %46 = math.exp %45 : vector<16x32xf32>
    %c0_18 = arith.constant 0 : index
    %c0_19 = arith.constant 0 : index
    %c0_20 = arith.constant 0 : index
    %47 = vector.load %arg12[%c0_18, %c0_19, %c0_20] : memref<2x32x16xf32, #tpu.memory_space<vmem>>, vector<1x32x16xf32>
    %48 = vector.shape_cast %47 : vector<1x32x16xf32> to vector<32x16xf32>
    %c0_21 = arith.constant 0 : index
    %c0_22 = arith.constant 0 : index
    %c0_23 = arith.constant 0 : index
    %49 = vector.load %arg13[%c0_21, %c0_22, %c0_23] : memref<2x32x16xf32, #tpu.memory_space<vmem>>, vector<1x32x16xf32>
    %50 = vector.shape_cast %49 : vector<1x32x16xf32> to vector<32x16xf32>
    %cst_24 = arith.constant 0.000000e+00 : f32
    %51 = vector.broadcast %cst_24 : f32 to vector<16x16xf32>
    %52 = vector.extract_strided_slice %43 {offsets = [0, 0], sizes = [16, 1], strides = [1, 1]} : vector<16x32xf32> to vector<16x1xf32>
    %53 = vector.extract_strided_slice %50 {offsets = [0, 0], sizes = [1, 16], strides = [1, 1]} : vector<32x16xf32> to vector<1x16xf32>
    %54 = vector.broadcast %52 : vector<16x1xf32> to vector<16x16xf32>
    %55 = vector.broadcast %53 : vector<1x16xf32> to vector<16x16xf32>
    %56 = arith.mulf %54, %55 : vector<16x16xf32>
    %57 = vector.extract_strided_slice %46 {offsets = [0, 0], sizes = [16, 1], strides = [1, 1]} : vector<16x32xf32> to vector<16x1xf32>
    %58 = vector.extract_strided_slice %48 {offsets = [0, 0], sizes = [1, 16], strides = [1, 1]} : vector<32x16xf32> to vector<1x16xf32>
    %59 = vector.broadcast %57 : vector<16x1xf32> to vector<16x16xf32>
    %60 = vector.broadcast %58 : vector<1x16xf32> to vector<16x16xf32>
    %61 = arith.mulf %59, %60 : vector<16x16xf32>
    %62 = arith.minimumf %56, %61 : vector<16x16xf32>
    %63 = arith.addf %51, %62 : vector<16x16xf32>
    %64 = vector.extract_strided_slice %43 {offsets = [0, 1], sizes = [16, 1], strides = [1, 1]} : vector<16x32xf32> to vector<16x1xf32>
    %65 = vector.extract_strided_slice %50 {offsets = [1, 0], sizes = [1, 16], strides = [1, 1]} : vector<32x16xf32> to vector<1x16xf32>
    %66 = vector.broadcast %64 : vector<16x1xf32> to vector<16x16xf32>
    %67 = vector.broadcast %65 : vector<1x16xf32> to vector<16x16xf32>
    %68 = arith.mulf %66, %67 : vector<16x16xf32>
    %69 = vector.extract_strided_slice %46 {offsets = [0, 1], sizes = [16, 1], strides = [1, 1]} : vector<16x32xf32> to vector<16x1xf32>
    %70 = vector.extract_strided_slice %48 {offsets = [1, 0], sizes = [1, 16], strides = [1, 1]} : vector<32x16xf32> to vector<1x16xf32>
    %71 = vector.broadcast %69 : vector<16x1xf32> to vector<16x16xf32>
    %72 = vector.broadcast %70 : vector<1x16xf32> to vector<16x16xf32>
    %73 = arith.mulf %71, %72 : vector<16x16xf32>
    %74 = arith.minimumf %68, %73 : vector<16x16xf32>
    %75 = arith.addf %63, %74 : vector<16x16xf32>
    %76 = vector.extract_strided_slice %43 {offsets = [0, 2], sizes = [16, 1], strides = [1, 1]} : vector<16x32xf32> to vector<16x1xf32>
    %77 = vector.extract_strided_slice %50 {offsets = [2, 0], sizes = [1, 16], strides = [1, 1]} : vector<32x16xf32> to vector<1x16xf32>
    %78 = vector.broadcast %76 : vector<16x1xf32> to vector<16x16xf32>
    %79 = vector.broadcast %77 : vector<1x16xf32> to vector<16x16xf32>
    %80 = arith.mulf %78, %79 : vector<16x16xf32>
    %81 = vector.extract_strided_slice %46 {offsets = [0, 2], sizes = [16, 1], strides = [1, 1]} : vector<16x32xf32> to vector<16x1xf32>
    %82 = vector.extract_strided_slice %48 {offsets = [2, 0], sizes = [1, 16], strides = [1, 1]} : vector<32x16xf32> to vector<1x16xf32>
    %83 = vector.broadcast %81 : vector<16x1xf32> to vector<16x16xf32>
    %84 = vector.broadcast %82 : vector<1x16xf32> to vector<16x16xf32>
    %85 = arith.mulf %83, %84 : vector<16x16xf32>
    %86 = arith.minimumf %80, %85 : vector<16x16xf32>
    %87 = arith.addf %75, %86 : vector<16x16xf32>
    %88 = vector.extract_strided_slice %43 {offsets = [0, 3], sizes = [16, 1], strides = [1, 1]} : vector<16x32xf32> to vector<16x1xf32>
    %89 = vector.extract_strided_slice %50 {offsets = [3, 0], sizes = [1, 16], strides = [1, 1]} : vector<32x16xf32> to vector<1x16xf32>
    %90 = vector.broadcast %88 : vector<16x1xf32> to vector<16x16xf32>
    %91 = vector.broadcast %89 : vector<1x16xf32> to vector<16x16xf32>
    %92 = arith.mulf %90, %91 : vector<16x16xf32>
    %93 = vector.extract_strided_slice %46 {offsets = [0, 3], sizes = [16, 1], strides = [1, 1]} : vector<16x32xf32> to vector<16x1xf32>
    %94 = vector.extract_strided_slice %48 {offsets = [3, 0], sizes = [1, 16], strides = [1, 1]} : vector<32x16xf32> to vector<1x16xf32>
    %95 = vector.broadcast %93 : vector<16x1xf32> to vector<16x16xf32>
    %96 = vector.broadcast %94 : vector<1x16xf32> to vector<16x16xf32>
    %97 = arith.mulf %95, %96 : vector<16x16xf32>
    %98 = arith.minimumf %92, %97 : vector<16x16xf32>
    %99 = arith.addf %87, %98 : vector<16x16xf32>
    %100 = vector.extract_strided_slice %43 {offsets = [0, 4], sizes = [16, 1], strides = [1, 1]} : vector<16x32xf32> to vector<16x1xf32>
    %101 = vector.extract_strided_slice %50 {offsets = [4, 0], sizes = [1, 16], strides = [1, 1]} : vector<32x16xf32> to vector<1x16xf32>
    %102 = vector.broadcast %100 : vector<16x1xf32> to vector<16x16xf32>
    %103 = vector.broadcast %101 : vector<1x16xf32> to vector<16x16xf32>
    %104 = arith.mulf %102, %103 : vector<16x16xf32>
    %105 = vector.extract_strided_slice %46 {offsets = [0, 4], sizes = [16, 1], strides = [1, 1]} : vector<16x32xf32> to vector<16x1xf32>
    %106 = vector.extract_strided_slice %48 {offsets = [4, 0], sizes = [1, 16], strides = [1, 1]} : vector<32x16xf32> to vector<1x16xf32>
    %107 = vector.broadcast %105 : vector<16x1xf32> to vector<16x16xf32>
    %108 = vector.broadcast %106 : vector<1x16xf32> to vector<16x16xf32>
    %109 = arith.mulf %107, %108 : vector<16x16xf32>
    %110 = arith.minimumf %104, %109 : vector<16x16xf32>
    %111 = arith.addf %99, %110 : vector<16x16xf32>
    %112 = vector.extract_strided_slice %43 {offsets = [0, 5], sizes = [16, 1], strides = [1, 1]} : vector<16x32xf32> to vector<16x1xf32>
    %113 = vector.extract_strided_slice %50 {offsets = [5, 0], sizes = [1, 16], strides = [1, 1]} : vector<32x16xf32> to vector<1x16xf32>
    %114 = vector.broadcast %112 : vector<16x1xf32> to vector<16x16xf32>
    %115 = vector.broadcast %113 : vector<1x16xf32> to vector<16x16xf32>
    %116 = arith.mulf %114, %115 : vector<16x16xf32>
    %117 = vector.extract_strided_slice %46 {offsets = [0, 5], sizes = [16, 1], strides = [1, 1]} : vector<16x32xf32> to vector<16x1xf32>
    %118 = vector.extract_strided_slice %48 {offsets = [5, 0], sizes = [1, 16], strides = [1, 1]} : vector<32x16xf32> to vector<1x16xf32>
    %119 = vector.broadcast %117 : vector<16x1xf32> to vector<16x16xf32>
    %120 = vector.broadcast %118 : vector<1x16xf32> to vector<16x16xf32>
    %121 = arith.mulf %119, %120 : vector<16x16xf32>
    %122 = arith.minimumf %116, %121 : vector<16x16xf32>
    %123 = arith.addf %111, %122 : vector<16x16xf32>
    %124 = vector.extract_strided_slice %43 {offsets = [0, 6], sizes = [16, 1], strides = [1, 1]} : vector<16x32xf32> to vector<16x1xf32>
    %125 = vector.extract_strided_slice %50 {offsets = [6, 0], sizes = [1, 16], strides = [1, 1]} : vector<32x16xf32> to vector<1x16xf32>
    %126 = vector.broadcast %124 : vector<16x1xf32> to vector<16x16xf32>
    %127 = vector.broadcast %125 : vector<1x16xf32> to vector<16x16xf32>
    %128 = arith.mulf %126, %127 : vector<16x16xf32>
    %129 = vector.extract_strided_slice %46 {offsets = [0, 6], sizes = [16, 1], strides = [1, 1]} : vector<16x32xf32> to vector<16x1xf32>
    %130 = vector.extract_strided_slice %48 {offsets = [6, 0], sizes = [1, 16], strides = [1, 1]} : vector<32x16xf32> to vector<1x16xf32>
    %131 = vector.broadcast %129 : vector<16x1xf32> to vector<16x16xf32>
    %132 = vector.broadcast %130 : vector<1x16xf32> to vector<16x16xf32>
    %133 = arith.mulf %131, %132 : vector<16x16xf32>
    %134 = arith.minimumf %128, %133 : vector<16x16xf32>
    %135 = arith.addf %123, %134 : vector<16x16xf32>
    %136 = vector.extract_strided_slice %43 {offsets = [0, 7], sizes = [16, 1], strides = [1, 1]} : vector<16x32xf32> to vector<16x1xf32>
    %137 = vector.extract_strided_slice %50 {offsets = [7, 0], sizes = [1, 16], strides = [1, 1]} : vector<32x16xf32> to vector<1x16xf32>
    %138 = vector.broadcast %136 : vector<16x1xf32> to vector<16x16xf32>
    %139 = vector.broadcast %137 : vector<1x16xf32> to vector<16x16xf32>
    %140 = arith.mulf %138, %139 : vector<16x16xf32>
    %141 = vector.extract_strided_slice %46 {offsets = [0, 7], sizes = [16, 1], strides = [1, 1]} : vector<16x32xf32> to vector<16x1xf32>
    %142 = vector.extract_strided_slice %48 {offsets = [7, 0], sizes = [1, 16], strides = [1, 1]} : vector<32x16xf32> to vector<1x16xf32>
    %143 = vector.broadcast %141 : vector<16x1xf32> to vector<16x16xf32>
    %144 = vector.broadcast %142 : vector<1x16xf32> to vector<16x16xf32>
    %145 = arith.mulf %143, %144 : vector<16x16xf32>
    %146 = arith.minimumf %140, %145 : vector<16x16xf32>
    %147 = arith.addf %135, %146 : vector<16x16xf32>
    %148 = vector.extract_strided_slice %43 {offsets = [0, 8], sizes = [16, 1], strides = [1, 1]} : vector<16x32xf32> to vector<16x1xf32>
    %149 = vector.extract_strided_slice %50 {offsets = [8, 0], sizes = [1, 16], strides = [1, 1]} : vector<32x16xf32> to vector<1x16xf32>
    %150 = vector.broadcast %148 : vector<16x1xf32> to vector<16x16xf32>
    %151 = vector.broadcast %149 : vector<1x16xf32> to vector<16x16xf32>
    %152 = arith.mulf %150, %151 : vector<16x16xf32>
    %153 = vector.extract_strided_slice %46 {offsets = [0, 8], sizes = [16, 1], strides = [1, 1]} : vector<16x32xf32> to vector<16x1xf32>
    %154 = vector.extract_strided_slice %48 {offsets = [8, 0], sizes = [1, 16], strides = [1, 1]} : vector<32x16xf32> to vector<1x16xf32>
    %155 = vector.broadcast %153 : vector<16x1xf32> to vector<16x16xf32>
    %156 = vector.broadcast %154 : vector<1x16xf32> to vector<16x16xf32>
    %157 = arith.mulf %155, %156 : vector<16x16xf32>
    %158 = arith.minimumf %152, %157 : vector<16x16xf32>
    %159 = arith.addf %147, %158 : vector<16x16xf32>
    %160 = vector.extract_strided_slice %43 {offsets = [0, 9], sizes = [16, 1], strides = [1, 1]} : vector<16x32xf32> to vector<16x1xf32>
    %161 = vector.extract_strided_slice %50 {offsets = [9, 0], sizes = [1, 16], strides = [1, 1]} : vector<32x16xf32> to vector<1x16xf32>
    %162 = vector.broadcast %160 : vector<16x1xf32> to vector<16x16xf32>
    %163 = vector.broadcast %161 : vector<1x16xf32> to vector<16x16xf32>
    %164 = arith.mulf %162, %163 : vector<16x16xf32>
    %165 = vector.extract_strided_slice %46 {offsets = [0, 9], sizes = [16, 1], strides = [1, 1]} : vector<16x32xf32> to vector<16x1xf32>
    %166 = vector.extract_strided_slice %48 {offsets = [9, 0], sizes = [1, 16], strides = [1, 1]} : vector<32x16xf32> to vector<1x16xf32>
    %167 = vector.broadcast %165 : vector<16x1xf32> to vector<16x16xf32>
    %168 = vector.broadcast %166 : vector<1x16xf32> to vector<16x16xf32>
    %169 = arith.mulf %167, %168 : vector<16x16xf32>
    %170 = arith.minimumf %164, %169 : vector<16x16xf32>
    %171 = arith.addf %159, %170 : vector<16x16xf32>
    %172 = vector.extract_strided_slice %43 {offsets = [0, 10], sizes = [16, 1], strides = [1, 1]} : vector<16x32xf32> to vector<16x1xf32>
    %173 = vector.extract_strided_slice %50 {offsets = [10, 0], sizes = [1, 16], strides = [1, 1]} : vector<32x16xf32> to vector<1x16xf32>
    %174 = vector.broadcast %172 : vector<16x1xf32> to vector<16x16xf32>
    %175 = vector.broadcast %173 : vector<1x16xf32> to vector<16x16xf32>
    %176 = arith.mulf %174, %175 : vector<16x16xf32>
    %177 = vector.extract_strided_slice %46 {offsets = [0, 10], sizes = [16, 1], strides = [1, 1]} : vector<16x32xf32> to vector<16x1xf32>
    %178 = vector.extract_strided_slice %48 {offsets = [10, 0], sizes = [1, 16], strides = [1, 1]} : vector<32x16xf32> to vector<1x16xf32>
    %179 = vector.broadcast %177 : vector<16x1xf32> to vector<16x16xf32>
    %180 = vector.broadcast %178 : vector<1x16xf32> to vector<16x16xf32>
    %181 = arith.mulf %179, %180 : vector<16x16xf32>
    %182 = arith.minimumf %176, %181 : vector<16x16xf32>
    %183 = arith.addf %171, %182 : vector<16x16xf32>
    %184 = vector.extract_strided_slice %43 {offsets = [0, 11], sizes = [16, 1], strides = [1, 1]} : vector<16x32xf32> to vector<16x1xf32>
    %185 = vector.extract_strided_slice %50 {offsets = [11, 0], sizes = [1, 16], strides = [1, 1]} : vector<32x16xf32> to vector<1x16xf32>
    %186 = vector.broadcast %184 : vector<16x1xf32> to vector<16x16xf32>
    %187 = vector.broadcast %185 : vector<1x16xf32> to vector<16x16xf32>
    %188 = arith.mulf %186, %187 : vector<16x16xf32>
    %189 = vector.extract_strided_slice %46 {offsets = [0, 11], sizes = [16, 1], strides = [1, 1]} : vector<16x32xf32> to vector<16x1xf32>
    %190 = vector.extract_strided_slice %48 {offsets = [11, 0], sizes = [1, 16], strides = [1, 1]} : vector<32x16xf32> to vector<1x16xf32>
    %191 = vector.broadcast %189 : vector<16x1xf32> to vector<16x16xf32>
    %192 = vector.broadcast %190 : vector<1x16xf32> to vector<16x16xf32>
    %193 = arith.mulf %191, %192 : vector<16x16xf32>
    %194 = arith.minimumf %188, %193 : vector<16x16xf32>
    %195 = arith.addf %183, %194 : vector<16x16xf32>
    %196 = vector.extract_strided_slice %43 {offsets = [0, 12], sizes = [16, 1], strides = [1, 1]} : vector<16x32xf32> to vector<16x1xf32>
    %197 = vector.extract_strided_slice %50 {offsets = [12, 0], sizes = [1, 16], strides = [1, 1]} : vector<32x16xf32> to vector<1x16xf32>
    %198 = vector.broadcast %196 : vector<16x1xf32> to vector<16x16xf32>
    %199 = vector.broadcast %197 : vector<1x16xf32> to vector<16x16xf32>
    %200 = arith.mulf %198, %199 : vector<16x16xf32>
    %201 = vector.extract_strided_slice %46 {offsets = [0, 12], sizes = [16, 1], strides = [1, 1]} : vector<16x32xf32> to vector<16x1xf32>
    %202 = vector.extract_strided_slice %48 {offsets = [12, 0], sizes = [1, 16], strides = [1, 1]} : vector<32x16xf32> to vector<1x16xf32>
    %203 = vector.broadcast %201 : vector<16x1xf32> to vector<16x16xf32>
    %204 = vector.broadcast %202 : vector<1x16xf32> to vector<16x16xf32>
    %205 = arith.mulf %203, %204 : vector<16x16xf32>
    %206 = arith.minimumf %200, %205 : vector<16x16xf32>
    %207 = arith.addf %195, %206 : vector<16x16xf32>
    %208 = vector.extract_strided_slice %43 {offsets = [0, 13], sizes = [16, 1], strides = [1, 1]} : vector<16x32xf32> to vector<16x1xf32>
    %209 = vector.extract_strided_slice %50 {offsets = [13, 0], sizes = [1, 16], strides = [1, 1]} : vector<32x16xf32> to vector<1x16xf32>
    %210 = vector.broadcast %208 : vector<16x1xf32> to vector<16x16xf32>
    %211 = vector.broadcast %209 : vector<1x16xf32> to vector<16x16xf32>
    %212 = arith.mulf %210, %211 : vector<16x16xf32>
    %213 = vector.extract_strided_slice %46 {offsets = [0, 13], sizes = [16, 1], strides = [1, 1]} : vector<16x32xf32> to vector<16x1xf32>
    %214 = vector.extract_strided_slice %48 {offsets = [13, 0], sizes = [1, 16], strides = [1, 1]} : vector<32x16xf32> to vector<1x16xf32>
    %215 = vector.broadcast %213 : vector<16x1xf32> to vector<16x16xf32>
    %216 = vector.broadcast %214 : vector<1x16xf32> to vector<16x16xf32>
    %217 = arith.mulf %215, %216 : vector<16x16xf32>
    %218 = arith.minimumf %212, %217 : vector<16x16xf32>
    %219 = arith.addf %207, %218 : vector<16x16xf32>
    %220 = vector.extract_strided_slice %43 {offsets = [0, 14], sizes = [16, 1], strides = [1, 1]} : vector<16x32xf32> to vector<16x1xf32>
    %221 = vector.extract_strided_slice %50 {offsets = [14, 0], sizes = [1, 16], strides = [1, 1]} : vector<32x16xf32> to vector<1x16xf32>
    %222 = vector.broadcast %220 : vector<16x1xf32> to vector<16x16xf32>
    %223 = vector.broadcast %221 : vector<1x16xf32> to vector<16x16xf32>
    %224 = arith.mulf %222, %223 : vector<16x16xf32>
    %225 = vector.extract_strided_slice %46 {offsets = [0, 14], sizes = [16, 1], strides = [1, 1]} : vector<16x32xf32> to vector<16x1xf32>
    %226 = vector.extract_strided_slice %48 {offsets = [14, 0], sizes = [1, 16], strides = [1, 1]} : vector<32x16xf32> to vector<1x16xf32>
    %227 = vector.broadcast %225 : vector<16x1xf32> to vector<16x16xf32>
    %228 = vector.broadcast %226 : vector<1x16xf32> to vector<16x16xf32>
    %229 = arith.mulf %227, %228 : vector<16x16xf32>
    %230 = arith.minimumf %224, %229 : vector<16x16xf32>
    %231 = arith.addf %219, %230 : vector<16x16xf32>
    %232 = vector.extract_strided_slice %43 {offsets = [0, 15], sizes = [16, 1], strides = [1, 1]} : vector<16x32xf32> to vector<16x1xf32>
    %233 = vector.extract_strided_slice %50 {offsets = [15, 0], sizes = [1, 16], strides = [1, 1]} : vector<32x16xf32> to vector<1x16xf32>
    %234 = vector.broadcast %232 : vector<16x1xf32> to vector<16x16xf32>
    %235 = vector.broadcast %233 : vector<1x16xf32> to vector<16x16xf32>
    %236 = arith.mulf %234, %235 : vector<16x16xf32>
    %237 = vector.extract_strided_slice %46 {offsets = [0, 15], sizes = [16, 1], strides = [1, 1]} : vector<16x32xf32> to vector<16x1xf32>
    %238 = vector.extract_strided_slice %48 {offsets = [15, 0], sizes = [1, 16], strides = [1, 1]} : vector<32x16xf32> to vector<1x16xf32>
    %239 = vector.broadcast %237 : vector<16x1xf32> to vector<16x16xf32>
    %240 = vector.broadcast %238 : vector<1x16xf32> to vector<16x16xf32>
    %241 = arith.mulf %239, %240 : vector<16x16xf32>
    %242 = arith.minimumf %236, %241 : vector<16x16xf32>
    %243 = arith.addf %231, %242 : vector<16x16xf32>
    %244 = vector.extract_strided_slice %43 {offsets = [0, 16], sizes = [16, 1], strides = [1, 1]} : vector<16x32xf32> to vector<16x1xf32>
    %245 = vector.extract_strided_slice %50 {offsets = [16, 0], sizes = [1, 16], strides = [1, 1]} : vector<32x16xf32> to vector<1x16xf32>
    %246 = vector.broadcast %244 : vector<16x1xf32> to vector<16x16xf32>
    %247 = vector.broadcast %245 : vector<1x16xf32> to vector<16x16xf32>
    %248 = arith.mulf %246, %247 : vector<16x16xf32>
    %249 = vector.extract_strided_slice %46 {offsets = [0, 16], sizes = [16, 1], strides = [1, 1]} : vector<16x32xf32> to vector<16x1xf32>
    %250 = vector.extract_strided_slice %48 {offsets = [16, 0], sizes = [1, 16], strides = [1, 1]} : vector<32x16xf32> to vector<1x16xf32>
    %251 = vector.broadcast %249 : vector<16x1xf32> to vector<16x16xf32>
    %252 = vector.broadcast %250 : vector<1x16xf32> to vector<16x16xf32>
    %253 = arith.mulf %251, %252 : vector<16x16xf32>
    %254 = arith.minimumf %248, %253 : vector<16x16xf32>
    %255 = arith.addf %243, %254 : vector<16x16xf32>
    %256 = vector.extract_strided_slice %43 {offsets = [0, 17], sizes = [16, 1], strides = [1, 1]} : vector<16x32xf32> to vector<16x1xf32>
    %257 = vector.extract_strided_slice %50 {offsets = [17, 0], sizes = [1, 16], strides = [1, 1]} : vector<32x16xf32> to vector<1x16xf32>
    %258 = vector.broadcast %256 : vector<16x1xf32> to vector<16x16xf32>
    %259 = vector.broadcast %257 : vector<1x16xf32> to vector<16x16xf32>
    %260 = arith.mulf %258, %259 : vector<16x16xf32>
    %261 = vector.extract_strided_slice %46 {offsets = [0, 17], sizes = [16, 1], strides = [1, 1]} : vector<16x32xf32> to vector<16x1xf32>
    %262 = vector.extract_strided_slice %48 {offsets = [17, 0], sizes = [1, 16], strides = [1, 1]} : vector<32x16xf32> to vector<1x16xf32>
    %263 = vector.broadcast %261 : vector<16x1xf32> to vector<16x16xf32>
    %264 = vector.broadcast %262 : vector<1x16xf32> to vector<16x16xf32>
    %265 = arith.mulf %263, %264 : vector<16x16xf32>
    %266 = arith.minimumf %260, %265 : vector<16x16xf32>
    %267 = arith.addf %255, %266 : vector<16x16xf32>
    %268 = vector.extract_strided_slice %43 {offsets = [0, 18], sizes = [16, 1], strides = [1, 1]} : vector<16x32xf32> to vector<16x1xf32>
    %269 = vector.extract_strided_slice %50 {offsets = [18, 0], sizes = [1, 16], strides = [1, 1]} : vector<32x16xf32> to vector<1x16xf32>
    %270 = vector.broadcast %268 : vector<16x1xf32> to vector<16x16xf32>
    %271 = vector.broadcast %269 : vector<1x16xf32> to vector<16x16xf32>
    %272 = arith.mulf %270, %271 : vector<16x16xf32>
    %273 = vector.extract_strided_slice %46 {offsets = [0, 18], sizes = [16, 1], strides = [1, 1]} : vector<16x32xf32> to vector<16x1xf32>
    %274 = vector.extract_strided_slice %48 {offsets = [18, 0], sizes = [1, 16], strides = [1, 1]} : vector<32x16xf32> to vector<1x16xf32>
    %275 = vector.broadcast %273 : vector<16x1xf32> to vector<16x16xf32>
    %276 = vector.broadcast %274 : vector<1x16xf32> to vector<16x16xf32>
    %277 = arith.mulf %275, %276 : vector<16x16xf32>
    %278 = arith.minimumf %272, %277 : vector<16x16xf32>
    %279 = arith.addf %267, %278 : vector<16x16xf32>
    %280 = vector.extract_strided_slice %43 {offsets = [0, 19], sizes = [16, 1], strides = [1, 1]} : vector<16x32xf32> to vector<16x1xf32>
    %281 = vector.extract_strided_slice %50 {offsets = [19, 0], sizes = [1, 16], strides = [1, 1]} : vector<32x16xf32> to vector<1x16xf32>
    %282 = vector.broadcast %280 : vector<16x1xf32> to vector<16x16xf32>
    %283 = vector.broadcast %281 : vector<1x16xf32> to vector<16x16xf32>
    %284 = arith.mulf %282, %283 : vector<16x16xf32>
    %285 = vector.extract_strided_slice %46 {offsets = [0, 19], sizes = [16, 1], strides = [1, 1]} : vector<16x32xf32> to vector<16x1xf32>
    %286 = vector.extract_strided_slice %48 {offsets = [19, 0], sizes = [1, 16], strides = [1, 1]} : vector<32x16xf32> to vector<1x16xf32>
    %287 = vector.broadcast %285 : vector<16x1xf32> to vector<16x16xf32>
    %288 = vector.broadcast %286 : vector<1x16xf32> to vector<16x16xf32>
    %289 = arith.mulf %287, %288 : vector<16x16xf32>
    %290 = arith.minimumf %284, %289 : vector<16x16xf32>
    %291 = arith.addf %279, %290 : vector<16x16xf32>
    %292 = vector.extract_strided_slice %43 {offsets = [0, 20], sizes = [16, 1], strides = [1, 1]} : vector<16x32xf32> to vector<16x1xf32>
    %293 = vector.extract_strided_slice %50 {offsets = [20, 0], sizes = [1, 16], strides = [1, 1]} : vector<32x16xf32> to vector<1x16xf32>
    %294 = vector.broadcast %292 : vector<16x1xf32> to vector<16x16xf32>
    %295 = vector.broadcast %293 : vector<1x16xf32> to vector<16x16xf32>
    %296 = arith.mulf %294, %295 : vector<16x16xf32>
    %297 = vector.extract_strided_slice %46 {offsets = [0, 20], sizes = [16, 1], strides = [1, 1]} : vector<16x32xf32> to vector<16x1xf32>
    %298 = vector.extract_strided_slice %48 {offsets = [20, 0], sizes = [1, 16], strides = [1, 1]} : vector<32x16xf32> to vector<1x16xf32>
    %299 = vector.broadcast %297 : vector<16x1xf32> to vector<16x16xf32>
    %300 = vector.broadcast %298 : vector<1x16xf32> to vector<16x16xf32>
    %301 = arith.mulf %299, %300 : vector<16x16xf32>
    %302 = arith.minimumf %296, %301 : vector<16x16xf32>
    %303 = arith.addf %291, %302 : vector<16x16xf32>
    %304 = vector.extract_strided_slice %43 {offsets = [0, 21], sizes = [16, 1], strides = [1, 1]} : vector<16x32xf32> to vector<16x1xf32>
    %305 = vector.extract_strided_slice %50 {offsets = [21, 0], sizes = [1, 16], strides = [1, 1]} : vector<32x16xf32> to vector<1x16xf32>
    %306 = vector.broadcast %304 : vector<16x1xf32> to vector<16x16xf32>
    %307 = vector.broadcast %305 : vector<1x16xf32> to vector<16x16xf32>
    %308 = arith.mulf %306, %307 : vector<16x16xf32>
    %309 = vector.extract_strided_slice %46 {offsets = [0, 21], sizes = [16, 1], strides = [1, 1]} : vector<16x32xf32> to vector<16x1xf32>
    %310 = vector.extract_strided_slice %48 {offsets = [21, 0], sizes = [1, 16], strides = [1, 1]} : vector<32x16xf32> to vector<1x16xf32>
    %311 = vector.broadcast %309 : vector<16x1xf32> to vector<16x16xf32>
    %312 = vector.broadcast %310 : vector<1x16xf32> to vector<16x16xf32>
    %313 = arith.mulf %311, %312 : vector<16x16xf32>
    %314 = arith.minimumf %308, %313 : vector<16x16xf32>
    %315 = arith.addf %303, %314 : vector<16x16xf32>
    %316 = vector.extract_strided_slice %43 {offsets = [0, 22], sizes = [16, 1], strides = [1, 1]} : vector<16x32xf32> to vector<16x1xf32>
    %317 = vector.extract_strided_slice %50 {offsets = [22, 0], sizes = [1, 16], strides = [1, 1]} : vector<32x16xf32> to vector<1x16xf32>
    %318 = vector.broadcast %316 : vector<16x1xf32> to vector<16x16xf32>
    %319 = vector.broadcast %317 : vector<1x16xf32> to vector<16x16xf32>
    %320 = arith.mulf %318, %319 : vector<16x16xf32>
    %321 = vector.extract_strided_slice %46 {offsets = [0, 22], sizes = [16, 1], strides = [1, 1]} : vector<16x32xf32> to vector<16x1xf32>
    %322 = vector.extract_strided_slice %48 {offsets = [22, 0], sizes = [1, 16], strides = [1, 1]} : vector<32x16xf32> to vector<1x16xf32>
    %323 = vector.broadcast %321 : vector<16x1xf32> to vector<16x16xf32>
    %324 = vector.broadcast %322 : vector<1x16xf32> to vector<16x16xf32>
    %325 = arith.mulf %323, %324 : vector<16x16xf32>
    %326 = arith.minimumf %320, %325 : vector<16x16xf32>
    %327 = arith.addf %315, %326 : vector<16x16xf32>
    %328 = vector.extract_strided_slice %43 {offsets = [0, 23], sizes = [16, 1], strides = [1, 1]} : vector<16x32xf32> to vector<16x1xf32>
    %329 = vector.extract_strided_slice %50 {offsets = [23, 0], sizes = [1, 16], strides = [1, 1]} : vector<32x16xf32> to vector<1x16xf32>
    %330 = vector.broadcast %328 : vector<16x1xf32> to vector<16x16xf32>
    %331 = vector.broadcast %329 : vector<1x16xf32> to vector<16x16xf32>
    %332 = arith.mulf %330, %331 : vector<16x16xf32>
    %333 = vector.extract_strided_slice %46 {offsets = [0, 23], sizes = [16, 1], strides = [1, 1]} : vector<16x32xf32> to vector<16x1xf32>
    %334 = vector.extract_strided_slice %48 {offsets = [23, 0], sizes = [1, 16], strides = [1, 1]} : vector<32x16xf32> to vector<1x16xf32>
    %335 = vector.broadcast %333 : vector<16x1xf32> to vector<16x16xf32>
    %336 = vector.broadcast %334 : vector<1x16xf32> to vector<16x16xf32>
    %337 = arith.mulf %335, %336 : vector<16x16xf32>
    %338 = arith.minimumf %332, %337 : vector<16x16xf32>
    %339 = arith.addf %327, %338 : vector<16x16xf32>
    %340 = vector.extract_strided_slice %43 {offsets = [0, 24], sizes = [16, 1], strides = [1, 1]} : vector<16x32xf32> to vector<16x1xf32>
    %341 = vector.extract_strided_slice %50 {offsets = [24, 0], sizes = [1, 16], strides = [1, 1]} : vector<32x16xf32> to vector<1x16xf32>
    %342 = vector.broadcast %340 : vector<16x1xf32> to vector<16x16xf32>
    %343 = vector.broadcast %341 : vector<1x16xf32> to vector<16x16xf32>
    %344 = arith.mulf %342, %343 : vector<16x16xf32>
    %345 = vector.extract_strided_slice %46 {offsets = [0, 24], sizes = [16, 1], strides = [1, 1]} : vector<16x32xf32> to vector<16x1xf32>
    %346 = vector.extract_strided_slice %48 {offsets = [24, 0], sizes = [1, 16], strides = [1, 1]} : vector<32x16xf32> to vector<1x16xf32>
    %347 = vector.broadcast %345 : vector<16x1xf32> to vector<16x16xf32>
    %348 = vector.broadcast %346 : vector<1x16xf32> to vector<16x16xf32>
    %349 = arith.mulf %347, %348 : vector<16x16xf32>
    %350 = arith.minimumf %344, %349 : vector<16x16xf32>
    %351 = arith.addf %339, %350 : vector<16x16xf32>
    %352 = vector.extract_strided_slice %43 {offsets = [0, 25], sizes = [16, 1], strides = [1, 1]} : vector<16x32xf32> to vector<16x1xf32>
    %353 = vector.extract_strided_slice %50 {offsets = [25, 0], sizes = [1, 16], strides = [1, 1]} : vector<32x16xf32> to vector<1x16xf32>
    %354 = vector.broadcast %352 : vector<16x1xf32> to vector<16x16xf32>
    %355 = vector.broadcast %353 : vector<1x16xf32> to vector<16x16xf32>
    %356 = arith.mulf %354, %355 : vector<16x16xf32>
    %357 = vector.extract_strided_slice %46 {offsets = [0, 25], sizes = [16, 1], strides = [1, 1]} : vector<16x32xf32> to vector<16x1xf32>
    %358 = vector.extract_strided_slice %48 {offsets = [25, 0], sizes = [1, 16], strides = [1, 1]} : vector<32x16xf32> to vector<1x16xf32>
    %359 = vector.broadcast %357 : vector<16x1xf32> to vector<16x16xf32>
    %360 = vector.broadcast %358 : vector<1x16xf32> to vector<16x16xf32>
    %361 = arith.mulf %359, %360 : vector<16x16xf32>
    %362 = arith.minimumf %356, %361 : vector<16x16xf32>
    %363 = arith.addf %351, %362 : vector<16x16xf32>
    %364 = vector.extract_strided_slice %43 {offsets = [0, 26], sizes = [16, 1], strides = [1, 1]} : vector<16x32xf32> to vector<16x1xf32>
    %365 = vector.extract_strided_slice %50 {offsets = [26, 0], sizes = [1, 16], strides = [1, 1]} : vector<32x16xf32> to vector<1x16xf32>
    %366 = vector.broadcast %364 : vector<16x1xf32> to vector<16x16xf32>
    %367 = vector.broadcast %365 : vector<1x16xf32> to vector<16x16xf32>
    %368 = arith.mulf %366, %367 : vector<16x16xf32>
    %369 = vector.extract_strided_slice %46 {offsets = [0, 26], sizes = [16, 1], strides = [1, 1]} : vector<16x32xf32> to vector<16x1xf32>
    %370 = vector.extract_strided_slice %48 {offsets = [26, 0], sizes = [1, 16], strides = [1, 1]} : vector<32x16xf32> to vector<1x16xf32>
    %371 = vector.broadcast %369 : vector<16x1xf32> to vector<16x16xf32>
    %372 = vector.broadcast %370 : vector<1x16xf32> to vector<16x16xf32>
    %373 = arith.mulf %371, %372 : vector<16x16xf32>
    %374 = arith.minimumf %368, %373 : vector<16x16xf32>
    %375 = arith.addf %363, %374 : vector<16x16xf32>
    %376 = vector.extract_strided_slice %43 {offsets = [0, 27], sizes = [16, 1], strides = [1, 1]} : vector<16x32xf32> to vector<16x1xf32>
    %377 = vector.extract_strided_slice %50 {offsets = [27, 0], sizes = [1, 16], strides = [1, 1]} : vector<32x16xf32> to vector<1x16xf32>
    %378 = vector.broadcast %376 : vector<16x1xf32> to vector<16x16xf32>
    %379 = vector.broadcast %377 : vector<1x16xf32> to vector<16x16xf32>
    %380 = arith.mulf %378, %379 : vector<16x16xf32>
    %381 = vector.extract_strided_slice %46 {offsets = [0, 27], sizes = [16, 1], strides = [1, 1]} : vector<16x32xf32> to vector<16x1xf32>
    %382 = vector.extract_strided_slice %48 {offsets = [27, 0], sizes = [1, 16], strides = [1, 1]} : vector<32x16xf32> to vector<1x16xf32>
    %383 = vector.broadcast %381 : vector<16x1xf32> to vector<16x16xf32>
    %384 = vector.broadcast %382 : vector<1x16xf32> to vector<16x16xf32>
    %385 = arith.mulf %383, %384 : vector<16x16xf32>
    %386 = arith.minimumf %380, %385 : vector<16x16xf32>
    %387 = arith.addf %375, %386 : vector<16x16xf32>
    %388 = vector.extract_strided_slice %43 {offsets = [0, 28], sizes = [16, 1], strides = [1, 1]} : vector<16x32xf32> to vector<16x1xf32>
    %389 = vector.extract_strided_slice %50 {offsets = [28, 0], sizes = [1, 16], strides = [1, 1]} : vector<32x16xf32> to vector<1x16xf32>
    %390 = vector.broadcast %388 : vector<16x1xf32> to vector<16x16xf32>
    %391 = vector.broadcast %389 : vector<1x16xf32> to vector<16x16xf32>
    %392 = arith.mulf %390, %391 : vector<16x16xf32>
    %393 = vector.extract_strided_slice %46 {offsets = [0, 28], sizes = [16, 1], strides = [1, 1]} : vector<16x32xf32> to vector<16x1xf32>
    %394 = vector.extract_strided_slice %48 {offsets = [28, 0], sizes = [1, 16], strides = [1, 1]} : vector<32x16xf32> to vector<1x16xf32>
    %395 = vector.broadcast %393 : vector<16x1xf32> to vector<16x16xf32>
    %396 = vector.broadcast %394 : vector<1x16xf32> to vector<16x16xf32>
    %397 = arith.mulf %395, %396 : vector<16x16xf32>
    %398 = arith.minimumf %392, %397 : vector<16x16xf32>
    %399 = arith.addf %387, %398 : vector<16x16xf32>
    %400 = vector.extract_strided_slice %43 {offsets = [0, 29], sizes = [16, 1], strides = [1, 1]} : vector<16x32xf32> to vector<16x1xf32>
    %401 = vector.extract_strided_slice %50 {offsets = [29, 0], sizes = [1, 16], strides = [1, 1]} : vector<32x16xf32> to vector<1x16xf32>
    %402 = vector.broadcast %400 : vector<16x1xf32> to vector<16x16xf32>
    %403 = vector.broadcast %401 : vector<1x16xf32> to vector<16x16xf32>
    %404 = arith.mulf %402, %403 : vector<16x16xf32>
    %405 = vector.extract_strided_slice %46 {offsets = [0, 29], sizes = [16, 1], strides = [1, 1]} : vector<16x32xf32> to vector<16x1xf32>
    %406 = vector.extract_strided_slice %48 {offsets = [29, 0], sizes = [1, 16], strides = [1, 1]} : vector<32x16xf32> to vector<1x16xf32>
    %407 = vector.broadcast %405 : vector<16x1xf32> to vector<16x16xf32>
    %408 = vector.broadcast %406 : vector<1x16xf32> to vector<16x16xf32>
    %409 = arith.mulf %407, %408 : vector<16x16xf32>
    %410 = arith.minimumf %404, %409 : vector<16x16xf32>
    %411 = arith.addf %399, %410 : vector<16x16xf32>
    %412 = vector.extract_strided_slice %43 {offsets = [0, 30], sizes = [16, 1], strides = [1, 1]} : vector<16x32xf32> to vector<16x1xf32>
    %413 = vector.extract_strided_slice %50 {offsets = [30, 0], sizes = [1, 16], strides = [1, 1]} : vector<32x16xf32> to vector<1x16xf32>
    %414 = vector.broadcast %412 : vector<16x1xf32> to vector<16x16xf32>
    %415 = vector.broadcast %413 : vector<1x16xf32> to vector<16x16xf32>
    %416 = arith.mulf %414, %415 : vector<16x16xf32>
    %417 = vector.extract_strided_slice %46 {offsets = [0, 30], sizes = [16, 1], strides = [1, 1]} : vector<16x32xf32> to vector<16x1xf32>
    %418 = vector.extract_strided_slice %48 {offsets = [30, 0], sizes = [1, 16], strides = [1, 1]} : vector<32x16xf32> to vector<1x16xf32>
    %419 = vector.broadcast %417 : vector<16x1xf32> to vector<16x16xf32>
    %420 = vector.broadcast %418 : vector<1x16xf32> to vector<16x16xf32>
    %421 = arith.mulf %419, %420 : vector<16x16xf32>
    %422 = arith.minimumf %416, %421 : vector<16x16xf32>
    %423 = arith.addf %411, %422 : vector<16x16xf32>
    %424 = vector.extract_strided_slice %43 {offsets = [0, 31], sizes = [16, 1], strides = [1, 1]} : vector<16x32xf32> to vector<16x1xf32>
    %425 = vector.extract_strided_slice %50 {offsets = [31, 0], sizes = [1, 16], strides = [1, 1]} : vector<32x16xf32> to vector<1x16xf32>
    %426 = vector.broadcast %424 : vector<16x1xf32> to vector<16x16xf32>
    %427 = vector.broadcast %425 : vector<1x16xf32> to vector<16x16xf32>
    %428 = arith.mulf %426, %427 : vector<16x16xf32>
    %429 = vector.extract_strided_slice %46 {offsets = [0, 31], sizes = [16, 1], strides = [1, 1]} : vector<16x32xf32> to vector<16x1xf32>
    %430 = vector.extract_strided_slice %48 {offsets = [31, 0], sizes = [1, 16], strides = [1, 1]} : vector<32x16xf32> to vector<1x16xf32>
    %431 = vector.broadcast %429 : vector<16x1xf32> to vector<16x16xf32>
    %432 = vector.broadcast %430 : vector<1x16xf32> to vector<16x16xf32>
    %433 = arith.mulf %431, %432 : vector<16x16xf32>
    %434 = arith.minimumf %428, %433 : vector<16x16xf32>
    %435 = arith.addf %423, %434 : vector<16x16xf32>
    %c0_25 = arith.constant 0 : index
    %c0_26 = arith.constant 0 : index
    %436 = memref.load %arg8[%c0_25, %c0_26] : memref<2x3xf32, #tpu.memory_space<smem>>
    %437 = vector.broadcast %436 : f32 to vector<16x16xf32>
    %438 = arith.mulf %437, %15 : vector<16x16xf32>
    %c0_27 = arith.constant 0 : index
    %c1 = arith.constant 1 : index
    %439 = memref.load %arg8[%c0_27, %c1] : memref<2x3xf32, #tpu.memory_space<smem>>
    %440 = vector.broadcast %439 : f32 to vector<16x16xf32>
    %441 = arith.mulf %440, %24 : vector<16x16xf32>
    %442 = arith.addf %438, %441 : vector<16x16xf32>
    %c0_28 = arith.constant 0 : index
    %c2 = arith.constant 2 : index
    %443 = memref.load %arg8[%c0_28, %c2] : memref<2x3xf32, #tpu.memory_space<smem>>
    %444 = vector.broadcast %443 : f32 to vector<16x16xf32>
    %445 = arith.mulf %444, %33 : vector<16x16xf32>
    %446 = arith.addf %442, %445 : vector<16x16xf32>
    %447 = arith.addf %435, %446 : vector<16x16xf32>
    %cst_29 = arith.constant 3.125000e-02 : f32
    %448 = vector.broadcast %cst_29 : f32 to vector<16x16xf32>
    %449 = arith.mulf %447, %448 : vector<16x16xf32>
    %cst_30 = arith.constant dense<0xFF800000> : vector<16xf32>
    %450 = vector.multi_reduction <maximumf>, %449, %cst_30 [1] : vector<16x16xf32> to vector<16xf32>
    %451 = vector.shape_cast %450 : vector<16xf32> to vector<16x1xf32>
    %452 = vector.broadcast %451 : vector<16x1xf32> to vector<16x16xf32>
    %453 = arith.subf %449, %452 : vector<16x16xf32>
    %454 = math.exp %453 : vector<16x16xf32>
    %cst_31 = arith.constant dense<0.000000e+00> : vector<16xf32>
    %455 = vector.multi_reduction <add>, %454, %cst_31 [1] : vector<16x16xf32> to vector<16xf32>
    %456 = vector.shape_cast %455 : vector<16xf32> to vector<16x1xf32>
    %c0_32 = arith.constant 0 : index
    %c0_33 = arith.constant 0 : index
    %c0_34 = arith.constant 0 : index
    %457 = vector.load %arg14[%c0_32, %c0_33, %c0_34] : memref<2x32x16xf32, #tpu.memory_space<vmem>>, vector<1x32x16xf32>
    %458 = vector.shape_cast %457 : vector<1x32x16xf32> to vector<32x16xf32>
    %cst_35 = arith.constant dense<0.000000e+00> : vector<16x32xf32>
    %459 = tpu.matmul %454, %458, %cst_35 {dimension_numbers = #tpu.dot_dimension_numbers<[1], [1], [0], [0], [0, 0, 1, 0], [], []>} : vector<16x16xf32>, vector<32x16xf32>, vector<16x32xf32> -> vector<16x32xf32>
    %460 = tpu.reciprocal %456 {approx = true} : vector<16x1xf32> -> vector<16x1xf32>
    %461 = vector.broadcast %460 : vector<16x1xf32> to vector<16x32xf32>
    %462 = arith.mulf %459, %461 : vector<16x32xf32>
    %c1_36 = arith.constant 1 : index
    %c0_37 = arith.constant 0 : index
    %c0_38 = arith.constant 0 : index
    %463 = vector.load %arg6[%c1_36, %c0_37, %c0_38] : memref<2x32x32xf32, #tpu.memory_space<vmem>>, vector<1x32x32xf32>
    %464 = vector.shape_cast %463 : vector<1x32x32xf32> to vector<32x32xf32>
    %cst_39 = arith.constant dense<0.000000e+00> : vector<16x32xf32>
    %465 = tpu.matmul %462, %464, %cst_39 {dimension_numbers = #tpu.dot_dimension_numbers<[1], [0], [0], [1], [0, 0, 1, 1], [], []>} : vector<16x32xf32>, vector<32x32xf32>, vector<16x32xf32> -> vector<16x32xf32>
    %c1_40 = arith.constant 1 : index
    %c0_41 = arith.constant 0 : index
    %c0_42 = arith.constant 0 : index
    %466 = vector.load %arg15[%c1_40, %c0_41, %c0_42] : memref<2x1x1xf32, #tpu.memory_space<vmem>>, vector<1x1x1xf32>
    %467 = vector.shape_cast %466 : vector<1x1x1xf32> to vector<1x1xf32>
    %468 = vector.broadcast %467 : vector<1x1xf32> to vector<16x32xf32>
    %469 = arith.subf %465, %468 : vector<16x32xf32>
    %470 = math.exp %469 : vector<16x32xf32>
    %471 = vector.broadcast %467 : vector<1x1xf32> to vector<16x32xf32>
    %472 = arith.subf %471, %465 : vector<16x32xf32>
    %473 = math.exp %472 : vector<16x32xf32>
    %c1_43 = arith.constant 1 : index
    %c0_44 = arith.constant 0 : index
    %c0_45 = arith.constant 0 : index
    %474 = vector.load %arg12[%c1_43, %c0_44, %c0_45] : memref<2x32x16xf32, #tpu.memory_space<vmem>>, vector<1x32x16xf32>
    %475 = vector.shape_cast %474 : vector<1x32x16xf32> to vector<32x16xf32>
    %c1_46 = arith.constant 1 : index
    %c0_47 = arith.constant 0 : index
    %c0_48 = arith.constant 0 : index
    %476 = vector.load %arg13[%c1_46, %c0_47, %c0_48] : memref<2x32x16xf32, #tpu.memory_space<vmem>>, vector<1x32x16xf32>
    %477 = vector.shape_cast %476 : vector<1x32x16xf32> to vector<32x16xf32>
    %cst_49 = arith.constant 0.000000e+00 : f32
    %478 = vector.broadcast %cst_49 : f32 to vector<16x16xf32>
    %479 = vector.extract_strided_slice %470 {offsets = [0, 0], sizes = [16, 1], strides = [1, 1]} : vector<16x32xf32> to vector<16x1xf32>
    %480 = vector.extract_strided_slice %477 {offsets = [0, 0], sizes = [1, 16], strides = [1, 1]} : vector<32x16xf32> to vector<1x16xf32>
    %481 = vector.broadcast %479 : vector<16x1xf32> to vector<16x16xf32>
    %482 = vector.broadcast %480 : vector<1x16xf32> to vector<16x16xf32>
    %483 = arith.mulf %481, %482 : vector<16x16xf32>
    %484 = vector.extract_strided_slice %473 {offsets = [0, 0], sizes = [16, 1], strides = [1, 1]} : vector<16x32xf32> to vector<16x1xf32>
    %485 = vector.extract_strided_slice %475 {offsets = [0, 0], sizes = [1, 16], strides = [1, 1]} : vector<32x16xf32> to vector<1x16xf32>
    %486 = vector.broadcast %484 : vector<16x1xf32> to vector<16x16xf32>
    %487 = vector.broadcast %485 : vector<1x16xf32> to vector<16x16xf32>
    %488 = arith.mulf %486, %487 : vector<16x16xf32>
    %489 = arith.minimumf %483, %488 : vector<16x16xf32>
    %490 = arith.addf %478, %489 : vector<16x16xf32>
    %491 = vector.extract_strided_slice %470 {offsets = [0, 1], sizes = [16, 1], strides = [1, 1]} : vector<16x32xf32> to vector<16x1xf32>
    %492 = vector.extract_strided_slice %477 {offsets = [1, 0], sizes = [1, 16], strides = [1, 1]} : vector<32x16xf32> to vector<1x16xf32>
    %493 = vector.broadcast %491 : vector<16x1xf32> to vector<16x16xf32>
    %494 = vector.broadcast %492 : vector<1x16xf32> to vector<16x16xf32>
    %495 = arith.mulf %493, %494 : vector<16x16xf32>
    %496 = vector.extract_strided_slice %473 {offsets = [0, 1], sizes = [16, 1], strides = [1, 1]} : vector<16x32xf32> to vector<16x1xf32>
    %497 = vector.extract_strided_slice %475 {offsets = [1, 0], sizes = [1, 16], strides = [1, 1]} : vector<32x16xf32> to vector<1x16xf32>
    %498 = vector.broadcast %496 : vector<16x1xf32> to vector<16x16xf32>
    %499 = vector.broadcast %497 : vector<1x16xf32> to vector<16x16xf32>
    %500 = arith.mulf %498, %499 : vector<16x16xf32>
    %501 = arith.minimumf %495, %500 : vector<16x16xf32>
    %502 = arith.addf %490, %501 : vector<16x16xf32>
    %503 = vector.extract_strided_slice %470 {offsets = [0, 2], sizes = [16, 1], strides = [1, 1]} : vector<16x32xf32> to vector<16x1xf32>
    %504 = vector.extract_strided_slice %477 {offsets = [2, 0], sizes = [1, 16], strides = [1, 1]} : vector<32x16xf32> to vector<1x16xf32>
    %505 = vector.broadcast %503 : vector<16x1xf32> to vector<16x16xf32>
    %506 = vector.broadcast %504 : vector<1x16xf32> to vector<16x16xf32>
    %507 = arith.mulf %505, %506 : vector<16x16xf32>
    %508 = vector.extract_strided_slice %473 {offsets = [0, 2], sizes = [16, 1], strides = [1, 1]} : vector<16x32xf32> to vector<16x1xf32>
    %509 = vector.extract_strided_slice %475 {offsets = [2, 0], sizes = [1, 16], strides = [1, 1]} : vector<32x16xf32> to vector<1x16xf32>
    %510 = vector.broadcast %508 : vector<16x1xf32> to vector<16x16xf32>
    %511 = vector.broadcast %509 : vector<1x16xf32> to vector<16x16xf32>
    %512 = arith.mulf %510, %511 : vector<16x16xf32>
    %513 = arith.minimumf %507, %512 : vector<16x16xf32>
    %514 = arith.addf %502, %513 : vector<16x16xf32>
    %515 = vector.extract_strided_slice %470 {offsets = [0, 3], sizes = [16, 1], strides = [1, 1]} : vector<16x32xf32> to vector<16x1xf32>
    %516 = vector.extract_strided_slice %477 {offsets = [3, 0], sizes = [1, 16], strides = [1, 1]} : vector<32x16xf32> to vector<1x16xf32>
    %517 = vector.broadcast %515 : vector<16x1xf32> to vector<16x16xf32>
    %518 = vector.broadcast %516 : vector<1x16xf32> to vector<16x16xf32>
    %519 = arith.mulf %517, %518 : vector<16x16xf32>
    %520 = vector.extract_strided_slice %473 {offsets = [0, 3], sizes = [16, 1], strides = [1, 1]} : vector<16x32xf32> to vector<16x1xf32>
    %521 = vector.extract_strided_slice %475 {offsets = [3, 0], sizes = [1, 16], strides = [1, 1]} : vector<32x16xf32> to vector<1x16xf32>
    %522 = vector.broadcast %520 : vector<16x1xf32> to vector<16x16xf32>
    %523 = vector.broadcast %521 : vector<1x16xf32> to vector<16x16xf32>
    %524 = arith.mulf %522, %523 : vector<16x16xf32>
    %525 = arith.minimumf %519, %524 : vector<16x16xf32>
    %526 = arith.addf %514, %525 : vector<16x16xf32>
    %527 = vector.extract_strided_slice %470 {offsets = [0, 4], sizes = [16, 1], strides = [1, 1]} : vector<16x32xf32> to vector<16x1xf32>
    %528 = vector.extract_strided_slice %477 {offsets = [4, 0], sizes = [1, 16], strides = [1, 1]} : vector<32x16xf32> to vector<1x16xf32>
    %529 = vector.broadcast %527 : vector<16x1xf32> to vector<16x16xf32>
    %530 = vector.broadcast %528 : vector<1x16xf32> to vector<16x16xf32>
    %531 = arith.mulf %529, %530 : vector<16x16xf32>
    %532 = vector.extract_strided_slice %473 {offsets = [0, 4], sizes = [16, 1], strides = [1, 1]} : vector<16x32xf32> to vector<16x1xf32>
    %533 = vector.extract_strided_slice %475 {offsets = [4, 0], sizes = [1, 16], strides = [1, 1]} : vector<32x16xf32> to vector<1x16xf32>
    %534 = vector.broadcast %532 : vector<16x1xf32> to vector<16x16xf32>
    %535 = vector.broadcast %533 : vector<1x16xf32> to vector<16x16xf32>
    %536 = arith.mulf %534, %535 : vector<16x16xf32>
    %537 = arith.minimumf %531, %536 : vector<16x16xf32>
    %538 = arith.addf %526, %537 : vector<16x16xf32>
    %539 = vector.extract_strided_slice %470 {offsets = [0, 5], sizes = [16, 1], strides = [1, 1]} : vector<16x32xf32> to vector<16x1xf32>
    %540 = vector.extract_strided_slice %477 {offsets = [5, 0], sizes = [1, 16], strides = [1, 1]} : vector<32x16xf32> to vector<1x16xf32>
    %541 = vector.broadcast %539 : vector<16x1xf32> to vector<16x16xf32>
    %542 = vector.broadcast %540 : vector<1x16xf32> to vector<16x16xf32>
    %543 = arith.mulf %541, %542 : vector<16x16xf32>
    %544 = vector.extract_strided_slice %473 {offsets = [0, 5], sizes = [16, 1], strides = [1, 1]} : vector<16x32xf32> to vector<16x1xf32>
    %545 = vector.extract_strided_slice %475 {offsets = [5, 0], sizes = [1, 16], strides = [1, 1]} : vector<32x16xf32> to vector<1x16xf32>
    %546 = vector.broadcast %544 : vector<16x1xf32> to vector<16x16xf32>
    %547 = vector.broadcast %545 : vector<1x16xf32> to vector<16x16xf32>
    %548 = arith.mulf %546, %547 : vector<16x16xf32>
    %549 = arith.minimumf %543, %548 : vector<16x16xf32>
    %550 = arith.addf %538, %549 : vector<16x16xf32>
    %551 = vector.extract_strided_slice %470 {offsets = [0, 6], sizes = [16, 1], strides = [1, 1]} : vector<16x32xf32> to vector<16x1xf32>
    %552 = vector.extract_strided_slice %477 {offsets = [6, 0], sizes = [1, 16], strides = [1, 1]} : vector<32x16xf32> to vector<1x16xf32>
    %553 = vector.broadcast %551 : vector<16x1xf32> to vector<16x16xf32>
    %554 = vector.broadcast %552 : vector<1x16xf32> to vector<16x16xf32>
    %555 = arith.mulf %553, %554 : vector<16x16xf32>
    %556 = vector.extract_strided_slice %473 {offsets = [0, 6], sizes = [16, 1], strides = [1, 1]} : vector<16x32xf32> to vector<16x1xf32>
    %557 = vector.extract_strided_slice %475 {offsets = [6, 0], sizes = [1, 16], strides = [1, 1]} : vector<32x16xf32> to vector<1x16xf32>
    %558 = vector.broadcast %556 : vector<16x1xf32> to vector<16x16xf32>
    %559 = vector.broadcast %557 : vector<1x16xf32> to vector<16x16xf32>
    %560 = arith.mulf %558, %559 : vector<16x16xf32>
    %561 = arith.minimumf %555, %560 : vector<16x16xf32>
    %562 = arith.addf %550, %561 : vector<16x16xf32>
    %563 = vector.extract_strided_slice %470 {offsets = [0, 7], sizes = [16, 1], strides = [1, 1]} : vector<16x32xf32> to vector<16x1xf32>
    %564 = vector.extract_strided_slice %477 {offsets = [7, 0], sizes = [1, 16], strides = [1, 1]} : vector<32x16xf32> to vector<1x16xf32>
    %565 = vector.broadcast %563 : vector<16x1xf32> to vector<16x16xf32>
    %566 = vector.broadcast %564 : vector<1x16xf32> to vector<16x16xf32>
    %567 = arith.mulf %565, %566 : vector<16x16xf32>
    %568 = vector.extract_strided_slice %473 {offsets = [0, 7], sizes = [16, 1], strides = [1, 1]} : vector<16x32xf32> to vector<16x1xf32>
    %569 = vector.extract_strided_slice %475 {offsets = [7, 0], sizes = [1, 16], strides = [1, 1]} : vector<32x16xf32> to vector<1x16xf32>
    %570 = vector.broadcast %568 : vector<16x1xf32> to vector<16x16xf32>
    %571 = vector.broadcast %569 : vector<1x16xf32> to vector<16x16xf32>
    %572 = arith.mulf %570, %571 : vector<16x16xf32>
    %573 = arith.minimumf %567, %572 : vector<16x16xf32>
    %574 = arith.addf %562, %573 : vector<16x16xf32>
    %575 = vector.extract_strided_slice %470 {offsets = [0, 8], sizes = [16, 1], strides = [1, 1]} : vector<16x32xf32> to vector<16x1xf32>
    %576 = vector.extract_strided_slice %477 {offsets = [8, 0], sizes = [1, 16], strides = [1, 1]} : vector<32x16xf32> to vector<1x16xf32>
    %577 = vector.broadcast %575 : vector<16x1xf32> to vector<16x16xf32>
    %578 = vector.broadcast %576 : vector<1x16xf32> to vector<16x16xf32>
    %579 = arith.mulf %577, %578 : vector<16x16xf32>
    %580 = vector.extract_strided_slice %473 {offsets = [0, 8], sizes = [16, 1], strides = [1, 1]} : vector<16x32xf32> to vector<16x1xf32>
    %581 = vector.extract_strided_slice %475 {offsets = [8, 0], sizes = [1, 16], strides = [1, 1]} : vector<32x16xf32> to vector<1x16xf32>
    %582 = vector.broadcast %580 : vector<16x1xf32> to vector<16x16xf32>
    %583 = vector.broadcast %581 : vector<1x16xf32> to vector<16x16xf32>
    %584 = arith.mulf %582, %583 : vector<16x16xf32>
    %585 = arith.minimumf %579, %584 : vector<16x16xf32>
    %586 = arith.addf %574, %585 : vector<16x16xf32>
    %587 = vector.extract_strided_slice %470 {offsets = [0, 9], sizes = [16, 1], strides = [1, 1]} : vector<16x32xf32> to vector<16x1xf32>
    %588 = vector.extract_strided_slice %477 {offsets = [9, 0], sizes = [1, 16], strides = [1, 1]} : vector<32x16xf32> to vector<1x16xf32>
    %589 = vector.broadcast %587 : vector<16x1xf32> to vector<16x16xf32>
    %590 = vector.broadcast %588 : vector<1x16xf32> to vector<16x16xf32>
    %591 = arith.mulf %589, %590 : vector<16x16xf32>
    %592 = vector.extract_strided_slice %473 {offsets = [0, 9], sizes = [16, 1], strides = [1, 1]} : vector<16x32xf32> to vector<16x1xf32>
    %593 = vector.extract_strided_slice %475 {offsets = [9, 0], sizes = [1, 16], strides = [1, 1]} : vector<32x16xf32> to vector<1x16xf32>
    %594 = vector.broadcast %592 : vector<16x1xf32> to vector<16x16xf32>
    %595 = vector.broadcast %593 : vector<1x16xf32> to vector<16x16xf32>
    %596 = arith.mulf %594, %595 : vector<16x16xf32>
    %597 = arith.minimumf %591, %596 : vector<16x16xf32>
    %598 = arith.addf %586, %597 : vector<16x16xf32>
    %599 = vector.extract_strided_slice %470 {offsets = [0, 10], sizes = [16, 1], strides = [1, 1]} : vector<16x32xf32> to vector<16x1xf32>
    %600 = vector.extract_strided_slice %477 {offsets = [10, 0], sizes = [1, 16], strides = [1, 1]} : vector<32x16xf32> to vector<1x16xf32>
    %601 = vector.broadcast %599 : vector<16x1xf32> to vector<16x16xf32>
    %602 = vector.broadcast %600 : vector<1x16xf32> to vector<16x16xf32>
    %603 = arith.mulf %601, %602 : vector<16x16xf32>
    %604 = vector.extract_strided_slice %473 {offsets = [0, 10], sizes = [16, 1], strides = [1, 1]} : vector<16x32xf32> to vector<16x1xf32>
    %605 = vector.extract_strided_slice %475 {offsets = [10, 0], sizes = [1, 16], strides = [1, 1]} : vector<32x16xf32> to vector<1x16xf32>
    %606 = vector.broadcast %604 : vector<16x1xf32> to vector<16x16xf32>
    %607 = vector.broadcast %605 : vector<1x16xf32> to vector<16x16xf32>
    %608 = arith.mulf %606, %607 : vector<16x16xf32>
    %609 = arith.minimumf %603, %608 : vector<16x16xf32>
    %610 = arith.addf %598, %609 : vector<16x16xf32>
    %611 = vector.extract_strided_slice %470 {offsets = [0, 11], sizes = [16, 1], strides = [1, 1]} : vector<16x32xf32> to vector<16x1xf32>
    %612 = vector.extract_strided_slice %477 {offsets = [11, 0], sizes = [1, 16], strides = [1, 1]} : vector<32x16xf32> to vector<1x16xf32>
    %613 = vector.broadcast %611 : vector<16x1xf32> to vector<16x16xf32>
    %614 = vector.broadcast %612 : vector<1x16xf32> to vector<16x16xf32>
    %615 = arith.mulf %613, %614 : vector<16x16xf32>
    %616 = vector.extract_strided_slice %473 {offsets = [0, 11], sizes = [16, 1], strides = [1, 1]} : vector<16x32xf32> to vector<16x1xf32>
    %617 = vector.extract_strided_slice %475 {offsets = [11, 0], sizes = [1, 16], strides = [1, 1]} : vector<32x16xf32> to vector<1x16xf32>
    %618 = vector.broadcast %616 : vector<16x1xf32> to vector<16x16xf32>
    %619 = vector.broadcast %617 : vector<1x16xf32> to vector<16x16xf32>
    %620 = arith.mulf %618, %619 : vector<16x16xf32>
    %621 = arith.minimumf %615, %620 : vector<16x16xf32>
    %622 = arith.addf %610, %621 : vector<16x16xf32>
    %623 = vector.extract_strided_slice %470 {offsets = [0, 12], sizes = [16, 1], strides = [1, 1]} : vector<16x32xf32> to vector<16x1xf32>
    %624 = vector.extract_strided_slice %477 {offsets = [12, 0], sizes = [1, 16], strides = [1, 1]} : vector<32x16xf32> to vector<1x16xf32>
    %625 = vector.broadcast %623 : vector<16x1xf32> to vector<16x16xf32>
    %626 = vector.broadcast %624 : vector<1x16xf32> to vector<16x16xf32>
    %627 = arith.mulf %625, %626 : vector<16x16xf32>
    %628 = vector.extract_strided_slice %473 {offsets = [0, 12], sizes = [16, 1], strides = [1, 1]} : vector<16x32xf32> to vector<16x1xf32>
    %629 = vector.extract_strided_slice %475 {offsets = [12, 0], sizes = [1, 16], strides = [1, 1]} : vector<32x16xf32> to vector<1x16xf32>
    %630 = vector.broadcast %628 : vector<16x1xf32> to vector<16x16xf32>
    %631 = vector.broadcast %629 : vector<1x16xf32> to vector<16x16xf32>
    %632 = arith.mulf %630, %631 : vector<16x16xf32>
    %633 = arith.minimumf %627, %632 : vector<16x16xf32>
    %634 = arith.addf %622, %633 : vector<16x16xf32>
    %635 = vector.extract_strided_slice %470 {offsets = [0, 13], sizes = [16, 1], strides = [1, 1]} : vector<16x32xf32> to vector<16x1xf32>
    %636 = vector.extract_strided_slice %477 {offsets = [13, 0], sizes = [1, 16], strides = [1, 1]} : vector<32x16xf32> to vector<1x16xf32>
    %637 = vector.broadcast %635 : vector<16x1xf32> to vector<16x16xf32>
    %638 = vector.broadcast %636 : vector<1x16xf32> to vector<16x16xf32>
    %639 = arith.mulf %637, %638 : vector<16x16xf32>
    %640 = vector.extract_strided_slice %473 {offsets = [0, 13], sizes = [16, 1], strides = [1, 1]} : vector<16x32xf32> to vector<16x1xf32>
    %641 = vector.extract_strided_slice %475 {offsets = [13, 0], sizes = [1, 16], strides = [1, 1]} : vector<32x16xf32> to vector<1x16xf32>
    %642 = vector.broadcast %640 : vector<16x1xf32> to vector<16x16xf32>
    %643 = vector.broadcast %641 : vector<1x16xf32> to vector<16x16xf32>
    %644 = arith.mulf %642, %643 : vector<16x16xf32>
    %645 = arith.minimumf %639, %644 : vector<16x16xf32>
    %646 = arith.addf %634, %645 : vector<16x16xf32>
    %647 = vector.extract_strided_slice %470 {offsets = [0, 14], sizes = [16, 1], strides = [1, 1]} : vector<16x32xf32> to vector<16x1xf32>
    %648 = vector.extract_strided_slice %477 {offsets = [14, 0], sizes = [1, 16], strides = [1, 1]} : vector<32x16xf32> to vector<1x16xf32>
    %649 = vector.broadcast %647 : vector<16x1xf32> to vector<16x16xf32>
    %650 = vector.broadcast %648 : vector<1x16xf32> to vector<16x16xf32>
    %651 = arith.mulf %649, %650 : vector<16x16xf32>
    %652 = vector.extract_strided_slice %473 {offsets = [0, 14], sizes = [16, 1], strides = [1, 1]} : vector<16x32xf32> to vector<16x1xf32>
    %653 = vector.extract_strided_slice %475 {offsets = [14, 0], sizes = [1, 16], strides = [1, 1]} : vector<32x16xf32> to vector<1x16xf32>
    %654 = vector.broadcast %652 : vector<16x1xf32> to vector<16x16xf32>
    %655 = vector.broadcast %653 : vector<1x16xf32> to vector<16x16xf32>
    %656 = arith.mulf %654, %655 : vector<16x16xf32>
    %657 = arith.minimumf %651, %656 : vector<16x16xf32>
    %658 = arith.addf %646, %657 : vector<16x16xf32>
    %659 = vector.extract_strided_slice %470 {offsets = [0, 15], sizes = [16, 1], strides = [1, 1]} : vector<16x32xf32> to vector<16x1xf32>
    %660 = vector.extract_strided_slice %477 {offsets = [15, 0], sizes = [1, 16], strides = [1, 1]} : vector<32x16xf32> to vector<1x16xf32>
    %661 = vector.broadcast %659 : vector<16x1xf32> to vector<16x16xf32>
    %662 = vector.broadcast %660 : vector<1x16xf32> to vector<16x16xf32>
    %663 = arith.mulf %661, %662 : vector<16x16xf32>
    %664 = vector.extract_strided_slice %473 {offsets = [0, 15], sizes = [16, 1], strides = [1, 1]} : vector<16x32xf32> to vector<16x1xf32>
    %665 = vector.extract_strided_slice %475 {offsets = [15, 0], sizes = [1, 16], strides = [1, 1]} : vector<32x16xf32> to vector<1x16xf32>
    %666 = vector.broadcast %664 : vector<16x1xf32> to vector<16x16xf32>
    %667 = vector.broadcast %665 : vector<1x16xf32> to vector<16x16xf32>
    %668 = arith.mulf %666, %667 : vector<16x16xf32>
    %669 = arith.minimumf %663, %668 : vector<16x16xf32>
    %670 = arith.addf %658, %669 : vector<16x16xf32>
    %671 = vector.extract_strided_slice %470 {offsets = [0, 16], sizes = [16, 1], strides = [1, 1]} : vector<16x32xf32> to vector<16x1xf32>
    %672 = vector.extract_strided_slice %477 {offsets = [16, 0], sizes = [1, 16], strides = [1, 1]} : vector<32x16xf32> to vector<1x16xf32>
    %673 = vector.broadcast %671 : vector<16x1xf32> to vector<16x16xf32>
    %674 = vector.broadcast %672 : vector<1x16xf32> to vector<16x16xf32>
    %675 = arith.mulf %673, %674 : vector<16x16xf32>
    %676 = vector.extract_strided_slice %473 {offsets = [0, 16], sizes = [16, 1], strides = [1, 1]} : vector<16x32xf32> to vector<16x1xf32>
    %677 = vector.extract_strided_slice %475 {offsets = [16, 0], sizes = [1, 16], strides = [1, 1]} : vector<32x16xf32> to vector<1x16xf32>
    %678 = vector.broadcast %676 : vector<16x1xf32> to vector<16x16xf32>
    %679 = vector.broadcast %677 : vector<1x16xf32> to vector<16x16xf32>
    %680 = arith.mulf %678, %679 : vector<16x16xf32>
    %681 = arith.minimumf %675, %680 : vector<16x16xf32>
    %682 = arith.addf %670, %681 : vector<16x16xf32>
    %683 = vector.extract_strided_slice %470 {offsets = [0, 17], sizes = [16, 1], strides = [1, 1]} : vector<16x32xf32> to vector<16x1xf32>
    %684 = vector.extract_strided_slice %477 {offsets = [17, 0], sizes = [1, 16], strides = [1, 1]} : vector<32x16xf32> to vector<1x16xf32>
    %685 = vector.broadcast %683 : vector<16x1xf32> to vector<16x16xf32>
    %686 = vector.broadcast %684 : vector<1x16xf32> to vector<16x16xf32>
    %687 = arith.mulf %685, %686 : vector<16x16xf32>
    %688 = vector.extract_strided_slice %473 {offsets = [0, 17], sizes = [16, 1], strides = [1, 1]} : vector<16x32xf32> to vector<16x1xf32>
    %689 = vector.extract_strided_slice %475 {offsets = [17, 0], sizes = [1, 16], strides = [1, 1]} : vector<32x16xf32> to vector<1x16xf32>
    %690 = vector.broadcast %688 : vector<16x1xf32> to vector<16x16xf32>
    %691 = vector.broadcast %689 : vector<1x16xf32> to vector<16x16xf32>
    %692 = arith.mulf %690, %691 : vector<16x16xf32>
    %693 = arith.minimumf %687, %692 : vector<16x16xf32>
    %694 = arith.addf %682, %693 : vector<16x16xf32>
    %695 = vector.extract_strided_slice %470 {offsets = [0, 18], sizes = [16, 1], strides = [1, 1]} : vector<16x32xf32> to vector<16x1xf32>
    %696 = vector.extract_strided_slice %477 {offsets = [18, 0], sizes = [1, 16], strides = [1, 1]} : vector<32x16xf32> to vector<1x16xf32>
    %697 = vector.broadcast %695 : vector<16x1xf32> to vector<16x16xf32>
    %698 = vector.broadcast %696 : vector<1x16xf32> to vector<16x16xf32>
    %699 = arith.mulf %697, %698 : vector<16x16xf32>
    %700 = vector.extract_strided_slice %473 {offsets = [0, 18], sizes = [16, 1], strides = [1, 1]} : vector<16x32xf32> to vector<16x1xf32>
    %701 = vector.extract_strided_slice %475 {offsets = [18, 0], sizes = [1, 16], strides = [1, 1]} : vector<32x16xf32> to vector<1x16xf32>
    %702 = vector.broadcast %700 : vector<16x1xf32> to vector<16x16xf32>
    %703 = vector.broadcast %701 : vector<1x16xf32> to vector<16x16xf32>
    %704 = arith.mulf %702, %703 : vector<16x16xf32>
    %705 = arith.minimumf %699, %704 : vector<16x16xf32>
    %706 = arith.addf %694, %705 : vector<16x16xf32>
    %707 = vector.extract_strided_slice %470 {offsets = [0, 19], sizes = [16, 1], strides = [1, 1]} : vector<16x32xf32> to vector<16x1xf32>
    %708 = vector.extract_strided_slice %477 {offsets = [19, 0], sizes = [1, 16], strides = [1, 1]} : vector<32x16xf32> to vector<1x16xf32>
    %709 = vector.broadcast %707 : vector<16x1xf32> to vector<16x16xf32>
    %710 = vector.broadcast %708 : vector<1x16xf32> to vector<16x16xf32>
    %711 = arith.mulf %709, %710 : vector<16x16xf32>
    %712 = vector.extract_strided_slice %473 {offsets = [0, 19], sizes = [16, 1], strides = [1, 1]} : vector<16x32xf32> to vector<16x1xf32>
    %713 = vector.extract_strided_slice %475 {offsets = [19, 0], sizes = [1, 16], strides = [1, 1]} : vector<32x16xf32> to vector<1x16xf32>
    %714 = vector.broadcast %712 : vector<16x1xf32> to vector<16x16xf32>
    %715 = vector.broadcast %713 : vector<1x16xf32> to vector<16x16xf32>
    %716 = arith.mulf %714, %715 : vector<16x16xf32>
    %717 = arith.minimumf %711, %716 : vector<16x16xf32>
    %718 = arith.addf %706, %717 : vector<16x16xf32>
    %719 = vector.extract_strided_slice %470 {offsets = [0, 20], sizes = [16, 1], strides = [1, 1]} : vector<16x32xf32> to vector<16x1xf32>
    %720 = vector.extract_strided_slice %477 {offsets = [20, 0], sizes = [1, 16], strides = [1, 1]} : vector<32x16xf32> to vector<1x16xf32>
    %721 = vector.broadcast %719 : vector<16x1xf32> to vector<16x16xf32>
    %722 = vector.broadcast %720 : vector<1x16xf32> to vector<16x16xf32>
    %723 = arith.mulf %721, %722 : vector<16x16xf32>
    %724 = vector.extract_strided_slice %473 {offsets = [0, 20], sizes = [16, 1], strides = [1, 1]} : vector<16x32xf32> to vector<16x1xf32>
    %725 = vector.extract_strided_slice %475 {offsets = [20, 0], sizes = [1, 16], strides = [1, 1]} : vector<32x16xf32> to vector<1x16xf32>
    %726 = vector.broadcast %724 : vector<16x1xf32> to vector<16x16xf32>
    %727 = vector.broadcast %725 : vector<1x16xf32> to vector<16x16xf32>
    %728 = arith.mulf %726, %727 : vector<16x16xf32>
    %729 = arith.minimumf %723, %728 : vector<16x16xf32>
    %730 = arith.addf %718, %729 : vector<16x16xf32>
    %731 = vector.extract_strided_slice %470 {offsets = [0, 21], sizes = [16, 1], strides = [1, 1]} : vector<16x32xf32> to vector<16x1xf32>
    %732 = vector.extract_strided_slice %477 {offsets = [21, 0], sizes = [1, 16], strides = [1, 1]} : vector<32x16xf32> to vector<1x16xf32>
    %733 = vector.broadcast %731 : vector<16x1xf32> to vector<16x16xf32>
    %734 = vector.broadcast %732 : vector<1x16xf32> to vector<16x16xf32>
    %735 = arith.mulf %733, %734 : vector<16x16xf32>
    %736 = vector.extract_strided_slice %473 {offsets = [0, 21], sizes = [16, 1], strides = [1, 1]} : vector<16x32xf32> to vector<16x1xf32>
    %737 = vector.extract_strided_slice %475 {offsets = [21, 0], sizes = [1, 16], strides = [1, 1]} : vector<32x16xf32> to vector<1x16xf32>
    %738 = vector.broadcast %736 : vector<16x1xf32> to vector<16x16xf32>
    %739 = vector.broadcast %737 : vector<1x16xf32> to vector<16x16xf32>
    %740 = arith.mulf %738, %739 : vector<16x16xf32>
    %741 = arith.minimumf %735, %740 : vector<16x16xf32>
    %742 = arith.addf %730, %741 : vector<16x16xf32>
    %743 = vector.extract_strided_slice %470 {offsets = [0, 22], sizes = [16, 1], strides = [1, 1]} : vector<16x32xf32> to vector<16x1xf32>
    %744 = vector.extract_strided_slice %477 {offsets = [22, 0], sizes = [1, 16], strides = [1, 1]} : vector<32x16xf32> to vector<1x16xf32>
    %745 = vector.broadcast %743 : vector<16x1xf32> to vector<16x16xf32>
    %746 = vector.broadcast %744 : vector<1x16xf32> to vector<16x16xf32>
    %747 = arith.mulf %745, %746 : vector<16x16xf32>
    %748 = vector.extract_strided_slice %473 {offsets = [0, 22], sizes = [16, 1], strides = [1, 1]} : vector<16x32xf32> to vector<16x1xf32>
    %749 = vector.extract_strided_slice %475 {offsets = [22, 0], sizes = [1, 16], strides = [1, 1]} : vector<32x16xf32> to vector<1x16xf32>
    %750 = vector.broadcast %748 : vector<16x1xf32> to vector<16x16xf32>
    %751 = vector.broadcast %749 : vector<1x16xf32> to vector<16x16xf32>
    %752 = arith.mulf %750, %751 : vector<16x16xf32>
    %753 = arith.minimumf %747, %752 : vector<16x16xf32>
    %754 = arith.addf %742, %753 : vector<16x16xf32>
    %755 = vector.extract_strided_slice %470 {offsets = [0, 23], sizes = [16, 1], strides = [1, 1]} : vector<16x32xf32> to vector<16x1xf32>
    %756 = vector.extract_strided_slice %477 {offsets = [23, 0], sizes = [1, 16], strides = [1, 1]} : vector<32x16xf32> to vector<1x16xf32>
    %757 = vector.broadcast %755 : vector<16x1xf32> to vector<16x16xf32>
    %758 = vector.broadcast %756 : vector<1x16xf32> to vector<16x16xf32>
    %759 = arith.mulf %757, %758 : vector<16x16xf32>
    %760 = vector.extract_strided_slice %473 {offsets = [0, 23], sizes = [16, 1], strides = [1, 1]} : vector<16x32xf32> to vector<16x1xf32>
    %761 = vector.extract_strided_slice %475 {offsets = [23, 0], sizes = [1, 16], strides = [1, 1]} : vector<32x16xf32> to vector<1x16xf32>
    %762 = vector.broadcast %760 : vector<16x1xf32> to vector<16x16xf32>
    %763 = vector.broadcast %761 : vector<1x16xf32> to vector<16x16xf32>
    %764 = arith.mulf %762, %763 : vector<16x16xf32>
    %765 = arith.minimumf %759, %764 : vector<16x16xf32>
    %766 = arith.addf %754, %765 : vector<16x16xf32>
    %767 = vector.extract_strided_slice %470 {offsets = [0, 24], sizes = [16, 1], strides = [1, 1]} : vector<16x32xf32> to vector<16x1xf32>
    %768 = vector.extract_strided_slice %477 {offsets = [24, 0], sizes = [1, 16], strides = [1, 1]} : vector<32x16xf32> to vector<1x16xf32>
    %769 = vector.broadcast %767 : vector<16x1xf32> to vector<16x16xf32>
    %770 = vector.broadcast %768 : vector<1x16xf32> to vector<16x16xf32>
    %771 = arith.mulf %769, %770 : vector<16x16xf32>
    %772 = vector.extract_strided_slice %473 {offsets = [0, 24], sizes = [16, 1], strides = [1, 1]} : vector<16x32xf32> to vector<16x1xf32>
    %773 = vector.extract_strided_slice %475 {offsets = [24, 0], sizes = [1, 16], strides = [1, 1]} : vector<32x16xf32> to vector<1x16xf32>
    %774 = vector.broadcast %772 : vector<16x1xf32> to vector<16x16xf32>
    %775 = vector.broadcast %773 : vector<1x16xf32> to vector<16x16xf32>
    %776 = arith.mulf %774, %775 : vector<16x16xf32>
    %777 = arith.minimumf %771, %776 : vector<16x16xf32>
    %778 = arith.addf %766, %777 : vector<16x16xf32>
    %779 = vector.extract_strided_slice %470 {offsets = [0, 25], sizes = [16, 1], strides = [1, 1]} : vector<16x32xf32> to vector<16x1xf32>
    %780 = vector.extract_strided_slice %477 {offsets = [25, 0], sizes = [1, 16], strides = [1, 1]} : vector<32x16xf32> to vector<1x16xf32>
    %781 = vector.broadcast %779 : vector<16x1xf32> to vector<16x16xf32>
    %782 = vector.broadcast %780 : vector<1x16xf32> to vector<16x16xf32>
    %783 = arith.mulf %781, %782 : vector<16x16xf32>
    %784 = vector.extract_strided_slice %473 {offsets = [0, 25], sizes = [16, 1], strides = [1, 1]} : vector<16x32xf32> to vector<16x1xf32>
    %785 = vector.extract_strided_slice %475 {offsets = [25, 0], sizes = [1, 16], strides = [1, 1]} : vector<32x16xf32> to vector<1x16xf32>
    %786 = vector.broadcast %784 : vector<16x1xf32> to vector<16x16xf32>
    %787 = vector.broadcast %785 : vector<1x16xf32> to vector<16x16xf32>
    %788 = arith.mulf %786, %787 : vector<16x16xf32>
    %789 = arith.minimumf %783, %788 : vector<16x16xf32>
    %790 = arith.addf %778, %789 : vector<16x16xf32>
    %791 = vector.extract_strided_slice %470 {offsets = [0, 26], sizes = [16, 1], strides = [1, 1]} : vector<16x32xf32> to vector<16x1xf32>
    %792 = vector.extract_strided_slice %477 {offsets = [26, 0], sizes = [1, 16], strides = [1, 1]} : vector<32x16xf32> to vector<1x16xf32>
    %793 = vector.broadcast %791 : vector<16x1xf32> to vector<16x16xf32>
    %794 = vector.broadcast %792 : vector<1x16xf32> to vector<16x16xf32>
    %795 = arith.mulf %793, %794 : vector<16x16xf32>
    %796 = vector.extract_strided_slice %473 {offsets = [0, 26], sizes = [16, 1], strides = [1, 1]} : vector<16x32xf32> to vector<16x1xf32>
    %797 = vector.extract_strided_slice %475 {offsets = [26, 0], sizes = [1, 16], strides = [1, 1]} : vector<32x16xf32> to vector<1x16xf32>
    %798 = vector.broadcast %796 : vector<16x1xf32> to vector<16x16xf32>
    %799 = vector.broadcast %797 : vector<1x16xf32> to vector<16x16xf32>
    %800 = arith.mulf %798, %799 : vector<16x16xf32>
    %801 = arith.minimumf %795, %800 : vector<16x16xf32>
    %802 = arith.addf %790, %801 : vector<16x16xf32>
    %803 = vector.extract_strided_slice %470 {offsets = [0, 27], sizes = [16, 1], strides = [1, 1]} : vector<16x32xf32> to vector<16x1xf32>
    %804 = vector.extract_strided_slice %477 {offsets = [27, 0], sizes = [1, 16], strides = [1, 1]} : vector<32x16xf32> to vector<1x16xf32>
    %805 = vector.broadcast %803 : vector<16x1xf32> to vector<16x16xf32>
    %806 = vector.broadcast %804 : vector<1x16xf32> to vector<16x16xf32>
    %807 = arith.mulf %805, %806 : vector<16x16xf32>
    %808 = vector.extract_strided_slice %473 {offsets = [0, 27], sizes = [16, 1], strides = [1, 1]} : vector<16x32xf32> to vector<16x1xf32>
    %809 = vector.extract_strided_slice %475 {offsets = [27, 0], sizes = [1, 16], strides = [1, 1]} : vector<32x16xf32> to vector<1x16xf32>
    %810 = vector.broadcast %808 : vector<16x1xf32> to vector<16x16xf32>
    %811 = vector.broadcast %809 : vector<1x16xf32> to vector<16x16xf32>
    %812 = arith.mulf %810, %811 : vector<16x16xf32>
    %813 = arith.minimumf %807, %812 : vector<16x16xf32>
    %814 = arith.addf %802, %813 : vector<16x16xf32>
    %815 = vector.extract_strided_slice %470 {offsets = [0, 28], sizes = [16, 1], strides = [1, 1]} : vector<16x32xf32> to vector<16x1xf32>
    %816 = vector.extract_strided_slice %477 {offsets = [28, 0], sizes = [1, 16], strides = [1, 1]} : vector<32x16xf32> to vector<1x16xf32>
    %817 = vector.broadcast %815 : vector<16x1xf32> to vector<16x16xf32>
    %818 = vector.broadcast %816 : vector<1x16xf32> to vector<16x16xf32>
    %819 = arith.mulf %817, %818 : vector<16x16xf32>
    %820 = vector.extract_strided_slice %473 {offsets = [0, 28], sizes = [16, 1], strides = [1, 1]} : vector<16x32xf32> to vector<16x1xf32>
    %821 = vector.extract_strided_slice %475 {offsets = [28, 0], sizes = [1, 16], strides = [1, 1]} : vector<32x16xf32> to vector<1x16xf32>
    %822 = vector.broadcast %820 : vector<16x1xf32> to vector<16x16xf32>
    %823 = vector.broadcast %821 : vector<1x16xf32> to vector<16x16xf32>
    %824 = arith.mulf %822, %823 : vector<16x16xf32>
    %825 = arith.minimumf %819, %824 : vector<16x16xf32>
    %826 = arith.addf %814, %825 : vector<16x16xf32>
    %827 = vector.extract_strided_slice %470 {offsets = [0, 29], sizes = [16, 1], strides = [1, 1]} : vector<16x32xf32> to vector<16x1xf32>
    %828 = vector.extract_strided_slice %477 {offsets = [29, 0], sizes = [1, 16], strides = [1, 1]} : vector<32x16xf32> to vector<1x16xf32>
    %829 = vector.broadcast %827 : vector<16x1xf32> to vector<16x16xf32>
    %830 = vector.broadcast %828 : vector<1x16xf32> to vector<16x16xf32>
    %831 = arith.mulf %829, %830 : vector<16x16xf32>
    %832 = vector.extract_strided_slice %473 {offsets = [0, 29], sizes = [16, 1], strides = [1, 1]} : vector<16x32xf32> to vector<16x1xf32>
    %833 = vector.extract_strided_slice %475 {offsets = [29, 0], sizes = [1, 16], strides = [1, 1]} : vector<32x16xf32> to vector<1x16xf32>
    %834 = vector.broadcast %832 : vector<16x1xf32> to vector<16x16xf32>
    %835 = vector.broadcast %833 : vector<1x16xf32> to vector<16x16xf32>
    %836 = arith.mulf %834, %835 : vector<16x16xf32>
    %837 = arith.minimumf %831, %836 : vector<16x16xf32>
    %838 = arith.addf %826, %837 : vector<16x16xf32>
    %839 = vector.extract_strided_slice %470 {offsets = [0, 30], sizes = [16, 1], strides = [1, 1]} : vector<16x32xf32> to vector<16x1xf32>
    %840 = vector.extract_strided_slice %477 {offsets = [30, 0], sizes = [1, 16], strides = [1, 1]} : vector<32x16xf32> to vector<1x16xf32>
    %841 = vector.broadcast %839 : vector<16x1xf32> to vector<16x16xf32>
    %842 = vector.broadcast %840 : vector<1x16xf32> to vector<16x16xf32>
    %843 = arith.mulf %841, %842 : vector<16x16xf32>
    %844 = vector.extract_strided_slice %473 {offsets = [0, 30], sizes = [16, 1], strides = [1, 1]} : vector<16x32xf32> to vector<16x1xf32>
    %845 = vector.extract_strided_slice %475 {offsets = [30, 0], sizes = [1, 16], strides = [1, 1]} : vector<32x16xf32> to vector<1x16xf32>
    %846 = vector.broadcast %844 : vector<16x1xf32> to vector<16x16xf32>
    %847 = vector.broadcast %845 : vector<1x16xf32> to vector<16x16xf32>
    %848 = arith.mulf %846, %847 : vector<16x16xf32>
    %849 = arith.minimumf %843, %848 : vector<16x16xf32>
    %850 = arith.addf %838, %849 : vector<16x16xf32>
    %851 = vector.extract_strided_slice %470 {offsets = [0, 31], sizes = [16, 1], strides = [1, 1]} : vector<16x32xf32> to vector<16x1xf32>
    %852 = vector.extract_strided_slice %477 {offsets = [31, 0], sizes = [1, 16], strides = [1, 1]} : vector<32x16xf32> to vector<1x16xf32>
    %853 = vector.broadcast %851 : vector<16x1xf32> to vector<16x16xf32>
    %854 = vector.broadcast %852 : vector<1x16xf32> to vector<16x16xf32>
    %855 = arith.mulf %853, %854 : vector<16x16xf32>
    %856 = vector.extract_strided_slice %473 {offsets = [0, 31], sizes = [16, 1], strides = [1, 1]} : vector<16x32xf32> to vector<16x1xf32>
    %857 = vector.extract_strided_slice %475 {offsets = [31, 0], sizes = [1, 16], strides = [1, 1]} : vector<32x16xf32> to vector<1x16xf32>
    %858 = vector.broadcast %856 : vector<16x1xf32> to vector<16x16xf32>
    %859 = vector.broadcast %857 : vector<1x16xf32> to vector<16x16xf32>
    %860 = arith.mulf %858, %859 : vector<16x16xf32>
    %861 = arith.minimumf %855, %860 : vector<16x16xf32>
    %862 = arith.addf %850, %861 : vector<16x16xf32>
    %c1_50 = arith.constant 1 : index
    %c0_51 = arith.constant 0 : index
    %863 = memref.load %arg8[%c1_50, %c0_51] : memref<2x3xf32, #tpu.memory_space<smem>>
    %864 = vector.broadcast %863 : f32 to vector<16x16xf32>
    %865 = arith.mulf %864, %15 : vector<16x16xf32>
    %c1_52 = arith.constant 1 : index
    %c1_53 = arith.constant 1 : index
    %866 = memref.load %arg8[%c1_52, %c1_53] : memref<2x3xf32, #tpu.memory_space<smem>>
    %867 = vector.broadcast %866 : f32 to vector<16x16xf32>
    %868 = arith.mulf %867, %24 : vector<16x16xf32>
    %869 = arith.addf %865, %868 : vector<16x16xf32>
    %c1_54 = arith.constant 1 : index
    %c2_55 = arith.constant 2 : index
    %870 = memref.load %arg8[%c1_54, %c2_55] : memref<2x3xf32, #tpu.memory_space<smem>>
    %871 = vector.broadcast %870 : f32 to vector<16x16xf32>
    %872 = arith.mulf %871, %33 : vector<16x16xf32>
    %873 = arith.addf %869, %872 : vector<16x16xf32>
    %874 = arith.addf %862, %873 : vector<16x16xf32>
    %cst_56 = arith.constant 3.125000e-02 : f32
    %875 = vector.broadcast %cst_56 : f32 to vector<16x16xf32>
    %876 = arith.mulf %874, %875 : vector<16x16xf32>
    %cst_57 = arith.constant dense<0xFF800000> : vector<16xf32>
    %877 = vector.multi_reduction <maximumf>, %876, %cst_57 [1] : vector<16x16xf32> to vector<16xf32>
    %878 = vector.shape_cast %877 : vector<16xf32> to vector<16x1xf32>
    %879 = vector.broadcast %878 : vector<16x1xf32> to vector<16x16xf32>
    %880 = arith.subf %876, %879 : vector<16x16xf32>
    %881 = math.exp %880 : vector<16x16xf32>
    %cst_58 = arith.constant dense<0.000000e+00> : vector<16xf32>
    %882 = vector.multi_reduction <add>, %881, %cst_58 [1] : vector<16x16xf32> to vector<16xf32>
    %883 = vector.shape_cast %882 : vector<16xf32> to vector<16x1xf32>
    %c1_59 = arith.constant 1 : index
    %c0_60 = arith.constant 0 : index
    %c0_61 = arith.constant 0 : index
    %884 = vector.load %arg14[%c1_59, %c0_60, %c0_61] : memref<2x32x16xf32, #tpu.memory_space<vmem>>, vector<1x32x16xf32>
    %885 = vector.shape_cast %884 : vector<1x32x16xf32> to vector<32x16xf32>
    %cst_62 = arith.constant dense<0.000000e+00> : vector<16x32xf32>
    %886 = tpu.matmul %881, %885, %cst_62 {dimension_numbers = #tpu.dot_dimension_numbers<[1], [1], [0], [0], [0, 0, 1, 0], [], []>} : vector<16x16xf32>, vector<32x16xf32>, vector<16x32xf32> -> vector<16x32xf32>
    %887 = tpu.reciprocal %883 {approx = true} : vector<16x1xf32> -> vector<16x1xf32>
    %888 = vector.broadcast %887 : vector<16x1xf32> to vector<16x32xf32>
    %889 = arith.mulf %886, %888 : vector<16x32xf32>
    %c0_63 = arith.constant 0 : index
    %c0_64 = arith.constant 0 : index
    %890 = vector.load %arg9[%c0_63, %c0_64] : memref<32x32xf32, #tpu.memory_space<vmem>>, vector<32x32xf32>
    %cst_65 = arith.constant dense<0.000000e+00> : vector<16x32xf32>
    %891 = tpu.matmul %889, %890, %cst_65 {dimension_numbers = #tpu.dot_dimension_numbers<[1], [0], [0], [1], [0, 0, 1, 1], [], []>} : vector<16x32xf32>, vector<32x32xf32>, vector<16x32xf32> -> vector<16x32xf32>
    %c0_66 = arith.constant 0 : index
    %c0_67 = arith.constant 0 : index
    %892 = vector.load %arg10[%c0_66, %c0_67] : memref<1x32xf32, #tpu.memory_space<vmem>>, vector<1x32xf32>
    %893 = vector.broadcast %892 : vector<1x32xf32> to vector<16x32xf32>
    %894 = arith.addf %891, %893 : vector<16x32xf32>
    %c0_68 = arith.constant 0 : index
    %c0_69 = arith.constant 0 : index
    %c0_70 = arith.constant 0 : index
    %895 = vector.load %arg11[%c0_68, %c0_69, %c0_70] : memref<1x16x32xf32, #tpu.memory_space<vmem>>, vector<1x16x32xf32>
    %896 = vector.shape_cast %895 : vector<1x16x32xf32> to vector<16x32xf32>
    %897 = vector.shape_cast %894 : vector<16x32xf32> to vector<1x16x32xf32>
    tpu.vector_store %arg11[%c0_68, %c0_69, %c0_70], %897 {strides = array<i32>} : memref<1x16x32xf32, #tpu.memory_space<vmem>>, vector<1x16x32xf32>,
    return
  }
  func.func @transform_0(%arg0: i32, %arg1: i32) -> (i32, i32, i32) {
    %c0_i32 = arith.constant 0 : i32
    %c0_i32_0 = arith.constant 0 : i32
    return %arg0, %arg1, %c0_i32 : i32, i32, i32
  }
  func.func @transform_1(%arg0: i32, %arg1: i32) -> (i32, i32, i32) {
    %c0_i32 = arith.constant 0 : i32
    %c0_i32_0 = arith.constant 0 : i32
    return %arg0, %arg1, %c0_i32 : i32, i32, i32
  }
  func.func @transform_2(%arg0: i32, %arg1: i32) -> (i32, i32, i32) {
    %c0_i32 = arith.constant 0 : i32
    %c0_i32_0 = arith.constant 0 : i32
    %c0_i32_1 = arith.constant 0 : i32
    return %arg0, %c0_i32, %c0_i32_0 : i32, i32, i32
  }
  func.func @transform_3(%arg0: i32, %arg1: i32) -> (i32, i32, i32) {
    %c0_i32 = arith.constant 0 : i32
    %c0_i32_0 = arith.constant 0 : i32
    %c0_i32_1 = arith.constant 0 : i32
    return %arg0, %c0_i32, %c0_i32_0 : i32, i32, i32
  }
  func.func @transform_4(%arg0: i32, %arg1: i32) -> (i32, i32, i32) {
    %c0_i32 = arith.constant 0 : i32
    %c0_i32_0 = arith.constant 0 : i32
    %c0_i32_1 = arith.constant 0 : i32
    %c0_i32_2 = arith.constant 0 : i32
    return %c0_i32, %c0_i32_0, %c0_i32_1 : i32, i32, i32
  }
  func.func @transform_5(%arg0: i32, %arg1: i32) -> (i32, i32, i32) {
    %c0_i32 = arith.constant 0 : i32
    %c0_i32_0 = arith.constant 0 : i32
    %c0_i32_1 = arith.constant 0 : i32
    %c0_i32_2 = arith.constant 0 : i32
    return %c0_i32, %c0_i32_0, %c0_i32_1 : i32, i32, i32
  }
  func.func @transform_6(%arg0: i32, %arg1: i32) -> (i32, i32) {
    %c0_i32 = arith.constant 0 : i32
    %c0_i32_0 = arith.constant 0 : i32
    %c0_i32_1 = arith.constant 0 : i32
    return %c0_i32, %c0_i32_0 : i32, i32
  }
  func.func @transform_7(%arg0: i32, %arg1: i32) -> (i32, i32) {
    %c0_i32 = arith.constant 0 : i32
    %c0_i32_0 = arith.constant 0 : i32
    %c0_i32_1 = arith.constant 0 : i32
    return %c0_i32, %c0_i32_0 : i32, i32
  }
  func.func @transform_8(%arg0: i32, %arg1: i32) -> (i32, i32) {
    %c0_i32 = arith.constant 0 : i32
    %c0_i32_0 = arith.constant 0 : i32
    %c0_i32_1 = arith.constant 0 : i32
    return %c0_i32, %c0_i32_0 : i32, i32
  }
  func.func @transform_9(%arg0: i32, %arg1: i32) -> (i32, i32, i32) {
    %c0_i32 = arith.constant 0 : i32
    %c0_i32_0 = arith.constant 0 : i32
    return %arg0, %arg1, %c0_i32 : i32, i32, i32
  }
}

</mosaic_0001>

<bundles_post_ra>
// kernel: tpu_custom_call.1
= control target key start
LH: loop header
LB: loop body
LE: loop exit
PB: predicated region body
PF: predicated region fallthrough
CT: control target
= control target key end

     0   :  { %s7764_s0 = inlined_call_operand.hbm [shape: f32[2,64,32], index: 0, kind: input, shape index: {}]   ;;  %s7765_s1 = inlined_call_operand.hbm [shape: f32[2,64,3], index: 1, kind: input, shape index: {}]   ;;  %s7766_s2 = inlined_call_operand.hbm [shape: f32[2,16,16], index: 2, kind: input, shape index: {}]   ;;  %s7767_s3 = inlined_call_operand.hbm [shape: f32[2,3,16], index: 3, kind: input, shape index: {}]   ;;  %s7768_s4 = inlined_call_operand.hbm [shape: f32[2,32,32], index: 4, kind: input, shape index: {}]   ;;  %s7769_s5 = inlined_call_operand.hbm [shape: f32[2,64,16], index: 5, kind: input, shape index: {}]   ;;  %s7770_s6 = inlined_call_operand.hbm [shape: f32[2,3], index: 6, kind: input, shape index: {}]   ;;  %s7771_s7 = inlined_call_operand.hbm [shape: f32[32,32], index: 7, kind: input, shape index: {}]   ;;  %s7772_s8 = inlined_call_operand.hbm [shape: f32[1,32], index: 8, kind: input, shape index: {}]   ;;  %s7773_s9 = inlined_call_operand.hbm [shape: f32[2,64,32], index: 9, kind: output, shape index: {}]  }
   0x1   :  { %7956 = sst [smem:[#allocation152_spill]] %s7765_s1 }
   0x2   :  { %7957 = sst [smem:[#allocation153_spill]] %s7766_s2 }
   0x3   :  { %7958 = sst [smem:[#allocation154_spill]] %s7767_s3 }
   0x4   :  { %7959 = sst [smem:[#allocation155_spill]] %s7768_s4 }
   0x5   :  { %7960 = sst [smem:[#allocation156_spill]] %s7769_s5 }
   0x6   :  { %7961 = sst [smem:[#allocation157_spill]] %s7773_s9 }
   0x7   :  { %14 = vsyncpa [#allocation7], 0 }
   0x8   :  { %16 = vsyncpa [#allocation7 + $0x1], 0 }
   0x9   :  { %17 = vsyncpa [#allocation11], 0 }
   0xa   :  { %19 = vsyncpa [#allocation11 + $0x1], 0 }
   0xb   :  { %20 = vsyncpa [#allocation14], 0 }
   0xc   :  { %22 = vsyncpa [#allocation14 + $0x1], 0 }
   0xd   :  { %23 = vsyncpa [#allocation17], 0 }
   0xe   :  { %24 = vsyncpa [#allocation9], 0 }
   0xf   :  { %25 = vsyncpa [#allocation21], 0 }
  0x10   :  { %26 = vsyncpa [#allocation8], 0 }
  0x11   :  { %28 = vsyncpa [#allocation8 + $0x1], 0  ;;  %s5226_s30 = smov 0   ;;  %s5228_s10 = smov 0  }
  0x12   :  { %s5230_s11 = smov 0   ;;  %s5232_s12 = smov 0  }
  0x13   :  { %s5234_s13 = smov 0   ;;  %s5236_s14 = smov 0  }
  0x14   :  { %s5238_s15 = smov 0   ;;  %s5240_s16 = smov 0  }
  0x15   :  { %s5242_s17 = smov 0   ;;  %s5244_s18 = smov 0  }
  0x16   :  { %s5246_s19 = smov 0  }
  0x17 LB: > { %7962 = sst [smem:[#allocation33_spill]] %s5088_s30  ;;  %s5282_s20 = sadd.s32 4294967295, %s5128_s19   ;;  %s5128_s19 = sphi %s5246_s19, %s34_s19   ;;  %s5124_s18 = sphi %s5244_s18, %s8427_s18   ;;  %s5120_s17 = sphi %s5242_s17, %s8419_s17   ;;  %s5116_s16 = sphi %s5240_s16, %s8426_s16   ;;  %s5112_s15 = sphi %s5238_s15, %s8418_s15   ;;  %s5108_s14 = sphi %s5236_s14, %s8425_s14   ;;  %s5104_s13 = sphi %s5234_s13, %s8424_s13   ;;  %s5100_s12 = sphi %s5232_s12, %s8416_s12   ;;  %s5096_s11 = sphi %s5230_s11, %s8423_s11   ;;  %s5092_s10 = sphi %s5228_s10, %s8422_s10   ;;  %s5088_s30 = sphi %s5226_s30, %s8421_s30  }
  0x18   : > { %7963 = sst [smem:[#allocation34_spill]] %s5100_s12  ;;  %p3954_p0 = scmp.ge.s32.totalorder %s5128_s19, 1 }
  0x19   : > { %7964 = sst [smem:[#allocation35_spill]] %s5104_s13  ;;  %p7775_p1 = scmp.eq.s32.totalorder %s5282_s20, 0 }
  0x1a   : > { %7965 = sst [smem:[#allocation36_spill]] %s5112_s15  ;;  %p292_p2 = scmp.lt.s32.totalorder %s5128_s19, 9 }
  0x1b   : > { %7966 = sst [smem:[#allocation37_spill]] %s5116_s16  ;;  %s5130_s22 = smov [#allocation15]  }
  0x1c   : > { %7967 = sst [smem:[#allocation38_spill]] %s5120_s17  ;;  %p5287_p3 = pnand %p3954_p0, %p292_p2 }
  0x1d   : > { %s304_s23 = sshll.u32 %s5130_s22, 4  ;;  %s5131_s25 = smov [#allocation16]   ;;  %s305_s23 = int_to_ptr.vmem [resolvable:$true] %s304_s23 }
  0x1e   : > { %s7968_s21 = scalar_select %p5287_p3, 1, 0 }
  0x1f   : > { %p4266_p4 = pneg %p5287_p3  ;;  %s317_s26 = sshll.u32 %s5131_s25, 4  ;;  %s5299_s26 = int_to_ptr.vmem [resolvable:$true] %s317_s26 }
  0x20   : > { %7969 = sst [smem:[#allocation39_spill]] %s7968_s21  ;;  %s7971_s4 = sld [smem:[#allocation155_spill]] }
  0x21   : > { %p5295_p5 = pnand %p4266_p4, %p7775_p1 }
  0x23   : > { %s7970_s24 = scalar_select %p5295_p5, 1, 0 }
  0x24   : > { %p5309_p7 = pneg %p5295_p5 }
  0x26   : > { %s4729_s29 = scalar_lea.hbm %s7971_s4, 1024 }
  0x27   : > { %p4730_p6 = scmp.ne.s32.totalorder %s7971_s4, %s4729_s29  ;;  %p4736_p10 = scmp.lt.u32.totalorder %s4729_s29, %s7971_s4 }
  0x29   : > { %p4732_p8 = pnand %p5309_p7, %p4730_p6 }
  0x2b   : > { %p4733_p9 = pneg %p4732_p8 }
  0x2d   : > { %p4738_p11 = pnand %p4736_p10, %p4733_p9 }
  0x2f   : > { %4741 = shalt.err (!%p4738_p11)
}
  0x30   : > { %s4742_s27 = scalar_lea.vmem %s305_s23, 1024  ;;  %p4750_p2 = scmp.lt.s32.totalorder %s305_s23, %s305_s23 }
  0x31   : > { %p4743_p12 = scmp.ne.s32.totalorder %s305_s23, %s4742_s27  ;;  %p4751_p4 = scmp.lt.s32.totalorder %s4742_s27, %s4742_s27 }
  0x33   : > { %p4745_p13 = pnand %p4743_p12, %p5309_p7  ;;  %p4752_p1 = por %p4751_p4, %p4750_p2 }
  0x35   : > { %p4746_p0 = pneg %p4745_p13 }
  0x37   : > { %p4753_p3 = pnand %p4752_p1, %p4746_p0 }
  0x39   : > { %4756 = shalt.err (!%p4753_p3)
}
  0x3a   : > { %s7780_s9 = smov 128   ;;  %s7782_s16 = smov 8  }
  0x3b   : > { %4269 = dma.hbm_to_vmem [thread:$0]  (!%p5295_p5), %s7971_s4, 1024, %s305_s23, [#allocation14], %s7780_s9, %s7780_s9, %s7782_s16  }
  0x3c   : > { %s7973_s5 = sld [smem:[#allocation156_spill]] }
  0x42   : > { %s4757_s21 = scalar_lea.hbm %s7973_s5, 2048 }
  0x43   : > { %p4758_p1 = scmp.ne.s32.totalorder %s7973_s5, %s4757_s21  ;;  %p4764_p8 = scmp.lt.u32.totalorder %s4757_s21, %s7973_s5 }
  0x45   : > { %p4760_p3 = pnand %p4758_p1, %p5309_p7 }
  0x47   : > { %p4761_p6 = pneg %p4760_p3 }
  0x49   : > { %p4766_p9 = pnand %p4764_p8, %p4761_p6 }
  0x4b   : > { %4769 = shalt.err (!%p4766_p9)
}
  0x4c   : > { %s4770_s23 = scalar_lea.vmem %s5299_s26, 2048  ;;  %p4778_p13 = scmp.lt.s32.totalorder %s5299_s26, %s5299_s26 }
  0x4d   : > { %p4771_p10 = scmp.ne.s32.totalorder %s5299_s26, %s4770_s23  ;;  %p4779_p0 = scmp.lt.s32.totalorder %s4770_s23, %s4770_s23 }
  0x4f   : > { %p4773_p11 = pnand %p4771_p10, %p5309_p7  ;;  %p4780_p2 = por %p4779_p0, %p4778_p13 }
  0x51   : > { %p4774_p12 = pneg %p4773_p11 }
  0x53   : > { %p4781_p4 = pnand %p4780_p2, %p4774_p12 }
  0x55   : > { %4784 = shalt.err (!%p4781_p4)
}
  0x56   : > { %4272 = dma.hbm_to_vmem [thread:$0]  (!%p5295_p5), %s7973_s5, 2048, %s5299_s26, [#allocation17], %s7780_s9, %s7780_s9, %s7782_s16  }
  0x57   : > { %s3953_s30 = sadd.s32 4294967294, %s5128_s19   ;;  %s43_s21 = sadd.s32 1, %s5120_s17 }
  0x58   : > { %p44_p1 = scmp.ge.s32.totalorder %s43_s21, 4  ;;  %s46_s15 = sadd.s32 1, %s5124_s18 }
  0x59   : > { %s55_s28 = sadd.s32 1, %s5108_s14  ;;  %p62_p3 = scmp.ne.s32.totalorder %s5108_s14, %s5104_s13 }
  0x5a   : > { %s8429_s21 = smov (%p44_p1, %s43_s21), 0  ;;  %s8431_s15 = smov (!%p44_p1, %s46_s15), %s5124_s18 }
  0x5b   : > { %7974 = sst [smem:[#allocation40_spill]] %s8429_s21  ;;  %s51_s29 = ssub.s32 %s5120_s17, %s8429_s21 }
  0x5c   : > { %p7792_p6 = scmp.eq.s32.totalorder %s5128_s19, 0  ;;  %p48_p8 = scmp.ge.s32.totalorder %s8431_s15, 2 }
  0x5d   : > { %p68_p9 = scmp.ne.s32.totalorder %s5104_s13, %s5100_s12  ;;  %p279_p11 = scmp.eq.s32.totalorder %s5282_s20, 7 }
  0x5e   : > { %p5370_p10 = por %p7792_p6, %p62_p3  ;;  %s8433_s15 = smov (%p48_p8, %s8431_s15), 0 }
  0x5f   : > { %7976 = sst [smem:[#allocation41_spill]] %s8433_s15  ;;  %p7977_p12 = scmp.eq.s32.totalorder %s5282_s20, 0 }
  0x60   : > { %p5383_p0 = por %p279_p11, %p62_p3  ;;  %s5389_s23 = ssub.s32 %s5124_s18, %s8433_s15 }
  0x61   : > { %p5379_p13 = por %p7977_p12, %p68_p9  ;;  %p285_p2 = scmp.eq.s32.totalorder %s3953_s30, 7 }
  0x62   : > { %s7980_s27 = scalar_select %p5383_p0, 1, 0 }
  0x63   : > { %s7978_s25 = scalar_select %p5379_p13, 1, 0 }
  0x64   : > { %7981 = sst [smem:[#allocation43_spill]] %s7980_s27  ;;  %s52_s2 = sor.u32 %s51_s29, %s5389_s23 }
  0x65   : > { %7979 = sst [smem:[#allocation42_spill]] %s7978_s25  ;;  %p53_p1 = scmp.eq.s32.totalorder %s52_s2, 0 }
  0x66   : > { %p5393_p8 = por %p285_p2, %p68_p9  ;;  %p7791_p12 = scmp.lt.s32.totalorder %s5128_s19, 8 }
  0x67   : > { %s7785_s9 = sand.u32 1, %s5108_s14   ;;  %s3962_s5 = sshll.u32 %s5120_s17, 1 }
  0x68   : > { %s7982_s3 = scalar_select %p5393_p8, 1, 0 }
  0x69   : > { %s5400_s16 = scalar_select %p53_p1, %s5108_s14, %s55_s28  }
  0x6a   : > { %7983 = sst [smem:[#allocation44_spill]] %s7982_s3  ;;  %s5404_s4 = sshll.u32 %s7785_s9, 4 }
  0x6b   : > { %7984 = sst [smem:[#allocation45_spill]] %s5400_s16  ;;  %s3963_s15 = sshll.u32 %s5124_s18, 3 }
  0x6c   : > { %p5412_p3 = pnand %p7791_p12, %p5370_p10  ;;  %s5416_s29 = sadd.s32 %s3963_s15, %s3962_s5 }
  0x6d   : > { %s7797_s28 = sand.u32 1, %s5128_s19   ;;  %s7788_s2 = sshll.u32 %s5416_s29, 7 }
  0x6e   : > { %s7985_s30 = scalar_select %p5412_p3, 1, 0 }
  0x6f   : > { %s7986_s1 = sld [smem:[#allocation152_spill]]  ;;  %s391_s26 = scalar_lea.vmem [#allocation10], %s5404_s4 }
  0x70   : > { %s400_s16 = sshll.u32 %s391_s26, 4  ;;  %s5432_s5 = scalar_lea.sflag [#allocation11], %s7797_s28  ;;  %s5428_s16 = int_to_ptr.vmem [resolvable:$true] %s400_s16 }
  0x71   : > { %p7803_p10 = pneg %p5412_p3 }
  0x75   : > { %s5425_s17 = scalar_lea.hbm %s7986_s1, %s7788_s2  ;;  %s4790_s2 = scalar_lea.hbm %s7986_s1, 2048 }
  0x76   : > { %s4785_s15 = scalar_lea.hbm %s5425_s17, 256  ;;  %p4791_p1 = scmp.lt.u32.totalorder %s5425_s17, %s7986_s1 }
  0x77   : > { %p4786_p9 = scmp.ne.s32.totalorder %s5425_s17, %s4785_s15  ;;  %p4792_p12 = scmp.lt.u32.totalorder %s4790_s2, %s4785_s15 }
  0x78   : > { %p4794_p4 = scmp.lt.u32.totalorder %s4785_s15, %s5425_s17 }
  0x79   : > { %p4788_p11 = pnand %p7803_p10, %p4786_p9  ;;  %p4793_p6 = por %p4792_p12, %p4791_p1 }
  0x7b   : > { %p4789_p2 = pneg %p4788_p11  ;;  %p4795_p8 = por %p4794_p4, %p4793_p6 }
  0x7d   : > { %p4796_p0 = pnand %p4795_p8, %p4789_p2 }
  0x7f   : > { %4799 = shalt.err (!%p4796_p0)
}
  0x80   : > { %s4800_s26 = scalar_lea.vmem %s5428_s16, 256  ;;  %s5134_s9 = smov [#allocation10]  }
  0x81   : > { %p4801_p9 = scmp.ne.s32.totalorder %s5428_s16, %s4800_s26  ;;  %s4805_s21 = sshll.u32 %s5134_s9, 4  ;;  %s4806_s21 = int_to_ptr.vmem [resolvable:$false] %s4805_s21 }
  0x82   : > { %s4807_s12 = scalar_lea.vmem %s4806_s21, 512  ;;  %p4808_p5 = scmp.lt.s32.totalorder %s5428_s16, %s4806_s21 }
  0x83   : > { %p4803_p11 = pnand %p4801_p9, %p7803_p10  ;;  %p4809_p12 = scmp.lt.s32.totalorder %s4807_s12, %s4800_s26 }
  0x85   : > { %p4804_p13 = pneg %p4803_p11  ;;  %p4810_p1 = por %p4809_p12, %p4808_p5 }
  0x87   : > { %p4811_p6 = pnand %p4810_p1, %p4804_p13 }
  0x89   : > { %4814 = shalt.err (!%p4811_p6)
}
  0x8a   : > { %s7987_s3 = smov 8   ;;  %s7988_s2 = smov 128  }
  0x8b   : > { %4288 = dma.hbm_to_vmem [thread:$0]  (!%p5412_p3), %s5425_s17, 256, %s5428_s16, %s5432_s5, %s7988_s2, %s7988_s2, %s7987_s3  }
  0x8c   : > { %s4815_s9 = scalar_lea.hbm %s7770_s6, 32 }
  0x8d   : > { %p4816_p5 = scmp.ne.s32.totalorder %s7770_s6, %s4815_s9  ;;  %p4822_p4 = scmp.lt.u32.totalorder %s4815_s9, %s7770_s6 }
  0x8f   : > { %p4818_p13 = pnand %p4816_p5, %p5309_p7 }
  0x91   : > { %p4819_p0 = pneg %p4818_p13 }
  0x93   : > { %p4824_p8 = pnand %p4822_p4, %p4819_p0 }
  0x95   : > { %4827 = shalt.err (!%p4824_p8)
}
  0x96   : > { %s5135_s27 = smov [#allocation18]   ;;  %p7989_p2 = scmp.ne.s32.totalorder %s7970_s24, 0 }
  0x97   : > { %s5136_s28 = smov [#allocation19]   ;;  %s5137_s15 = smov [#allocation20]  }
  0x98   : > { %4275 = dma.hbm_to_smem (!%p7989_p2), %s7770_s6, 32, %s5135_s27, [#allocation9]  }
  0x99   : > { %s339_s1 = sshll.u32 %s5136_s28, 4  ;;  %s353_s21 = sshll.u32 %s5137_s15, 4  ;;  %s340_s1 = int_to_ptr.vmem [resolvable:$true] %s339_s1  ;;  %s5479_s21 = int_to_ptr.vmem [resolvable:$true] %s353_s21 }
  0x9a   : > { %s4828_s9 = scalar_lea.hbm %s7771_s7, 512 }
  0x9b   : > { %p4829_p9 = scmp.ne.s32.totalorder %s7771_s7, %s4828_s9  ;;  %p4835_p1 = scmp.lt.u32.totalorder %s4828_s9, %s7771_s7 }
  0x9d   : > { %p4831_p11 = pnand %p4829_p9, %p5309_p7 }
  0x9f   : > { %p4832_p12 = pneg %p4831_p11 }
  0xa1   : > { %p4837_p6 = pnand %p4835_p1, %p4832_p12 }
  0xa3   : > { %4840 = shalt.err (!%p4837_p6)
}
  0xa4   : > { %s4841_s16 = scalar_lea.vmem %s340_s1, 512  ;;  %p4849_p4 = scmp.lt.s32.totalorder %s340_s1, %s340_s1 }
  0xa5   : > { %p4842_p5 = scmp.ne.s32.totalorder %s340_s1, %s4841_s16  ;;  %p4850_p8 = scmp.lt.s32.totalorder %s4841_s16, %s4841_s16 }
  0xa7   : > { %p4844_p13 = pnand %p4842_p5, %p5309_p7  ;;  %p4851_p10 = por %p4850_p8, %p4849_p4 }
  0xa9   : > { %p4845_p0 = pneg %p4844_p13 }
  0xab   : > { %p4852_p3 = pnand %p4851_p10, %p4845_p0 }
  0xad   : > { %4855 = shalt.err (!%p4852_p3)
}
  0xae   : > { %4278 = dma.hbm_to_vmem [thread:$0]  (!%p7989_p2), %s7771_s7, 512, %s340_s1, [#allocation17], %s7988_s2, %s7988_s2, %s7987_s3  }
  0xaf   : > { %s4856_s26 = scalar_lea.hbm %s7772_s8, 16 }
  0xb0   : > { %p4857_p9 = scmp.ne.s32.totalorder %s7772_s8, %s4856_s26  ;;  %p4863_p11 = scmp.lt.u32.totalorder %s4856_s26, %s7772_s8 }
  0xb2   : > { %p4859_p3 = pnand %p4857_p9, %p5309_p7 }
  0xb4   : > { %p4860_p10 = pneg %p4859_p3 }
  0xb6   : > { %p4865_p12 = pnand %p4863_p11, %p4860_p10 }
  0xb8   : > { %4868 = shalt.err (!%p4865_p12)
}
  0xb9   : > { %s4869_s1 = scalar_lea.vmem %s5479_s21, 16  ;;  %s4876_s16 = scalar_lea.vmem %s5479_s21, 32 }
  0xba   : > { %p4870_p1 = scmp.ne.s32.totalorder %s5479_s21, %s4869_s1  ;;  %p4877_p13 = scmp.lt.s32.totalorder %s5479_s21, %s5479_s21 }
  0xbb   : > { %p4878_p0 = scmp.lt.s32.totalorder %s4876_s16, %s4869_s1 }
  0xbc   : > { %p4872_p6 = pnand %p4870_p1, %p5309_p7 }
  0xbd   : > { %p4879_p4 = por %p4878_p0, %p4877_p13 }
  0xbe   : > { %p4873_p5 = pneg %p4872_p6 }
  0xc0   : > { %p4880_p8 = pnand %p4879_p4, %p4873_p5 }
  0xc2   : > { %4883 = shalt.err (!%p4880_p8)
}
  0xc3   : > { %4281 = dma.hbm_to_vmem [thread:$0]  (!%p7989_p2), %s7772_s8, 16, %s5479_s21, [#allocation21]  }
  0xc4   : > { %s7990_s22 = sshll.u32 %s5416_s29, 7  ;;  %s368_s24 = scalar_lea.vmem [#allocation6], %s5404_s4 }
  0xc5   : > { %s5531_s26 = scalar_lea.hbm %s7764_s0, %s7990_s22  ;;  %s377_s9 = sshll.u32 %s368_s24, 4  ;;  %s5534_s9 = int_to_ptr.vmem [resolvable:$true] %s377_s9 }
  0xc6   : > { %s7991_s12 = sand.u32 1, %s5108_s14   ;;  %s4884_s27 = scalar_lea.hbm %s5531_s26, 256 }
  0xc7   : > { %s5538_s17 = scalar_lea.sflag [#allocation7], %s7991_s12  ;;  %p4885_p7 = scmp.ne.s32.totalorder %s5531_s26, %s4884_s27 }
  0xc8   : > { %p7992_p2 = scmp.ne.s32.totalorder %s7985_s30, 0  ;;  %s4889_s1 = scalar_lea.hbm %s7764_s0, 2048 }
  0xc9   : > { %p4890_p11 = scmp.lt.u32.totalorder %s5531_s26, %s7764_s0  ;;  %p4891_p12 = scmp.lt.u32.totalorder %s4889_s1, %s4884_s27 }
  0xca   : > { %p7993_p9 = pneg %p7992_p2  ;;  %p4893_p6 = scmp.lt.u32.totalorder %s4884_s27, %s5531_s26 }
  0xcb   : > { %p4892_p1 = por %p4891_p12, %p4890_p11 }
  0xcc   : > { %p4887_p3 = pnand %p4885_p7, %p7993_p9 }
  0xcd   : > { %p4894_p5 = por %p4893_p6, %p4892_p1 }
  0xce   : > { %p4888_p10 = pneg %p4887_p3 }
  0xd0   : > { %p4895_p13 = pnand %p4894_p5, %p4888_p10 }
  0xd2   : > { %4898 = shalt.err (!%p4895_p13)
}
  0xd3   : > { %s4899_s4 = scalar_lea.vmem %s5534_s9, 256  ;;  %p7994_p4 = pmov %p7993_p9 }
  0xd4   : > { %p4900_p0 = scmp.ne.s32.totalorder %s5534_s9, %s4899_s4  ;;  %s5138_s25 = smov [#allocation6]  }
  0xd5   : > { %s4904_s22 = sshll.u32 %s5138_s25, 4  ;;  %s4905_s22 = int_to_ptr.vmem [resolvable:$false] %s4904_s22 }
  0xd6   : > { %p4902_p8 = pnand %p4900_p0, %p7994_p4  ;;  %s4906_s28 = scalar_lea.vmem %s4905_s22, 512 }
  0xd7   : > { %p4907_p9 = scmp.lt.s32.totalorder %s5534_s9, %s4905_s22  ;;  %p4908_p3 = scmp.lt.s32.totalorder %s4906_s28, %s4899_s4 }
  0xd8   : > { %p4903_p7 = pneg %p4902_p8 }
  0xd9   : > { %p4909_p11 = por %p4908_p3, %p4907_p9 }
  0xdb   : > { %p4910_p12 = pnand %p4909_p11, %p4903_p7 }
  0xdd   : > { %4913 = shalt.err (!%p4910_p12)
}
  0xde   : > { %s7995_s15 = sld [smem:[#allocation33_spill]]  ;;  %s109_s30 = sadd.s32 1, %s5096_s11 }
  0xdf   : > { %4285 = dma.hbm_to_vmem [thread:$0]  (!%p7992_p2), %s5531_s26, 256, %s5534_s9, %s5538_s17, %s7988_s2, %s7988_s2, %s7987_s3  }
  0xe0   : > { %p7996_p10 = scmp.eq.s32.totalorder %s5389_s23, 0  ;;  %p116_p1 = scmp.ne.s32.totalorder %s5096_s11, %s5092_s10 }
  0xe1   : > { %s412_s12 = sand.u32 1, %s5096_s11   ;;  %s4034_s27 = sshll.u32 %s5124_s18, 8 }
  0xe2   : > { %s5571_s24 = scalar_select %p7996_p10, %s5096_s11, %s109_s30  }
  0xe3   : > { %p7997_p5 = scmp.eq.s32.totalorder %s5128_s19, 0  ;;  %p7998_p0 = scmp.eq.s32.totalorder %s5282_s20, 0 }
  0xe4   : > { %p122_p6 = scmp.ne.s32.totalorder %s5092_s10, %s7995_s15  ;;  %s3969_s21 = sshll.u32 %s412_s12, 4 }
  0xe5   : > { %p118_p13 = por %p116_p1, %p7997_p5  ;;  %s8000_s26 = sld [smem:[#allocation153_spill]] }
  0xe6   : > { %p5583_p4 = por %p122_p6, %p7998_p0  ;;  %p8001_p2 = scmp.lt.s32.totalorder %s5128_s19, 8 }
  0xe7   : > { %s414_s17 = scalar_lea.vmem [#allocation12], %s3969_s21 }
  0xe8   : > { %s7999_s29 = scalar_select %p5583_p4, 1, 0 }
  0xe9   : > { %p5596_p8 = pnand %p8001_p2, %p118_p13  ;;  %s421_s13 = sshll.u32 %s414_s17, 4  ;;  %s5600_s13 = int_to_ptr.vmem [resolvable:$true] %s421_s13 }
  0xeb   : > { %s5592_s9 = scalar_lea.hbm %s8000_s26, %s4034_s27  ;;  %p4916_p9 = pneg %p5596_p8 }
  0xec   : > { %s4914_s4 = scalar_lea.hbm %s5592_s9, 256  ;;  %s4919_s28 = scalar_lea.hbm %s8000_s26, 512 }
  0xed   : > { %p4915_p7 = scmp.ne.s32.totalorder %s5592_s9, %s4914_s4  ;;  %p4920_p12 = scmp.lt.u32.totalorder %s5592_s9, %s8000_s26 }
  0xee   : > { %p4921_p10 = scmp.lt.u32.totalorder %s4919_s28, %s4914_s4  ;;  %p4923_p6 = scmp.lt.u32.totalorder %s4914_s4, %s5592_s9 }
  0xef   : > { %p4917_p3 = pnand %p4916_p9, %p4915_p7 }
  0xf0   : > { %p4922_p1 = por %p4921_p10, %p4920_p12 }
  0xf1   : > { %p4918_p11 = pneg %p4917_p3 }
  0xf2   : > { %p4924_p5 = por %p4923_p6, %p4922_p1 }
  0xf4   : > { %p4925_p13 = pnand %p4924_p5, %p4918_p11 }
  0xf6   : > { %4928 = shalt.err (!%p4925_p13)
}
  0xf7   : > { %s4929_s27 = scalar_lea.vmem %s5600_s13, 256  ;;  %s5139_s21 = smov [#allocation12]  }
  0xf8   : > { %p4930_p0 = scmp.ne.s32.totalorder %s5600_s13, %s4929_s27  ;;  %s4934_s1 = sshll.u32 %s5139_s21, 4  ;;  %s4935_s1 = int_to_ptr.vmem [resolvable:$false] %s4934_s1 }
  0xf9   : > { %s4936_s16 = scalar_lea.vmem %s4935_s1, 512  ;;  %p4937_p3 = scmp.lt.s32.totalorder %s5600_s13, %s4935_s1 }
  0xfa   : > { %p4932_p2 = pnand %p4930_p0, %p4916_p9  ;;  %p4938_p12 = scmp.lt.s32.totalorder %s4936_s16, %s4929_s27 }
  0xfc   : > { %p4933_p7 = pneg %p4932_p2  ;;  %p4939_p10 = por %p4938_p12, %p4937_p3 }
  0xfe   : > { %p4940_p1 = pnand %p4939_p10, %p4933_p7 }
 0x100   : > { %4943 = shalt.err (!%p4940_p1)
}
 0x101   : > { %4291 = dma.hbm_to_vmem [thread:$0]  (!%p5596_p8), %s5592_s9, 256, %s5600_s13, %s5432_s5, %s7988_s2, %s7988_s2, %s7987_s3  }
 0x102   : > { %s3972_s17 = sshll.u32 %s412_s12, 2  ;;  %s3973_s4 = sshll.u32 %s5124_s18, 6 }
 0x103   : > { %s8003_s28 = sld [smem:[#allocation154_spill]]  ;;  %s435_s30 = scalar_lea.vmem [#allocation13], %s3972_s17 }
 0x104   : > { %s442_s27 = sshll.u32 %s435_s30, 4  ;;  %s8004_s21 = sand.u32 1, %s5128_s19   ;;  %s443_s27 = int_to_ptr.vmem [resolvable:$true] %s442_s27 }
 0x105   : > { %s432_s1 = scalar_lea.sflag [#allocation14], %s8004_s21 }
 0x109   : > { %s5637_s15 = scalar_lea.hbm %s8003_s28, %s3973_s4  ;;  %s4949_s2 = scalar_lea.hbm %s8003_s28, 128 }
 0x10a   : > { %s4944_s16 = scalar_lea.hbm %s5637_s15, 64  ;;  %p4950_p13 = scmp.lt.u32.totalorder %s5637_s15, %s8003_s28 }
 0x10b   : > { %p4945_p11 = scmp.ne.s32.totalorder %s5637_s15, %s4944_s16  ;;  %p4951_p0 = scmp.lt.u32.totalorder %s4949_s2, %s4944_s16 }
 0x10c   : > { %p4953_p7 = scmp.lt.u32.totalorder %s4944_s16, %s5637_s15 }
 0x10d   : > { %p4947_p6 = pnand %p4945_p11, %p4916_p9  ;;  %p4952_p2 = por %p4951_p0, %p4950_p13 }
 0x10f   : > { %p4948_p5 = pneg %p4947_p6  ;;  %p4954_p3 = por %p4953_p7, %p4952_p2 }
 0x111   : > { %p4955_p12 = pnand %p4954_p3, %p4948_p5 }
 0x113   : > { %4958 = shalt.err (!%p4955_p12)
}
 0x114   : > { %s4959_s13 = scalar_lea.vmem %s443_s27, 64  ;;  %s5140_s17 = smov [#allocation13]  }
 0x115   : > { %p4960_p10 = scmp.ne.s32.totalorder %s443_s27, %s4959_s13  ;;  %s4964_s4 = sshll.u32 %s5140_s17, 4  ;;  %s4965_s4 = int_to_ptr.vmem [resolvable:$false] %s4964_s4 }
 0x116   : > { %s4966_s25 = scalar_lea.vmem %s4965_s4, 128  ;;  %p4967_p6 = scmp.lt.s32.totalorder %s443_s27, %s4965_s4 }
 0x117   : > { %p4962_p1 = pnand %p4960_p10, %p4916_p9  ;;  %p4968_p4 = scmp.lt.s32.totalorder %s4966_s25, %s4959_s13 }
 0x119   : > { %p4963_p11 = pneg %p4962_p1  ;;  %p4969_p0 = por %p4968_p4, %p4967_p6 }
 0x11b   : > { %p4970_p13 = pnand %p4969_p0, %p4963_p11 }
 0x11d   : > { %4973 = shalt.err (!%p4970_p13)
}
 0x11e   : > { %4294 = dma.hbm_to_vmem [thread:$0]  (!%p5596_p8), %s5637_s15, 64, %s443_s27, %s432_s1  }
 0x11f   : > { %s8005_s22 = sld [smem:[#allocation39_spill]] }
 0x125   : > { %p8006_p5 = scmp.ne.s32.totalorder %s8005_s22, 0 }
 0x127   : > { %451 = sbr.rel (%p8006_p5) target bundleno = 3297 (0xce1), region = 56 }
 0x12e   : > { %s8007_s30 = sld [smem:[#allocation35_spill]]  ;;  %s8008_s21 = sld [smem:[#allocation42_spill]] }
 0x134   : > { %s5663_s16 = sand.u32 1, %s8007_s30   ;;  %p8009_p4 = scmp.ne.s32.totalorder %s8008_s21, 0 }
 0x135   : > { %s5666_s5 = sshll.u32 %s5663_s16, 4  ;;  %s454_s3 = scalar_lea.sflag [#allocation7], %s5663_s16 }
 0x136   : > { %s457_s2 = scalar_lea.vmem [#allocation6], %s5666_s5 }
 0x137   : > { %5047 = dma.done.wait (%p8009_p4), %s454_s3, 256  }
 0x138   : > { %5049 = vsyncadd (%p8009_p4), %s454_s3, 4294967040  ;;  %s462_s23 = sand.u32 1, %s5282_s20   ;;  %s466_s27 = scalar_lea.vmem [#allocation10], %s5666_s5 }
 0x139   : > { %s463_s15 = scalar_lea.sflag [#allocation11], %s462_s23 }
 0x13a   : > { %5051 = dma.done.wait (%p8009_p4), %s463_s15, 256  }
 0x13b   : > { %5053 = vsyncadd (%p8009_p4), %s463_s15, 4294967040  ;;  %s473_s1 = sand.u32 1, %s5092_s10   ;;  %p8010_p8 = scmp.ne.s32.totalorder %s7999_s29, 0 }
 0x13c   : > { %s3977_s12 = sshll.u32 %s473_s1, 4 }
 0x13d   : > { %s475_s9 = scalar_lea.vmem [#allocation12], %s3977_s12 }
 0x13e   : > { %5055 = dma.done.wait (%p8010_p8), %s463_s15, 256  }
 0x13f   : > { %5057 = vsyncadd (%p8010_p8), %s463_s15, 4294967040  ;;  %s5685_s13 = sshll.u32 %s473_s1, 2  ;;  %s481_s17 = scalar_lea.sflag [#allocation14], %s462_s23 }
 0x140   : > { %s484_s4 = scalar_lea.vmem [#allocation13], %s5685_s13 }
 0x141   : > { %5059 = dma.done.wait (%p8010_p8), %s481_s17, 64  }
 0x142   : > { %5061 = vsyncadd (%p8010_p8), %s481_s17, 4294967232  ;;  %p8011_p9 = scmp.eq.s32.totalorder %s5282_s20, 0 }
 0x144   : > { %5063 = dma.done.wait (%p8011_p9), [#allocation14], 1024   ;;  %p8012_p2 = pmov %p8011_p9 }
 0x146   : > { %5065 = vsyncadd (%p8012_p2), [#allocation14], 4294966272  ;;  %p8013_p7 = pmov %p8012_p2 }
 0x147   : > { %p8014_p3 = pmov %p8012_p2 }
 0x148   : > { %5067 = dma.done.wait (%p8013_p7), [#allocation17], 2048  }
 0x149   : > { %5069 = vsyncadd (%p8014_p3), [#allocation17], 4294965248  ;;  %p8015_p12 = pmov %p8012_p2 }
 0x14a   : > { %p8016_p10 = pmov %p8012_p2 }
 0x14b   : > { %5071 = dma.done.wait (%p8015_p12), [#allocation9], 32  }
 0x14c   : > { %5073 = vsyncadd (%p8016_p10), [#allocation9], 4294967264  ;;  %p8017_p1 = pmov %p8012_p2 }
 0x14e   : > { %5075 = dma.done.wait (%p8017_p1), [#allocation17], 512   ;;  %p8018_p11 = pmov %p8017_p1 }
 0x14f   : > { %p8019_p6 = pmov %p8017_p1 }
 0x150   : > { %5077 = vsyncadd (%p8018_p11), [#allocation17], 4294966784 }
 0x151   : > { %5079 = dma.done.wait (%p8019_p6), [#allocation21], 16   ;;  %p8020_p0 = pmov %p8017_p1 }
 0x153   : > { %5081 = vsyncadd (%p8020_p0), [#allocation21], 4294967280 }
 0x154   : > { %509 = sfence }
 0x155   : > { %s5713_s29 = scalar_lea.vmem [#allocation22], %s5666_s5  ;;  %s8021_s25 = sld [smem:[#allocation36_spill]] }
 0x15b   : > { %p3985_p13 = scmp.ne.s32.totalorder %s8021_s25, 0 }
 0x15c   : > { %v562_v0 = vld [vmem:[%s475_s9] sm:$0xff] (!%p3985_p13)  ;;  %v563_v1 = vld [vmem:[%s475_s9 + $0x8] sm:$0xff] (!%p3985_p13)  ;;  %vm572_vm0 = vcmask (!%p3985_p13), 130048   ;;  %vm741_vm1 = vcmask (!%p3985_p13), 0  }
 0x15d   : > { %561 = sbr.rel (%p3985_p13) target bundleno = 821 (0x335), region = 96  ;;  %v564_v2 = vld [vmem:[#allocation16] sm:$0xff] (!%p3985_p13)  ;;  %v4172_v3 = vpack.c.bf16 (!%p3985_p13), %v563_v1, %v562_v0  ;;  %v565_v5 = vld [vmem:[#allocation16 + $0x8] sm:$0xff] (!%p3985_p13)  ;;  %v566_v7 = vld [vmem:[#allocation16 + $0x10] sm:$0xff] (!%p3985_p13) }
 0x15e   : > { %4089 = vmatprep.mubr.msk.f32.mxu0 (!%p3985_p13), %vm572_vm0, %v564_v2  ;;  %v776_v4 = vld [vmem:[#allocation16 + $0x40] sm:$0xff] (!%p3985_p13)  ;;  %v777_v6 = vld [vmem:[#allocation16 + $0x48] sm:$0xff] (!%p3985_p13)  ;;  %v778_v8 = vld [vmem:[#allocation16 + $0x50] sm:$0xff] (!%p3985_p13) }
 0x15f   : > { %4105 = vmatprep.mubr.msk.f32.mxu1 (!%p3985_p13), %vm572_vm0, %v776_v4  ;;  %4173 = vmatprep.subr.bf16.mxu0 (!%p3985_p13), %v4172_v3  ;;  %v567_v9 = vld [vmem:[#allocation16 + $0x18] sm:$0xff] (!%p3985_p13)  ;;  %v568_v11 = vld [vmem:[#allocation16 + $0x20] sm:$0xff] (!%p3985_p13)  ;;  %v569_v13 = vld [vmem:[#allocation16 + $0x28] sm:$0xff] (!%p3985_p13) }
 0x160   : > { %4177 = vmatprep.subr.bf16.mxu1 (!%p3985_p13), %v4172_v3  ;;  %4175 = vmatpush3.bf16.msra.mxu0 (!%p3985_p13), %v4172_v3  ;;  %v779_v10 = vld [vmem:[#allocation16 + $0x58] sm:$0xff] (!%p3985_p13)  ;;  %v780_v12 = vld [vmem:[#allocation16 + $0x60] sm:$0xff] (!%p3985_p13)  ;;  %v781_v14 = vld [vmem:[#allocation16 + $0x68] sm:$0xff] (!%p3985_p13) }
 0x161   : > { %4179 = vmatpush3.bf16.msra.mxu1 (!%p3985_p13), %v4172_v3  ;;  %v570_v15 = vld [vmem:[#allocation16 + $0x30] sm:$0xff] (!%p3985_p13)  ;;  %v571_v17 = vld [vmem:[#allocation16 + $0x38] sm:$0xff] (!%p3985_p13) }
 0x162   : > { %v782_v16 = vld [vmem:[#allocation16 + $0x70] sm:$0xff] (!%p3985_p13)  ;;  %v783_v18 = vld [vmem:[#allocation16 + $0x78] sm:$0xff] (!%p3985_p13) }
 0x163   : > { %4090 = vmatmul.mubr.msk.f32.vlgmr.msra.gmra.mrb[0].mxu0 (!%p3985_p13), %vm572_vm0, %v565_v5 }
 0x164   : > { %4106 = vmatmul.mubr.msk.f32.vlgmr.msra.gmra.mrb[0].mxu1 %vm572_vm0, %v777_v6  ;;  %4092 = vmatprep.mubr.msk.f32.mxu0 %vm572_vm0, %v566_v7 }
 0x165   : > { %4108 = vmatprep.mubr.msk.f32.mxu1 %vm572_vm0, %v778_v8 }
 0x167   : > { %4093 = vmatmul.mubr.msk.f32.gmra.mrb[2].mxu0 %vm572_vm0, %v567_v9 }
 0x168   : > { %4109 = vmatmul.mubr.msk.f32.gmra.mrb[2].mxu1 %vm572_vm0, %v779_v10  ;;  %4095 = vmatprep.mubr.msk.f32.mxu0 %vm572_vm0, %v568_v11 }
 0x169   : > { %4111 = vmatprep.mubr.msk.f32.mxu1 %vm572_vm0, %v780_v12 }
 0x16b   : > { %4096 = vmatmul.mubr.msk.f32.gmra.mrb[4].mxu0 %vm572_vm0, %v569_v13 }
 0x16c   : > { %4112 = vmatmul.mubr.msk.f32.gmra.mrb[4].mxu1 %vm572_vm0, %v781_v14  ;;  %4098 = vmatprep.mubr.msk.f32.mxu0 %vm572_vm0, %v570_v15 }
 0x16d   : > { %4114 = vmatprep.mubr.msk.f32.mxu1 %vm572_vm0, %v782_v16 }
 0x16f   : > { %4099 = vmatmul.mubr.msk.f32.gmra.mrb[6].mxu0 %vm572_vm0, %v571_v17 }
 0x170   : > { %4115 = vmatmul.mubr.msk.f32.gmra.mrb[6].mxu1 %vm572_vm0, %v783_v18 }
 0x236   : > { %v5732_v19 = vpop.f32.mrb[0].mxu0 }
 0x237   : > { %v5734_v20 = vpop.f32.mrb[0].mxu1  ;;  %v5736_v21 = vpop.f32.mrb[1].mxu0  ;;  %v707_v24 = vsel %vm572_vm0, %v5732_v19, -inf  ;;  %v723_v26 = vsel %vm572_vm0, %v5732_v19, inf }
 0x238   : > { %v5738_v22 = vpop.f32.mrb[1].mxu1  ;;  %v919_v23 = vsel %vm572_vm0, %v5734_v20, -inf  ;;  %v935_v25 = vsel %vm572_vm0, %v5734_v20, inf  ;;  %v706_v28 = vsel %vm572_vm0, %v5736_v21, -inf  ;;  %v722_v30 = vsel %vm572_vm0, %v5736_v21, inf }
 0x239   : > { %v918_v27 = vsel %vm572_vm0, %v5738_v22, -inf  ;;  %v934_v29 = vsel %vm572_vm0, %v5738_v22, inf  ;;  %v710_v32 = vmax.f32 %v706_v28, %v707_v24  ;;  %v726_v34 = vmin.f32 %v722_v30, %v723_v26 }
 0x23a   : > { %v922_v31 = vmax.f32 %v918_v27, %v919_v23  ;;  %v938_v33 = vmin.f32 %v934_v29, %v935_v25  ;;  %v5756_v35 = vpop.f32.mrb[2].mxu0 }
 0x23b   : > { %v5758_v36 = vpop.f32.mrb[2].mxu1  ;;  %v5760_v37 = vpop.f32.mrb[3].mxu0  ;;  %v709_v40 = vsel %vm572_vm0, %v5756_v35, -inf  ;;  %v725_v42 = vsel %vm572_vm0, %v5756_v35, inf }
 0x23c   : > { %v5762_v38 = vpop.f32.mrb[3].mxu1  ;;  %v921_v39 = vsel %vm572_vm0, %v5758_v36, -inf  ;;  %v937_v41 = vsel %vm572_vm0, %v5758_v36, inf  ;;  %v708_v44 = vsel %vm572_vm0, %v5760_v37, -inf  ;;  %v724_v46 = vsel %vm572_vm0, %v5760_v37, inf }
 0x23d   : > { %v920_v43 = vsel %vm572_vm0, %v5762_v38, -inf  ;;  %v936_v45 = vsel %vm572_vm0, %v5762_v38, inf  ;;  %v711_v48 = vmax.f32 %v708_v44, %v709_v40  ;;  %v727_v50 = vmin.f32 %v724_v46, %v725_v42 }
 0x23e   : > { %v923_v47 = vmax.f32 %v920_v43, %v921_v39  ;;  %v939_v49 = vmin.f32 %v936_v45, %v937_v41  ;;  %v4097_v55 = vpop.f32.mrb[4].mxu0 }
 0x23f   : > { %v712_v52 = vmax.f32 %v710_v32, %v711_v48  ;;  %v728_v54 = vmin.f32 %v726_v34, %v727_v50  ;;  %v4113_v56 = vpop.f32.mrb[4].mxu1  ;;  %703 = vst.msk [vmem:[#allocation4 + $0x8] sm:$0xff] %vm572_vm0, %v4097_v55  ;;  %v683_v57 = vpop.f32.mrb[5].mxu0 }
 0x240   : > { %v924_v51 = vmax.f32 %v922_v31, %v923_v47  ;;  %v940_v53 = vmin.f32 %v938_v33, %v939_v49  ;;  %915 = vst.msk [vmem:[#allocation4 + $0x28] sm:$0xff] %vm572_vm0, %v4113_v56  ;;  %v894_v58 = vpop.f32.mrb[5].mxu1  ;;  %702 = vst.msk [vmem:[#allocation4] sm:$0xff] %vm572_vm0, %v683_v57 }
 0x241   : > { %713 = vmax.xlane.f32.xlu0 %v712_v52  ;;  %914 = vst.msk [vmem:[#allocation4 + $0x20] sm:$0xff] %vm572_vm0, %v894_v58 }
 0x242   : > { %925 = vmax.xlane.f32.xlu1 %v924_v51  ;;  %v4100_v59 = vpop.f32.mrb[6].mxu0 }
 0x243   : > { %v4116_v60 = vpop.f32.mrb[6].mxu1  ;;  %705 = vst.msk [vmem:[#allocation4 + $0x18] sm:$0xff] %vm572_vm0, %v4100_v59  ;;  %v693_v61 = vpop.f32.mrb[7].mxu0 }
 0x244   : > { %917 = vst.msk [vmem:[#allocation4 + $0x38] sm:$0xff] %vm572_vm0, %v4116_v60  ;;  %v904_v62 = vpop.f32.mrb[7].mxu1  ;;  %704 = vst.msk [vmem:[#allocation4 + $0x10] sm:$0xff] %vm572_vm0, %v693_v61 }
 0x245   : > { %729 = vmin.xlane.f32.xlu0 %v728_v54  ;;  %916 = vst.msk [vmem:[#allocation4 + $0x30] sm:$0xff] %vm572_vm0, %v904_v62 }
 0x246   : > { %941 = vmin.xlane.f32.xlu1 %v940_v53 }
 0x2ce   : > { %v714_v0 = vpop.xlane.xlu0 %713 }
 0x2cf   : > { %v926_v63 = vpop.xlane.xlu1 %925  ;;  %v715_v2 = vrot.slane %v714_v0, 4 }
 0x2d0   : > { %v927_v1 = vrot.slane %v926_v63, 4 }
 0x2d1   : > { %v716_v4 = vmax.f32 %v714_v0, %v715_v2 }
 0x2d2   : > { %v928_v3 = vmax.f32 %v926_v63, %v927_v1  ;;  %v730_v6 = vpop.xlane.xlu0 %729 }
 0x2d3   : > { %v942_v5 = vpop.xlane.xlu1 %941  ;;  %v717_v8 = vrot.slane %v716_v4, 2  ;;  %v731_v10 = vrot.slane %v730_v6, 4 }
 0x2d4   : > { %v929_v7 = vrot.slane %v928_v3, 2  ;;  %v943_v9 = vrot.slane %v942_v5, 4 }
 0x2d5   : > { %v732_v12 = vmin.f32 %v730_v6, %v731_v10  ;;  %v718_v13 = vmax.f32 %v716_v4, %v717_v8 }
 0x2d6   : > { %v944_v11 = vmin.f32 %v942_v5, %v943_v9  ;;  %v930_v14 = vmax.f32 %v928_v3, %v929_v7 }
 0x2d7   : > { %v733_v16 = vrot.slane %v732_v12, 2  ;;  %v719_v17 = vrot.slane %v718_v13, 1 }
 0x2d8   : > { %v945_v15 = vrot.slane %v944_v11, 2  ;;  %v931_v25 = vrot.slane %v930_v14, 1 }
 0x2d9   : > { %v734_v23 = vmin.f32 %v732_v12, %v733_v16  ;;  %v720_v24 = vmax.f32 %v718_v13, %v719_v17 }
 0x2da   : > { %v946_v18 = vmin.f32 %v944_v11, %v945_v15  ;;  %v932_v30 = vmax.f32 %v930_v14, %v931_v25 }
 0x2db   : > { %4228 = vpush %v720_v24  ;;  %v735_v26 = vrot.slane %v734_v23, 1 }
 0x2dc   : > { %v947_v27 = vrot.slane %v946_v18, 1 }
 0x2dd   : > { %v736_v28 = vmin.f32 %v734_v23, %v735_v26 }
 0x2de   : > { %v948_v29 = vmin.f32 %v946_v18, %v947_v27 }
 0x2df   : > { %4230 = vpush %v736_v28 }
 0x2e0   : > { %4232 = vpush %v932_v30 }
 0x2e1   : > { %4234 = vpush %v948_v29 }
 0x30c   : > { %s4229_s20 = spop %4228 }
 0x310   : > { %s4231_s22 = spop %4230 }
 0x311   : > { %s738_s30 = sadd.f32 %s4231_s22, %s4229_s20  ;;  %s4233_s21 = spop %4232 }
 0x312   : > { %s4235_s3 = spop %4234 }
 0x313   : > { %s739_s23 = smul.f32 0.5, %s738_s30  ;;  %s950_s15 = sadd.f32 %s4235_s3, %s4233_s21 }
 0x315   : > { %v740_v31 = vstv %s739_s23  ;;  %s951_s1 = smul.f32 0.5, %s950_s15 }
 0x316   : > { %742 = vst.msk [vmem:[#allocation5] sm:$0x1] %vm741_vm1, %v740_v31  ;;  %v743_v32 = vsub.f32 %v5736_v21, %v740_v31  ;;  %v744_v33 = vsub.f32 %v5732_v19, %v740_v31  ;;  %v745_v34 = vsub.f32 %v5760_v37, %v740_v31  ;;  %v746_v39 = vsub.f32 %v5756_v35, %v740_v31 }
 0x317   : > { %v759_v40 = vsub.f32 %v740_v31, %v5736_v21  ;;  %v760_v41 = vsub.f32 %v740_v31, %v5732_v19  ;;  %v761_v42 = vsub.f32 %v740_v31, %v5760_v37  ;;  %v952_v46 = vstv %s951_s1 }
 0x318   : > { %v747_v43 = vmul.f32 1.442695, %v743_v32  ;;  %v749_v44 = vmul.f32 1.442695, %v744_v33  ;;  %v751_v45 = vmul.f32 1.442695, %v745_v34  ;;  %v762_v48 = vsub.f32 %v740_v31, %v5756_v35 }
 0x319   : > { %v753_v47 = vmul.f32 1.442695, %v746_v39  ;;  %954 = vst.msk [vmem:[#allocation5 + $0x1] sm:$0x1] %vm741_vm1, %v952_v46  ;;  %v763_v49 = vmul.f32 1.442695, %v759_v40  ;;  %v955_v50 = vsub.f32 %v5738_v22, %v952_v46  ;;  %v956_v21 = vsub.f32 %v5734_v20, %v952_v46 }
 0x31a   : > { %4440 = vpow2.f32 %v747_v43  ;;  %v765_v51 = vmul.f32 1.442695, %v760_v41  ;;  %v767_v19 = vmul.f32 1.442695, %v761_v42  ;;  %v957_v37 = vsub.f32 %v5762_v38, %v952_v46 }
 0x31b   : > { %4442 = vpow2.f32 %v749_v44  ;;  %v769_v52 = vmul.f32 1.442695, %v762_v48  ;;  %v958_v53 = vsub.f32 %v5758_v36, %v952_v46  ;;  %v959_v35 = vmul.f32 1.442695, %v955_v50 }
 0x31c   : > { %4444 = vpow2.f32 %v751_v45  ;;  %v972_v54 = vsub.f32 %v952_v46, %v5738_v22  ;;  %v961_v55 = vmul.f32 1.442695, %v956_v21  ;;  %v973_v56 = vsub.f32 %v952_v46, %v5734_v20 }
 0x31d   : > { %4446 = vpow2.f32 %v753_v47  ;;  %v963_v57 = vmul.f32 1.442695, %v957_v37  ;;  %v974_v58 = vsub.f32 %v952_v46, %v5762_v38  ;;  %v965_v59 = vmul.f32 1.442695, %v958_v53 }
 0x31e   : > { %4448 = vpow2.f32 %v763_v49  ;;  %v975_v60 = vsub.f32 %v952_v46, %v5758_v36  ;;  %v976_v61 = vmul.f32 1.442695, %v972_v54  ;;  %v978_v62 = vmul.f32 1.442695, %v973_v56 }
 0x31f   : > { %4450 = vpow2.f32 %v765_v51  ;;  %v980_v0 = vmul.f32 1.442695, %v974_v58 }
 0x320   : > { %4452 = vpow2.f32 %v767_v19  ;;  %v982_v20 = vmul.f32 1.442695, %v975_v60 }
 0x321   : > { %4454 = vpow2.f32 %v769_v52 }
 0x322   : > { %4456 = vpow2.f32 %v959_v35 }
 0x323   : > { %4458 = vpow2.f32 %v961_v55 }
 0x324   : > { %v4441_v63 = vpop.eup %4440  ;;  %4460 = vpow2.f32 %v963_v57 }
 0x325   : > { %v4443_v22 = vpop.eup %4442  ;;  %755 = vst.msk [vmem:[#allocation2] sm:$0xff] %vm572_vm0, %v4441_v63  ;;  %4462 = vpow2.f32 %v965_v59 }
 0x326   : > { %v4445_v1 = vpop.eup %4444  ;;  %756 = vst.msk [vmem:[#allocation2 + $0x8] sm:$0xff] %vm572_vm0, %v4443_v22  ;;  %4464 = vpow2.f32 %v976_v61 }
 0x327   : > { %v4447_v38 = vpop.eup %4446  ;;  %757 = vst.msk [vmem:[#allocation2 + $0x10] sm:$0xff] %vm572_vm0, %v4445_v1  ;;  %4466 = vpow2.f32 %v978_v62 }
 0x328   : > { %v4449_v36 = vpop.eup %4448  ;;  %758 = vst.msk [vmem:[#allocation2 + $0x18] sm:$0xff] %vm572_vm0, %v4447_v38  ;;  %4468 = vpow2.f32 %v980_v0 }
 0x329   : > { %v4451_v2 = vpop.eup %4450  ;;  %771 = vst.msk [vmem:[#allocation3] sm:$0xff] %vm572_vm0, %v4449_v36  ;;  %4470 = vpow2.f32 %v982_v20 }
 0x32a   : > { %v4453_v3 = vpop.eup %4452  ;;  %772 = vst.msk [vmem:[#allocation3 + $0x8] sm:$0xff] %vm572_vm0, %v4451_v2 }
 0x32b   : > { %v4455_v4 = vpop.eup %4454  ;;  %773 = vst.msk [vmem:[#allocation3 + $0x10] sm:$0xff] %vm572_vm0, %v4453_v3 }
 0x32c   : > { %v4457_v5 = vpop.eup %4456  ;;  %774 = vst.msk [vmem:[#allocation3 + $0x18] sm:$0xff] %vm572_vm0, %v4455_v4 }
 0x32d   : > { %v4459_v6 = vpop.eup %4458  ;;  %968 = vst.msk [vmem:[#allocation2 + $0x20] sm:$0xff] %vm572_vm0, %v4457_v5 }
 0x32e   : > { %v4461_v7 = vpop.eup %4460  ;;  %969 = vst.msk [vmem:[#allocation2 + $0x28] sm:$0xff] %vm572_vm0, %v4459_v6 }
 0x32f   : > { %v4463_v8 = vpop.eup %4462  ;;  %970 = vst.msk [vmem:[#allocation2 + $0x30] sm:$0xff] %vm572_vm0, %v4461_v7 }
 0x330   : > { %v4465_v9 = vpop.eup %4464  ;;  %971 = vst.msk [vmem:[#allocation2 + $0x38] sm:$0xff] %vm572_vm0, %v4463_v8 }
 0x331   : > { %v4467_v10 = vpop.eup %4466  ;;  %985 = vst.msk [vmem:[#allocation3 + $0x20] sm:$0xff] %vm572_vm0, %v4465_v9 }
 0x332   : > { %v4469_v11 = vpop.eup %4468  ;;  %986 = vst.msk [vmem:[#allocation3 + $0x28] sm:$0xff] %vm572_vm0, %v4467_v10 }
 0x333   : > { %v4471_v12 = vpop.eup %4470  ;;  %987 = vst.msk [vmem:[#allocation3 + $0x30] sm:$0xff] %vm572_vm0, %v4469_v11 }
 0x334   : > { %988 = vst.msk [vmem:[#allocation3 + $0x38] sm:$0xff] %vm572_vm0, %v4471_v12 }
 0x335 PF: > { %v1062_v13 = vld [vmem:[#allocation15] sm:$0xff]  ;;  %v1063_v14 = vld [vmem:[#allocation15 + $0x8] sm:$0xff]  ;;  %v1064_v15 = vld [vmem:[#allocation15 + $0x10] sm:$0xff]  ;;  %vm1066_vm2 = vcmask 261120   ;;  %v7856_v23 = vmov 0   ;;  %v7823_v28 = vmov 1   ;;  %v1002_v31 = vlaneseq }
 0x336   : > { %v4180_v16 = vpack.c.bf16 %v1063_v14, %v1062_v13  ;;  %v1065_v17 = vld [vmem:[#allocation15 + $0x18] sm:$0xff]  ;;  %4473 = vset.pattern.permute.xlu1 %v7856_v23  ;;  %4472 = vset.pattern.permute.xlu0 %v7856_v23  ;;  %v4004_v26 = vld [vmem:[#allocation5] ss:$0 sm:$0xff]  ;;  %v7873_v30 = vmov 2   ;;  %s5856_s5 = sld [smem:[#allocation18 + $0x80]]  ;;  %s6325_s9 = sld [smem:[#allocation18 + $0x1]] }
 0x337   : > { %v1060_v18 = vld [vmem:[%s457_s2] sm:$0xff]  ;;  %v4184_v24 = vpack.c.bf16 %v1065_v17, %v1064_v15  ;;  %1155 = vperm.xlu0 %4472, %v4004_v26   ;;  %v5831_v27 = vld [vmem:[%s466_s27 + $0x8] sm:$0xff]  ;;  %v5842_v32 = vshrl.u32 %v1002_v31, 7  ;;  %v7819_v31 = vmov 6   ;;  %s6323_s12 = sld [smem:[#allocation18]]  ;;  %s6329_s13 = sld [smem:[#allocation18 + $0x2]] }
 0x338   : > { %4125 = vmatprep.mubr.msk.f32.mxu0 %vm1066_vm2, %v1060_v18  ;;  %v989_v25 = vld [vmem:[%s466_s27] sm:$0xff]  ;;  %4181 = vmatprep.subr.bf16.mxu0 %v4180_v16  ;;  %v1061_v29 = vld [vmem:[%s457_s2 + $0x8] sm:$0xff]  ;;  %s5858_s2 = sld [smem:[#allocation18 + $0x81]]  ;;  %s5881_s27 = sld [smem:[#allocation18 + $0x82]]  ;;  %vm2226_vm3 = vcmask 130048  }
 0x339   : > { %994 = vperm.xlu1 %4473, %v989_v25   ;;  %4183 = vmatpush3.bf16.msra.mxu0 %v4180_v16  ;;  %v5845_v33 = vsub.s32 0, %v5842_v32  ;;  %v991_v34 = vld [vmem:[%s484_s4] sm:$0x7]  ;;  %v5852_v41 = vsub.s32 1, %v5842_v32  ;;  %v5871_v63 = vsub.s32 2, %v5842_v32  ;;  %vm6919_vm4 = vmpackc.low %vm2226_vm3, %vm2226_vm3  ;;  %s8408_s17 = sld [smem:[#allocation36_spill]] }
 0x33a   : > { %4185 = vmatprep.subr.bf16.mxu0 %v4184_v24  ;;  %s8409_s4 = sld [smem:[#allocation37_spill]]  ;;  %s8410_s22 = sld [smem:[#allocation43_spill]] }
 0x33b   : > { %999 = vperm.xlu0 %4472, %v5831_v27   ;;  %8022 = vst [vmem:[#allocation46_spill] sm:$0xff] %v5852_v41  ;;  %v1005_v42 = vrot.slane %v991_v34, %v5845_v33  ;;  %v1027_v44 = vrot.slane %v991_v34, %v5852_v41  ;;  %v5874_v20 = vrot.slane %v991_v34, %v5871_v63  ;;  %v7813_v34 = vmov 3   ;;  %s3743_s3 = sshll.u32 %s5713_s29, 4  ;;  %s8411_s1 = sld [smem:[#allocation157_spill]]  ;;  %s7697_s3 = int_to_ptr.vmem [resolvable:$true] %s3743_s3 }
 0x33c   : > { %v3494_v52 = vstv %s5856_s5 }
 0x33d   : > { %4474 = vset.pattern.permute.xlu1 %v7823_v28  ;;  %4187 = vmatpush3.bf16.msra.mxu0 %v4184_v24 }
 0x33e   : > { %1017 = vperm.xlu1 %4474, %v989_v25   ;;  %v3498_v35 = vstv %s5858_s2  ;;  %v7831_v18 = vstv %s5881_s27  ;;  %s3728_s2 = scalar_lea.sflag [#allocation8], %s5663_s16 }
 0x33f   : > { %4477 = vset.pattern.permute.xlu0 %v7823_v28  ;;  %s4029_s25 = sshll.u32 %s8408_s17, 1 }
 0x340   : > { %4126 = vmatmul.mubr.msk.f32.vlgmr.msra.gmra.mrb[0].mxu0 %vm1066_vm2, %v1061_v29  ;;  %v7827_v29 = vmov 4   ;;  %s4030_s20 = sshll.u32 %s8409_s4, 3  ;;  %p8412_p4 = scmp.ne.s32.totalorder %s8410_s22, 0 }
 0x341   : > { %s3740_s30 = sadd.s32 %s4030_s20, %s4029_s25 }
 0x342   : > { %1021 = vperm.xlu1 %4474, %v5831_v27   ;;  %s4031_s21 = sshll.u32 %s3740_s30, 7 }
 0x343   : > { %s7695_s5 = scalar_lea.hbm %s8411_s1, %s4031_s21 }
 0x346   : > { %4475 = vset.pattern.permute.xlu1 %v7873_v30 }
 0x347   : > { %1039 = vperm.xlu1 %4475, %v989_v25  }
 0x34b   : > { %4476 = vset.pattern.permute.xlu1 %v7856_v23 }
 0x3b6   : > { %v5849_v40 = vpop.permute.xlu0 %1155 }
 0x3b8   : > { %v995_v39 = vpop.permute.xlu1 %994 }
 0x3b9   : > { %v1006_v58 = vsub.f32 %v995_v39, %v1005_v42  ;;  %v7817_v39 = vmov 8  }
 0x3ba   : > { %v1000_v45 = vpop.permute.xlu0 %999 }
 0x3bb   : > { %v1007_v46 = vsub.f32 %v1000_v45, %v1005_v42  ;;  %v1008_v60 = vand.u32 2147483647, %v1006_v58  ;;  %v7815_v42 = vmov 10   ;;  %v7834_v45 = vmov 14  }
 0x3bc   : > { %v7840_v58 = vmov 15  }
 0x3bd   : > { %v1018_v43 = vpop.permute.xlu1 %1017  ;;  %v1009_v47 = vand.u32 2147483647, %v1007_v46  ;;  %v1010_v62 = vsub.f32 0.0, %v1008_v60  ;;  %v7844_v46 = vmov 16  }
 0x3be   : > { %v1028_v59 = vsub.f32 %v1018_v43, %v1027_v44  ;;  %v7825_v43 = vmov 12  }
 0x3bf   : > { %v1011_v50 = vsub.f32 0.0, %v1009_v47  ;;  %v1012_v1 = vmul.f32 1.442695, %v1010_v62 }
 0x3c0   : > { %v1030_v61 = vand.u32 2147483647, %v1028_v59  ;;  %v7850_v59 = vmov 17  }
 0x3c1   : > { %v1022_v48 = vpop.permute.xlu1 %1021  ;;  %v1014_v21 = vmul.f32 1.442695, %v1011_v50 }
 0x3c2   : > { %v1029_v49 = vsub.f32 %v1022_v48, %v1027_v44  ;;  %v1032_v0 = vsub.f32 0.0, %v1030_v61  ;;  %v7809_v44 = vmov 5   ;;  %v7854_v48 = vmov 18  }
 0x3c3   : > { %4685 = vpow2.f32 %v1014_v21  ;;  %v7864_v21 = vmov 20   ;;  %v7860_v61 = vmov 19  }
 0x3c4   : > { %v1031_v51 = vand.u32 2147483647, %v1029_v49  ;;  %v1034_v5 = vmul.f32 1.442695, %v1032_v0 }
 0x3c6   : > { %v1033_v19 = vsub.f32 0.0, %v1031_v51  ;;  %v1040_v22 = vpop.permute.xlu1 %1039  ;;  %v7807_v51 = vmov 7  }
 0x3c7   : > { %v1050_v4 = vsub.f32 %v1040_v22, %v5874_v20 }
 0x3c8   : > { %v1036_v37 = vmul.f32 1.442695, %v1033_v19 }
 0x3c9   : > { %v1052_v7 = vand.u32 2147483647, %v1050_v4 }
 0x3ca   : > { %4687 = vpow2.f32 %v1036_v37  ;;  %v7866_v37 = vmov 21  }
 0x3cb   : > { %4689 = vpow2.f32 %v1012_v1  ;;  %v1054_v9 = vsub.f32 0.0, %v1052_v7  ;;  %v7862_v7 = vmov 23  }
 0x3cd   : > { %v5861_v53 = vpop.eup %4685  ;;  %v1056_v10 = vmul.f32 1.442695, %v1054_v9 }
 0x3ce   : > { %8023 = vst [vmem:[#allocation47_spill] sm:$0xff] %v5861_v53  ;;  %v3496_v54 = vmul.f32 %v5861_v53, %v3494_v52 }
 0x3d4   : > { %v5865_v55 = vpop.eup %4687 }
 0x3d5   : > { %8024 = vst [vmem:[#allocation48_spill] sm:$0xff] %v5865_v55  ;;  %v3500_v56 = vmul.f32 %v5865_v55, %v3498_v35  ;;  %v5883_v11 = vpop.eup %4689 }
 0x3d6   : > { %v3495_v15 = vmul.f32 %v5883_v11, %v3494_v52  ;;  %v7811_v52 = vmov 9  }
 0x3d7   : > { %v5868_v57 = vadd.f32 %v3500_v56, %v3496_v54  ;;  %v7821_v54 = vmov 11   ;;  %v7829_v56 = vmov 13  }
 0x413   : > { %v4127_v38 = vpop.f32.mrb[0].mxu0 }
 0x414   : > { %v1159_v36 = vsub.f32 %v4127_v38, %v5849_v40  ;;  %v1165_v2 = vsub.f32 %v5849_v40, %v4127_v38  ;;  %v5878_v3 = vpop.f32.mrb[1].mxu0  ;;  %v7870_v38 = vmov 22  }
 0x415   : > { %v1158_v47 = vsub.f32 %v5878_v3, %v5849_v40  ;;  %v1164_v50 = vsub.f32 %v5849_v40, %v5878_v3 }
 0x416   : > { %v1162_v6 = vmul.f32 1.442695, %v1159_v36  ;;  %v1168_v8 = vmul.f32 1.442695, %v1165_v2 }
 0x417   : > { %v1160_v49 = vmul.f32 1.442695, %v1158_v47  ;;  %v1166_v19 = vmul.f32 1.442695, %v1164_v50 }
 0x418   : > { %4691 = vpow2.f32 %v1162_v6 }
 0x419   : > { %4693 = vpow2.f32 %v1034_v5 }
 0x41a   : > { %4695 = vpow2.f32 %v1168_v8 }
 0x41b   : > { %4697 = vpow2.f32 %v1056_v10  ;;  %v7858_v10 = vmov 24  }
 0x41c   : > { %4699 = vpow2.f32 %v1160_v49  ;;  %v7848_v49 = vmov 26  }
 0x41d   : > { %4701 = vpow2.f32 %v1166_v19 }
 0x422   : > { %v5885_v12 = vpop.eup %4691 }
 0x423   : > { %v5887_v13 = vpop.eup %4693  ;;  %1219 = vperm.xlu0 %4477, %v5885_v12   ;;  %1185 = vperm.xlu1 %4476, %v5885_v12  }
 0x424   : > { %v5891_v14 = vpop.eup %4695  ;;  %v3499_v17 = vmul.f32 %v5887_v13, %v3498_v35 }
 0x425   : > { %v5894_v16 = vpop.eup %4697 }
 0x426   : > { %8025 = vst [vmem:[#allocation49_spill] sm:$0xff] %v5894_v16  ;;  %v3501_v24 = vadd.f32 %v3499_v17, %v3495_v15  ;;  %v3505_v25 = vmul.f32 %v5894_v16, %v7831_v18  ;;  %v5949_v40 = vpop.eup %4699  ;;  %v7852_v17 = vmov 25   ;;  %v7842_v18 = vmov 30  }
 0x427   : > { %4480 = vset.pattern.permute.xlu0 %v7873_v30  ;;  %1201 = vperm.xlu1 %4476, %v5891_v14   ;;  %v5955_v35 = vpop.eup %4701 }
 0x428   : > { %1265 = vperm.xlu0 %4480, %v5891_v14   ;;  %v5904_v26 = vadd.f32 %v3505_v25, %v3501_v24 }
 0x42a   : > { %8026 = vst [vmem:[#allocation50_spill] sm:$0xff] %v5904_v26 }
 0x42b   : > { %4478 = vset.pattern.permute.xlu1 %v7823_v28 }
 0x42c   : > { %4483 = vset.pattern.permute.xlu0 %v7827_v29  ;;  %1233 = vperm.xlu1 %4478, %v5891_v14  }
 0x42d   : > { %1329 = vperm.xlu0 %4483, %v5891_v14  }
 0x430   : > { %4479 = vset.pattern.permute.xlu1 %v7873_v30 }
 0x431   : > { %4486 = vset.pattern.permute.xlu0 %v7819_v31  ;;  %1251 = vperm.xlu1 %4479, %v5885_v12  }
 0x432   : > { %1393 = vperm.xlu0 %4486, %v5891_v14  }
 0x435   : > { %4481 = vset.pattern.permute.xlu1 %v7813_v34 }
 0x436   : > { %4489 = vset.pattern.permute.xlu0 %v7817_v39  ;;  %1283 = vperm.xlu1 %4481, %v5885_v12  }
 0x437   : > { %1457 = vperm.xlu0 %4489, %v5891_v14  }
 0x43a   : > { %1297 = vperm.xlu1 %4481, %v5891_v14  }
 0x43b   : > { %4492 = vset.pattern.permute.xlu0 %v7815_v42 }
 0x43c   : > { %1521 = vperm.xlu0 %4492, %v5891_v14  }
 0x43e   : > { %4482 = vset.pattern.permute.xlu1 %v7827_v29 }
 0x43f   : > { %1315 = vperm.xlu1 %4482, %v5885_v12  }
 0x440   : > { %4495 = vset.pattern.permute.xlu0 %v7825_v43 }
 0x441   : > { %1585 = vperm.xlu0 %4495, %v5891_v14  }
 0x443   : > { %4484 = vset.pattern.permute.xlu1 %v7809_v44 }
 0x444   : > { %1347 = vperm.xlu1 %4484, %v5885_v12  }
 0x445   : > { %4498 = vset.pattern.permute.xlu0 %v7834_v45 }
 0x446   : > { %1649 = vperm.xlu0 %4498, %v5891_v14  }
 0x448   : > { %1361 = vperm.xlu1 %4484, %v5891_v14  }
 0x44a   : > { %4501 = vset.pattern.permute.xlu0 %v7844_v46 }
 0x44b   : > { %1713 = vperm.xlu0 %4501, %v5891_v14  }
 0x44c   : > { %4485 = vset.pattern.permute.xlu1 %v7819_v31 }
 0x44d   : > { %1379 = vperm.xlu1 %4485, %v5885_v12  }
 0x44f   : > { %4504 = vset.pattern.permute.xlu0 %v7854_v48 }
 0x450   : > { %1777 = vperm.xlu0 %4504, %v5891_v14  }
 0x451   : > { %4487 = vset.pattern.permute.xlu1 %v7807_v51 }
 0x452   : > { %1411 = vperm.xlu1 %4487, %v5885_v12  }
 0x454   : > { %4507 = vset.pattern.permute.xlu0 %v7864_v21 }
 0x455   : > { %1841 = vperm.xlu0 %4507, %v5891_v14  }
 0x456   : > { %1425 = vperm.xlu1 %4487, %v5891_v14  }
 0x459   : > { %4508 = vset.pattern.permute.xlu0 %v7866_v37 }
 0x45a   : > { %1859 = vperm.xlu0 %4508, %v5885_v12   ;;  %4488 = vset.pattern.permute.xlu1 %v7817_v39 }
 0x45b   : > { %1443 = vperm.xlu1 %4488, %v5885_v12  }
 0x45e   : > { %4511 = vset.pattern.permute.xlu0 %v7856_v23 }
 0x45f   : > { %1180 = vperm.xlu0 %4511, %v5949_v40   ;;  %4490 = vset.pattern.permute.xlu1 %v7811_v52 }
 0x460   : > { %1475 = vperm.xlu1 %4490, %v5885_v12  }
 0x463   : > { %4514 = vset.pattern.permute.xlu0 %v7823_v28 }
 0x464   : > { %1229 = vperm.xlu0 %4514, %v5955_v35   ;;  %1489 = vperm.xlu1 %4490, %v5891_v14  }
 0x468   : > { %4515 = vset.pattern.permute.xlu0 %v7873_v30  ;;  %4491 = vset.pattern.permute.xlu1 %v7815_v42 }
 0x469   : > { %1247 = vperm.xlu0 %4515, %v5949_v40   ;;  %1507 = vperm.xlu1 %4491, %v5885_v12  }
 0x46d   : > { %4518 = vset.pattern.permute.xlu0 %v7813_v34  ;;  %4493 = vset.pattern.permute.xlu1 %v7821_v54 }
 0x46e   : > { %1293 = vperm.xlu0 %4518, %v5955_v35   ;;  %1539 = vperm.xlu1 %4493, %v5885_v12  }
 0x472   : > { %4519 = vset.pattern.permute.xlu0 %v7827_v29  ;;  %1553 = vperm.xlu1 %4493, %v5891_v14  }
 0x473   : > { %1311 = vperm.xlu0 %4519, %v5949_v40  }
 0x476   : > { %4494 = vset.pattern.permute.xlu1 %v7825_v43 }
 0x477   : > { %4522 = vset.pattern.permute.xlu0 %v7809_v44  ;;  %1571 = vperm.xlu1 %4494, %v5885_v12  }
 0x478   : > { %1357 = vperm.xlu0 %4522, %v5955_v35  }
 0x47b   : > { %4496 = vset.pattern.permute.xlu1 %v7829_v56 }
 0x47c   : > { %4523 = vset.pattern.permute.xlu0 %v7819_v31  ;;  %1603 = vperm.xlu1 %4496, %v5885_v12  }
 0x47d   : > { %1375 = vperm.xlu0 %4523, %v5949_v40  }
 0x480   : > { %1617 = vperm.xlu1 %4496, %v5891_v14  }
 0x481   : > { %4526 = vset.pattern.permute.xlu0 %v7807_v51 }
 0x482   : > { %1421 = vperm.xlu0 %4526, %v5955_v35  }
 0x484   : > { %4497 = vset.pattern.permute.xlu1 %v7834_v45 }
 0x485   : > { %1635 = vperm.xlu1 %4497, %v5885_v12  }
 0x486   : > { %4527 = vset.pattern.permute.xlu0 %v7817_v39 }
 0x487   : > { %1439 = vperm.xlu0 %4527, %v5949_v40  }
 0x489   : > { %4499 = vset.pattern.permute.xlu1 %v7840_v58 }
 0x48a   : > { %1667 = vperm.xlu1 %4499, %v5885_v12  }
 0x48b   : > { %4530 = vset.pattern.permute.xlu0 %v7811_v52 }
 0x48c   : > { %1485 = vperm.xlu0 %4530, %v5955_v35  }
 0x48e   : > { %1681 = vperm.xlu1 %4499, %v5891_v14  }
 0x490   : > { %4531 = vset.pattern.permute.xlu0 %v7815_v42 }
 0x491   : > { %1503 = vperm.xlu0 %4531, %v5949_v40  }
 0x492   : > { %4500 = vset.pattern.permute.xlu1 %v7844_v46 }
 0x493   : > { %1699 = vperm.xlu1 %4500, %v5885_v12  }
 0x495   : > { %4534 = vset.pattern.permute.xlu0 %v7821_v54 }
 0x496   : > { %1549 = vperm.xlu0 %4534, %v5955_v35  }
 0x497   : > { %4502 = vset.pattern.permute.xlu1 %v7850_v59 }
 0x498   : > { %1731 = vperm.xlu1 %4502, %v5885_v12  }
 0x49a   : > { %4535 = vset.pattern.permute.xlu0 %v7825_v43 }
 0x49b   : > { %1567 = vperm.xlu0 %4535, %v5949_v40  }
 0x49c   : > { %1745 = vperm.xlu1 %4502, %v5891_v14  }
 0x49f   : > { %4538 = vset.pattern.permute.xlu0 %v7829_v56 }
 0x4a0   : > { %1613 = vperm.xlu0 %4538, %v5955_v35   ;;  %4503 = vset.pattern.permute.xlu1 %v7854_v48 }
 0x4a1   : > { %1763 = vperm.xlu1 %4503, %v5885_v12  }
 0x4a2   : > { %v6006_v60 = vpop.permute.xlu1 %1185  ;;  %v6089_v25 = vpop.permute.xlu0 %1219 }
 0x4a4   : > { %4539 = vset.pattern.permute.xlu0 %v7834_v45 }
 0x4a5   : > { %1631 = vperm.xlu0 %4539, %v5949_v40   ;;  %4505 = vset.pattern.permute.xlu1 %v7860_v61 }
 0x4a6   : > { %1795 = vperm.xlu1 %4505, %v5885_v12   ;;  %v6012_v62 = vpop.permute.xlu1 %1201 }
 0x4a7   : > { %v6100_v19 = vpop.permute.xlu0 %1265 }
 0x4a9   : > { %4542 = vset.pattern.permute.xlu0 %v7840_v58 }
 0x4aa   : > { %1677 = vperm.xlu0 %4542, %v5955_v35   ;;  %1809 = vperm.xlu1 %4505, %v5891_v14  }
 0x4ab   : > { %v6017_v0 = vpop.permute.xlu1 %1233 }
 0x4ae   : > { %4543 = vset.pattern.permute.xlu0 %v7844_v46  ;;  %4506 = vset.pattern.permute.xlu1 %v7864_v21 }
 0x4af   : > { %1695 = vperm.xlu0 %4543, %v5949_v40   ;;  %1827 = vperm.xlu1 %4506, %v5885_v12  }
 0x4b0   : > { %v6023_v22 = vpop.permute.xlu1 %1251 }
 0x4b3   : > { %4546 = vset.pattern.permute.xlu0 %v7850_v59  ;;  %4509 = vset.pattern.permute.xlu1 %v7866_v37 }
 0x4b4   : > { %1741 = vperm.xlu0 %4546, %v5955_v35   ;;  %1873 = vperm.xlu1 %4509, %v5891_v14  }
 0x4b5   : > { %v6029_v1 = vpop.permute.xlu1 %1283 }
 0x4b8   : > { %4547 = vset.pattern.permute.xlu0 %v7854_v48  ;;  %4510 = vset.pattern.permute.xlu1 %v7870_v38 }
 0x4b9   : > { %1759 = vperm.xlu0 %4547, %v5949_v40   ;;  %1891 = vperm.xlu1 %4510, %v5885_v12   ;;  %v6035_v36 = vpop.permute.xlu1 %1297 }
 0x4bd   : > { %4550 = vset.pattern.permute.xlu0 %v7860_v61  ;;  %4512 = vset.pattern.permute.xlu1 %v7856_v23 }
 0x4be   : > { %1805 = vperm.xlu0 %4550, %v5955_v35   ;;  %1196 = vperm.xlu1 %4512, %v5955_v35   ;;  %v6041_v2 = vpop.permute.xlu1 %1315 }
 0x4c2   : > { %4551 = vset.pattern.permute.xlu0 %v7864_v21  ;;  %4513 = vset.pattern.permute.xlu1 %v7823_v28 }
 0x4c3   : > { %1823 = vperm.xlu0 %4551, %v5949_v40   ;;  %1215 = vperm.xlu1 %4513, %v5949_v40   ;;  %v6047_v3 = vpop.permute.xlu1 %1347 }
 0x4c7   : > { %4554 = vset.pattern.permute.xlu0 %v7866_v37  ;;  %4516 = vset.pattern.permute.xlu1 %v7873_v30  ;;  %v6051_v4 = vpop.permute.xlu1 %1361 }
 0x4c8   : > { %1869 = vperm.xlu0 %4554, %v5955_v35   ;;  %1261 = vperm.xlu1 %4516, %v5955_v35  }
 0x4cc   : > { %4556 = vset.pattern.permute.xlu0 %v7870_v38  ;;  %4517 = vset.pattern.permute.xlu1 %v7813_v34  ;;  %v6057_v5 = vpop.permute.xlu1 %1379 }
 0x4cd   : > { %8027 = vst [vmem:[#allocation51_spill] sm:$0xff] %v6057_v5  ;;  %1901 = vperm.xlu0 %4556, %v5955_v35   ;;  %1279 = vperm.xlu1 %4517, %v5949_v40  }
 0x4d1   : > { %1905 = vperm.xlu0 %4556, %v5891_v14   ;;  %4520 = vset.pattern.permute.xlu1 %v7827_v29  ;;  %v6063_v6 = vpop.permute.xlu1 %1411 }
 0x4d2   : > { %8028 = vst [vmem:[#allocation52_spill] sm:$0xff] %v6063_v6  ;;  %1325 = vperm.xlu1 %4520, %v5955_v35   ;;  %v1175_v6 = vld [vmem:[#allocation3 + $0x8] sm:$0xff] }
 0x4d5   : > { %4558 = vset.pattern.permute.xlu0 %v7862_v7  ;;  %v6067_v8 = vpop.permute.xlu1 %1425 }
 0x4d6   : > { %8029 = vst [vmem:[#allocation53_spill] sm:$0xff] %v6067_v8  ;;  %1919 = vperm.xlu0 %4558, %v5949_v40   ;;  %4521 = vset.pattern.permute.xlu1 %v7809_v44 }
 0x4d7   : > { %1343 = vperm.xlu1 %4521, %v5949_v40  }
 0x4da   : > { %1937 = vperm.xlu0 %4558, %v5891_v14   ;;  %v6073_v9 = vpop.permute.xlu1 %1443 }
 0x4db   : > { %8030 = vst [vmem:[#allocation54_spill] sm:$0xff] %v6073_v9  ;;  %4524 = vset.pattern.permute.xlu1 %v7819_v31  ;;  %v6416_v9 = vld [vmem:[#allocation3 + $0x10] sm:$0xff] }
 0x4dc   : > { %1389 = vperm.xlu1 %4524, %v5955_v35  }
 0x4de   : > { %4561 = vset.pattern.permute.xlu0 %v7858_v10 }
 0x4df   : > { %1965 = vperm.xlu0 %4561, %v5955_v35   ;;  %v6079_v15 = vpop.permute.xlu1 %1475 }
 0x4e0   : > { %8031 = vst [vmem:[#allocation55_spill] sm:$0xff] %v6079_v15  ;;  %4525 = vset.pattern.permute.xlu1 %v7807_v51  ;;  %v7838_v51 = vmov 27  }
 0x4e1   : > { %1407 = vperm.xlu1 %4525, %v5949_v40  }
 0x4e3   : > { %4562 = vset.pattern.permute.xlu0 %v7852_v17  ;;  %v6084_v24 = vpop.permute.xlu1 %1489 }
 0x4e4   : > { %8032 = vst [vmem:[#allocation56_spill] sm:$0xff] %v6084_v24  ;;  %1983 = vperm.xlu0 %4562, %v5949_v40  }
 0x4e5   : > { %4528 = vset.pattern.permute.xlu1 %v7817_v39  ;;  %v7836_v39 = vmov 28  }
 0x4e6   : > { %1453 = vperm.xlu1 %4528, %v5955_v35  }
 0x4e8   : > { %2001 = vperm.xlu0 %4562, %v5891_v14   ;;  %v6092_v47 = vpop.permute.xlu1 %1507 }
 0x4e9   : > { %8033 = vst [vmem:[#allocation57_spill] sm:$0xff] %v6092_v47 }
 0x4ea   : > { %4529 = vset.pattern.permute.xlu1 %v7811_v52  ;;  %v6108_v52 = vpop.permute.xlu0 %1329 }
 0x4eb   : > { %1471 = vperm.xlu1 %4529, %v5949_v40  }
 0x4ec   : > { %4565 = vset.pattern.permute.xlu0 %v7848_v49 }
 0x4ed   : > { %2029 = vperm.xlu0 %4565, %v5955_v35   ;;  %v6098_v50 = vpop.permute.xlu1 %1539 }
 0x4ee   : > { %8034 = vst [vmem:[#allocation58_spill] sm:$0xff] %v6098_v50 }
 0x4ef   : > { %4532 = vset.pattern.permute.xlu1 %v7815_v42  ;;  %v6116_v42 = vpop.permute.xlu0 %1393 }
 0x4f0   : > { %1517 = vperm.xlu1 %4532, %v5955_v35  }
 0x4f1   : > { %4566 = vset.pattern.permute.xlu0 %v7838_v51  ;;  %v6105_v44 = vpop.permute.xlu1 %1553 }
 0x4f2   : > { %8035 = vst [vmem:[#allocation59_spill] sm:$0xff] %v6105_v44  ;;  %2047 = vperm.xlu0 %4566, %v5949_v40  }
 0x4f4   : > { %4533 = vset.pattern.permute.xlu1 %v7821_v54  ;;  %v7832_v54 = vmov 29  }
 0x4f5   : > { %1535 = vperm.xlu1 %4533, %v5949_v40  }
 0x4f6   : > { %2065 = vperm.xlu0 %4566, %v5891_v14   ;;  %v6113_v34 = vpop.permute.xlu1 %1571 }
 0x4f7   : > { %8036 = vst [vmem:[#allocation60_spill] sm:$0xff] %v6113_v34 }
 0x4f9   : > { %4536 = vset.pattern.permute.xlu1 %v7825_v43  ;;  %v6128_v43 = vpop.permute.xlu0 %1457 }
 0x4fa   : > { %4569 = vset.pattern.permute.xlu0 %v7836_v39  ;;  %1581 = vperm.xlu1 %4536, %v5955_v35   ;;  %v7846_v39 = vmov 31  }
 0x4fb   : > { %2093 = vperm.xlu0 %4569, %v5955_v35   ;;  %v6121_v31 = vpop.permute.xlu1 %1603 }
 0x4fc   : > { %8037 = vst [vmem:[#allocation61_spill] sm:$0xff] %v6121_v31 }
 0x4fe   : > { %4537 = vset.pattern.permute.xlu1 %v7829_v56  ;;  %v6136_v56 = vpop.permute.xlu0 %1521 }
 0x4ff   : > { %4570 = vset.pattern.permute.xlu0 %v7832_v54  ;;  %1599 = vperm.xlu1 %4537, %v5949_v40   ;;  %v6126_v28 = vpop.permute.xlu1 %1617 }
 0x500   : > { %8038 = vst [vmem:[#allocation62_spill] sm:$0xff] %v6126_v28  ;;  %2111 = vperm.xlu0 %4570, %v5949_v40   ;;  %v8071_v28 = vmov 28  }
 0x503   : > { %4540 = vset.pattern.permute.xlu1 %v7834_v45  ;;  %v6144_v45 = vpop.permute.xlu0 %1585 }
 0x504   : > { %2129 = vperm.xlu0 %4570, %v5891_v14   ;;  %1645 = vperm.xlu1 %4540, %v5955_v35   ;;  %v6134_v29 = vpop.permute.xlu1 %1635 }
 0x505   : > { %8039 = vst [vmem:[#allocation63_spill] sm:$0xff] %v6134_v29  ;;  %v8068_v29 = vmov 27  }
 0x508   : > { %4573 = vset.pattern.permute.xlu0 %v7842_v18  ;;  %4541 = vset.pattern.permute.xlu1 %v7840_v58  ;;  %v6152_v58 = vpop.permute.xlu0 %1649 }
 0x509   : > { %2157 = vperm.xlu0 %4573, %v5955_v35   ;;  %1663 = vperm.xlu1 %4541, %v5949_v40   ;;  %v6142_v54 = vpop.permute.xlu1 %1667  ;;  %8042 = vst [vmem:[#allocation66_spill] sm:$0xff] %v6152_v58 }
 0x50a   : > { %8040 = vst [vmem:[#allocation64_spill] sm:$0xff] %v6142_v54 }
 0x50d   : > { %4574 = vset.pattern.permute.xlu0 %v7846_v39  ;;  %4544 = vset.pattern.permute.xlu1 %v7844_v46  ;;  %v6148_v51 = vpop.permute.xlu1 %1681  ;;  %v6163_v39 = vpop.permute.xlu0 %1713 }
 0x50e   : > { %8041 = vst [vmem:[#allocation65_spill] sm:$0xff] %v6148_v51  ;;  %2175 = vperm.xlu0 %4574, %v5949_v40   ;;  %1709 = vperm.xlu1 %4544, %v5955_v35   ;;  %8045 = vst [vmem:[#allocation69_spill] sm:$0xff] %v6163_v39  ;;  %v8115_v39 = vstv %s5881_s27  ;;  %s4974_s27 = scalar_lea.vmem %s7697_s3, 256 }
 0x50f   : > { %p4975_p5 = scmp.ne.s32.totalorder %s7697_s3, %s4974_s27 }
 0x511   : > { %p4976_p8 = pnand %p4975_p5, %p8412_p4 }
 0x512   : > { %2193 = vperm.xlu0 %4574, %v5891_v14   ;;  %4545 = vset.pattern.permute.xlu1 %v7850_v59  ;;  %v6156_v18 = vpop.permute.xlu1 %1699  ;;  %v6170_v59 = vpop.permute.xlu0 %1777 }
 0x513   : > { %8043 = vst [vmem:[#allocation67_spill] sm:$0xff] %v6156_v18  ;;  %1727 = vperm.xlu1 %4545, %v5949_v40   ;;  %8047 = vst [vmem:[#allocation71_spill] sm:$0xff] %v6170_v59  ;;  %p4977_p9 = pneg %p4976_p8 }
 0x516   : > { %4576 = vset.pattern.permute.xlu0 %v7856_v23 }
 0x517   : > { %4548 = vset.pattern.permute.xlu1 %v7854_v48  ;;  %v6161_v46 = vpop.permute.xlu1 %1731  ;;  %v6176_v48 = vpop.permute.xlu0 %1841 }
 0x518   : > { %8044 = vst [vmem:[#allocation68_spill] sm:$0xff] %v6161_v46  ;;  %1773 = vperm.xlu1 %4548, %v5955_v35   ;;  %8049 = vst [vmem:[#allocation73_spill] sm:$0xff] %v6176_v48  ;;  %v8062_v46 = vmov 26  }
 0x51b   : > { %v6166_v49 = vpop.permute.xlu1 %1745 }
 0x51c   : > { %8046 = vst [vmem:[#allocation70_spill] sm:$0xff] %v6166_v49  ;;  %4549 = vset.pattern.permute.xlu1 %v7860_v61  ;;  %v6184_v61 = vpop.permute.xlu0 %1859 }
 0x51d   : > { %1791 = vperm.xlu1 %4549, %v5949_v40   ;;  %8052 = vst [vmem:[#allocation76_spill] sm:$0xff] %v6184_v61 }
 0x520   : > { %v6172_v17 = vpop.permute.xlu1 %1763 }
 0x521   : > { %8048 = vst [vmem:[#allocation72_spill] sm:$0xff] %v6172_v17  ;;  %4552 = vset.pattern.permute.xlu1 %v7864_v21  ;;  %v6190_v21 = vpop.permute.xlu0 %1180 }
 0x522   : > { %1837 = vperm.xlu1 %4552, %v5955_v35  }
 0x525   : > { %v6178_v23 = vpop.permute.xlu1 %1795  ;;  %v6197_v55 = vpop.permute.xlu0 %1229 }
 0x526   : > { %8050 = vst [vmem:[#allocation74_spill] sm:$0xff] %v6178_v23  ;;  %4553 = vset.pattern.permute.xlu1 %v7866_v37  ;;  %v8055_v37 = vmov 23  }
 0x527   : > { %1855 = vperm.xlu1 %4553, %v5949_v40  }
 0x529   : > { %v6182_v10 = vpop.permute.xlu1 %1809 }
 0x52a   : > { %8051 = vst [vmem:[#allocation75_spill] sm:$0xff] %v6182_v10 }
 0x52b   : > { %4555 = vset.pattern.permute.xlu1 %v7870_v38  ;;  %v6203_v38 = vpop.permute.xlu0 %1247 }
 0x52c   : > { %1887 = vperm.xlu1 %4555, %v5949_v40  }
 0x52e   : > { %v6188_v7 = vpop.permute.xlu1 %1827 }
 0x52f   : > { %8053 = vst [vmem:[#allocation77_spill] sm:$0xff] %v6188_v7  ;;  %v8057_v7 = vmov 24  }
 0x530   : > { %4557 = vset.pattern.permute.xlu1 %v7873_v30 }
 0x531   : > { %1043 = vperm.xlu1 %4557, %v5831_v27   ;;  %v6209_v27 = vpop.permute.xlu0 %1293 }
 0x533   : > { %v6194_v26 = vpop.permute.xlu1 %1873 }
 0x534   : > { %8054 = vst [vmem:[#allocation78_spill] sm:$0xff] %v6194_v26  ;;  %v8059_v26 = vmov 25  }
 0x535   : > { %4559 = vset.pattern.permute.xlu1 %v8055_v37 }
 0x536   : > { %1933 = vperm.xlu1 %4559, %v5955_v35  }
 0x538   : > { %v6200_v53 = vpop.permute.xlu1 %1891 }
 0x539   : > { %8056 = vst [vmem:[#allocation79_spill] sm:$0xff] %v6200_v53  ;;  %v6217_v53 = vpop.permute.xlu0 %1311 }
 0x53a   : > { %1923 = vperm.xlu1 %4559, %v5885_v12   ;;  %8058 = vst [vmem:[#allocation80_spill] sm:$0xff] %v6217_v53 }
 0x53d   : > { %v6205_v16 = vpop.permute.xlu1 %1196 }
 0x53e   : > { %4560 = vset.pattern.permute.xlu1 %v8057_v7  ;;  %v6223_v7 = vpop.permute.xlu0 %1357 }
 0x53f   : > { %1951 = vperm.xlu1 %4560, %v5949_v40   ;;  %8060 = vst [vmem:[#allocation81_spill] sm:$0xff] %v6223_v7 }
 0x542   : > { %v6211_v30 = vpop.permute.xlu1 %1215  ;;  %v6228_v17 = vpop.permute.xlu0 %1375 }
 0x543   : > { %1955 = vperm.xlu1 %4560, %v5885_v12   ;;  %8061 = vst [vmem:[#allocation82_spill] sm:$0xff] %v6228_v17 }
 0x547   : > { %1969 = vperm.xlu1 %4560, %v5891_v14   ;;  %v6215_v37 = vpop.permute.xlu1 %1261 }
 0x54b   : > { %4563 = vset.pattern.permute.xlu1 %v8059_v26  ;;  %v6235_v26 = vpop.permute.xlu0 %1421 }
 0x54c   : > { %1997 = vperm.xlu1 %4563, %v5955_v35   ;;  %v6221_v23 = vpop.permute.xlu1 %1279  ;;  %8064 = vst [vmem:[#allocation84_spill] sm:$0xff] %v6235_v26 }
 0x54f   : > { %v6240_v54 = vpop.permute.xlu0 %1439 }
 0x550   : > { %1987 = vperm.xlu1 %4563, %v5885_v12   ;;  %8066 = vst [vmem:[#allocation86_spill] sm:$0xff] %v6240_v54 }
 0x551   : > { %v6226_v10 = vpop.permute.xlu1 %1325 }
 0x553   : > { %v6248_v31 = vpop.permute.xlu0 %1485 }
 0x554   : > { %4564 = vset.pattern.permute.xlu1 %v8062_v46  ;;  %8070 = vst [vmem:[#allocation89_spill] sm:$0xff] %v6248_v31  ;;  %v8077_v31 = vmov 29  }
 0x555   : > { %2015 = vperm.xlu1 %4564, %v5949_v40  }
 0x556   : > { %v6232_v49 = vpop.permute.xlu1 %1343 }
 0x557   : > { %8063 = vst [vmem:[#allocation83_spill] sm:$0xff] %v6232_v49  ;;  %v6255_v50 = vpop.permute.xlu0 %1503 }
 0x558   : > { %8073 = vst [vmem:[#allocation91_spill] sm:$0xff] %v6255_v50 }
 0x559   : > { %2019 = vperm.xlu1 %4564, %v5885_v12  }
 0x55b   : > { %v6237_v18 = vpop.permute.xlu1 %1389 }
 0x55c   : > { %8065 = vst [vmem:[#allocation85_spill] sm:$0xff] %v6237_v18 }
 0x55d   : > { %2033 = vperm.xlu1 %4564, %v5891_v14  }
 0x560   : > { %v6242_v51 = vpop.permute.xlu1 %1407 }
 0x561   : > { %8067 = vst [vmem:[#allocation87_spill] sm:$0xff] %v6242_v51  ;;  %4567 = vset.pattern.permute.xlu1 %v8068_v29  ;;  %v6260_v29 = vpop.permute.xlu0 %1549 }
 0x562   : > { %2061 = vperm.xlu1 %4567, %v5955_v35   ;;  %8075 = vst [vmem:[#allocation93_spill] sm:$0xff] %v6260_v29 }
 0x565   : > { %v6246_v46 = vpop.permute.xlu1 %1453  ;;  %v6266_v47 = vpop.permute.xlu0 %1567 }
 0x566   : > { %8069 = vst [vmem:[#allocation88_spill] sm:$0xff] %v6246_v46  ;;  %2051 = vperm.xlu1 %4567, %v5885_v12   ;;  %8078 = vst [vmem:[#allocation95_spill] sm:$0xff] %v6266_v47 }
 0x569   : > { %v6272_v50 = vpop.permute.xlu0 %1613 }
 0x56a   : > { %4568 = vset.pattern.permute.xlu1 %v8071_v28  ;;  %v6252_v34 = vpop.permute.xlu1 %1471  ;;  %8080 = vst [vmem:[#allocation97_spill] sm:$0xff] %v6272_v50 }
 0x56b   : > { %8072 = vst [vmem:[#allocation90_spill] sm:$0xff] %v6252_v34  ;;  %2079 = vperm.xlu1 %4568, %v5949_v40  }
 0x56f   : > { %2083 = vperm.xlu1 %4568, %v5885_v12   ;;  %v6258_v44 = vpop.permute.xlu1 %1517 }
 0x570   : > { %8074 = vst [vmem:[#allocation92_spill] sm:$0xff] %v6258_v44  ;;  %v8082_v44 = vmov 30  }
 0x573   : > { %2097 = vperm.xlu1 %4568, %v5891_v14  }
 0x574   : > { %v6263_v61 = vpop.permute.xlu1 %1535 }
 0x575   : > { %8076 = vst [vmem:[#allocation94_spill] sm:$0xff] %v6263_v61  ;;  %v6280_v61 = vpop.permute.xlu0 %1631 }
 0x576   : > { %8084 = vst [vmem:[#allocation100_spill] sm:$0xff] %v6280_v61 }
 0x577   : > { %4571 = vset.pattern.permute.xlu1 %v8077_v31 }
 0x578   : > { %2125 = vperm.xlu1 %4571, %v5955_v35  }
 0x579   : > { %v6269_v28 = vpop.permute.xlu1 %1581  ;;  %v6286_v47 = vpop.permute.xlu0 %1677 }
 0x57a   : > { %8079 = vst [vmem:[#allocation96_spill] sm:$0xff] %v6269_v28  ;;  %8086 = vst [vmem:[#allocation102_spill] sm:$0xff] %v6286_v47  ;;  %v8087_v28 = vmov 31  }
 0x57c   : > { %2115 = vperm.xlu1 %4571, %v5885_v12  }
 0x57e   : > { %v6274_v15 = vpop.permute.xlu1 %1599 }
 0x57f   : > { %8081 = vst [vmem:[#allocation98_spill] sm:$0xff] %v6274_v15 }
 0x580   : > { %4572 = vset.pattern.permute.xlu1 %v8082_v44  ;;  %v6292_v44 = vpop.permute.xlu0 %1695 }
 0x581   : > { %2143 = vperm.xlu1 %4572, %v5949_v40   ;;  %8089 = vst [vmem:[#allocation104_spill] sm:$0xff] %v6292_v44 }
 0x583   : > { %v6278_v29 = vpop.permute.xlu1 %1645 }
 0x584   : > { %8083 = vst [vmem:[#allocation99_spill] sm:$0xff] %v6278_v29  ;;  %v6297_v61 = vpop.permute.xlu0 %1741  ;;  %v8092_v29 = vmov 0  }
 0x585   : > { %2147 = vperm.xlu1 %4572, %v5885_v12   ;;  %8091 = vst [vmem:[#allocation106_spill] sm:$0xff] %v6297_v61 }
 0x588   : > { %v6283_v31 = vpop.permute.xlu1 %1663 }
 0x589   : > { %8085 = vst [vmem:[#allocation101_spill] sm:$0xff] %v6283_v31  ;;  %2161 = vperm.xlu1 %4572, %v5891_v14   ;;  %v6302_v14 = vpop.permute.xlu0 %1759 }
 0x58a   : > { %8094 = vst [vmem:[#allocation108_spill] sm:$0xff] %v6302_v14 }
 0x58d   : > { %4575 = vset.pattern.permute.xlu1 %v8087_v28  ;;  %v6289_v50 = vpop.permute.xlu1 %1709 }
 0x58e   : > { %8088 = vst [vmem:[#allocation103_spill] sm:$0xff] %v6289_v50  ;;  %2189 = vperm.xlu1 %4575, %v5955_v35   ;;  %v6308_v50 = vpop.permute.xlu0 %1805 }
 0x58f   : > { %8097 = vst [vmem:[#allocation111_spill] sm:$0xff] %v6308_v50 }
 0x592   : > { %2179 = vperm.xlu1 %4575, %v5885_v12   ;;  %v6295_v40 = vpop.permute.xlu1 %1727  ;;  %v6312_v44 = vpop.permute.xlu0 %1823 }
 0x593   : > { %8090 = vst [vmem:[#allocation105_spill] sm:$0xff] %v6295_v40  ;;  %8099 = vst [vmem:[#allocation113_spill] sm:$0xff] %v6312_v44  ;;  %v6353_v44 = vsub.s32 5, %v5842_v32 }
 0x596   : > { %4577 = vset.pattern.permute.xlu1 %v8092_v29  ;;  %v6316_v40 = vpop.permute.xlu0 %1869 }
 0x597   : > { %v6300_v31 = vpop.permute.xlu1 %1773  ;;  %8101 = vst [vmem:[#allocation115_spill] sm:$0xff] %v6316_v40  ;;  %v7875_v40 = vstv %s6325_s9 }
 0x598   : > { %8093 = vst [vmem:[#allocation107_spill] sm:$0xff] %v6300_v31  ;;  %v6365_v34 = vmul.f32 %v5887_v13, %v7875_v40  ;;  %v6386_v40 = vld [vmem:[#allocation2 + $0x10] sm:$0xff] }
 0x599   : > { %v6429_v58 = vrot.slane %v6386_v40, %v5845_v33  ;;  %v6436_v53 = vrot.slane %v6386_v40, %v5871_v63 }
 0x59a   : > { %v6319_v15 = vpop.permute.xlu0 %1901  ;;  %8110 = vst [vmem:[#allocation124_spill] sm:$0xff] %v6365_v34 }
 0x59b   : > { %8102 = vst [vmem:[#allocation116_spill] sm:$0xff] %v6319_v15  ;;  %v7876_v15 = vstv %s6323_s12  ;;  %8117 = vst [vmem:[#allocation130_spill] sm:$0xff] %v6429_v58 }
 0x59c   : > { %v6304_v47 = vpop.permute.xlu1 %1791  ;;  %8119 = vst [vmem:[#allocation132_spill] sm:$0xff] %v6436_v53  ;;  %v6462_v53 = vrot.slane %v1175_v6, %v5845_v33 }
 0x59d   : > { %8095 = vst [vmem:[#allocation109_spill] sm:$0xff] %v6304_v47 }
 0x5a1   : > { %v6306_v28 = vpop.permute.xlu1 %1837 }
 0x5a2   : > { %8096 = vst [vmem:[#allocation110_spill] sm:$0xff] %v6306_v28 }
 0x5a6   : > { %v6310_v35 = vpop.permute.xlu1 %1855 }
 0x5a7   : > { %8098 = vst [vmem:[#allocation112_spill] sm:$0xff] %v6310_v35  ;;  %v1171_v35 = vld [vmem:[#allocation2 + $0x8] sm:$0xff] }
 0x5a8   : > { %v6399_v26 = vrot.slane %v1171_v35, %v5845_v33  ;;  %v6405_v51 = vrot.slane %v1171_v35, %v5871_v63 }
 0x5ab   : > { %v6314_v12 = vpop.permute.xlu1 %1887 }
 0x5ac   : > { %8100 = vst [vmem:[#allocation114_spill] sm:$0xff] %v6314_v12 }
 0x5b0   : > { %v1044_v61 = vpop.permute.xlu1 %1043 }
 0x5b1   : > { %v1051_v29 = vsub.f32 %v1044_v61, %v5874_v20  ;;  %v6331_v20 = vpop.permute.xlu0 %1905  ;;  %v6334_v61 = vsub.s32 4, %v5842_v32 }
 0x5b2   : > { %8105 = vst [vmem:[#allocation119_spill] sm:$0xff] %v6331_v20 }
 0x5b3   : > { %v1053_v31 = vand.u32 2147483647, %v1051_v29  ;;  %v1174_v29 = vld [vmem:[#allocation3] sm:$0xff] }
 0x5b4   : > { %v6350_v20 = vrot.slane %v1174_v29, %v5845_v33  ;;  %v6408_v17 = vrot.slane %v1174_v29, %v6334_v61 }
 0x5b5   : > { %v1055_v14 = vsub.f32 0.0, %v1053_v31  ;;  %v6321_v47 = vpop.permute.xlu1 %1933  ;;  %v1170_v31 = vld [vmem:[#allocation2] sm:$0xff]  ;;  %v6355_v50 = vpop.permute.xlu0 %1919 }
 0x5b6   : > { %8103 = vst [vmem:[#allocation117_spill] sm:$0xff] %v6321_v47  ;;  %8108 = vst [vmem:[#allocation122_spill] sm:$0xff] %v6355_v50  ;;  %v6368_v54 = vrot.slane %v1170_v31, %v5845_v33  ;;  %v6371_v24 = vrot.slane %v1170_v31, %v5871_v63  ;;  %v6374_v48 = vrot.slane %v1170_v31, %v5852_v41 }
 0x5b7   : > { %v1058_v28 = vmul.f32 1.442695, %v1055_v14  ;;  %v6337_v14 = vsub.s32 6, %v5842_v32  ;;  %v6378_v50 = vrot.slane %v1170_v31, %v6334_v61  ;;  %v6425_v8 = vrot.slane %v1170_v31, %v6353_v44 }
 0x5b9   : > { %4703 = vpow2.f32 %v1058_v28  ;;  %v6327_v12 = vpop.permute.xlu1 %1923  ;;  %v6342_v28 = vrot.slane %v1174_v29, %v5852_v41  ;;  %v6384_v13 = vrot.slane %v1170_v31, %v6337_v14  ;;  %v6422_v7 = vrot.slane %v1171_v35, %v6337_v14 }
 0x5ba   : > { %8104 = vst [vmem:[#allocation118_spill] sm:$0xff] %v6327_v12  ;;  %v6345_v12 = vsub.s32 3, %v5842_v32  ;;  %v6432_v49 = vrot.slane %v1174_v29, %v6337_v14 }
 0x5bb   : > { %8116 = vst [vmem:[#allocation129_spill] sm:$0xff] %v6422_v7 }
 0x5bc   : > { %8107 = vst [vmem:[#allocation121_spill] sm:$0xff] %v6345_v12  ;;  %v6396_v46 = vrot.slane %v1174_v29, %v6345_v12  ;;  %v6402_v59 = vrot.slane %v1170_v31, %v6345_v12  ;;  %8118 = vst [vmem:[#allocation131_spill] sm:$0xff] %v6432_v49  ;;  %v1241_v49 = vmul.f32 %v6374_v48, %v6017_v0 }
 0x5bd   : > { %v1227_v0 = vmul.f32 %v6342_v28, %v6089_v25  ;;  %v6495_v25 = vrot.slane %v1175_v6, %v6337_v14 }
 0x5be   : > { %v6339_v47 = vpop.permute.xlu1 %1951 }
 0x5bf   : > { %8106 = vst [vmem:[#allocation120_spill] sm:$0xff] %v6339_v47  ;;  %v6360_v47 = vmul.f32 %v5883_v11, %v7876_v15  ;;  %v6381_v11 = vrot.slane %v1174_v29, %v5871_v63  ;;  %v6389_v15 = vsub.s32 7, %v5842_v32  ;;  %v6411_v32 = vrot.slane %v1171_v35, %v6334_v61  ;;  %8132 = vst [vmem:[#allocation145_spill] sm:$0xff] %v6495_v25 }
 0x5c0   : > { %v6515_v25 = vrot.slane %v6416_v9, %v5852_v41 }
 0x5c1   : > { %8109 = vst [vmem:[#allocation123_spill] sm:$0xff] %v6360_v47  ;;  %8111 = vst [vmem:[#allocation125_spill] sm:$0xff] %v6389_v15  ;;  %v6439_v5 = vrot.slane %v1174_v29, %v6389_v15 }
 0x5c2   : > { %v6391_v34 = vpop.permute.xlu1 %1955  ;;  %8134 = vst [vmem:[#allocation147_spill] sm:$0xff] %v6515_v25  ;;  %v6533_v25 = vrot.slane %v6416_v9, %v6345_v12 }
 0x5c3   : > { %8112 = vst [vmem:[#allocation126_spill] sm:$0xff] %v6391_v34  ;;  %v6393_v47 = vpop.eup %4703  ;;  %v6414_v34 = vrot.slane %v1174_v29, %v6353_v44  ;;  %v6459_v29 = vrot.slane %v6416_v9, %v6353_v44 }
 0x5c4   : > { %8113 = vst [vmem:[#allocation127_spill] sm:$0xff] %v6393_v47  ;;  %v3506_v18 = vmul.f32 %v6393_v47, %v8115_v39  ;;  %v6443_v39 = vrot.slane %v6386_v40, %v6334_v61  ;;  %v6445_v47 = vpop.permute.xlu0 %1937 }
 0x5c5   : > { %8114 = vst [vmem:[#allocation128_spill] sm:$0xff] %v6414_v34  ;;  %8120 = vst [vmem:[#allocation133_spill] sm:$0xff] %v6445_v47  ;;  %v6455_v34 = vrot.slane %v1170_v31, %v6389_v15  ;;  %v6465_v47 = vrot.slane %v1175_v6, %v5852_v41  ;;  %v1209_v31 = vmul.f32 %v6368_v54, %v6012_v62 }
 0x5c6   : > { %v6447_v7 = vpop.permute.xlu1 %1969  ;;  %v6450_v58 = vadd.f32 %v3506_v18, %v5868_v57  ;;  %8123 = vst [vmem:[#allocation136_spill] sm:$0xff] %v6459_v29  ;;  %v6471_v57 = vrot.slane %v1175_v6, %v5871_v63  ;;  %v6474_v18 = vrot.slane %v1175_v6, %v6345_v12  ;;  %v6483_v29 = vrot.slane %v1171_v35, %v6345_v12 }
 0x5c7   : > { %8121 = vst [vmem:[#allocation134_spill] sm:$0xff] %v6447_v7  ;;  %8124 = vst [vmem:[#allocation137_spill] sm:$0xff] %v6465_v47  ;;  %v6468_v7 = vrot.slane %v1171_v35, %v5852_v41  ;;  %v6486_v47 = vrot.slane %v1175_v6, %v6334_v61  ;;  %v1193_v62 = vmul.f32 %v6350_v20, %v6006_v60 }
 0x5c8   : > { %8122 = vst [vmem:[#allocation135_spill] sm:$0xff] %v6450_v58  ;;  %8126 = vst [vmem:[#allocation139_spill] sm:$0xff] %v6471_v57  ;;  %v1259_v58 = vmul.f32 %v6381_v11, %v6023_v22  ;;  %v6489_v57 = vrot.slane %v1175_v6, %v6353_v44  ;;  %v1273_v22 = vmul.f32 %v6371_v24, %v6100_v19 }
 0x5c9   : > { %8125 = vst [vmem:[#allocation138_spill] sm:$0xff] %v6468_v7  ;;  %8127 = vst [vmem:[#allocation140_spill] sm:$0xff] %v6474_v18  ;;  %v6492_v18 = vrot.slane %v1171_v35, %v6353_v44  ;;  %v1243_v7 = vmin.f32 %v1227_v0, %v1241_v49  ;;  %v6519_v60 = vrot.slane %v6386_v40, %v5852_v41  ;;  %v6521_v49 = vpop.permute.xlu0 %1965 }
 0x5ca   : > { %8128 = vst [vmem:[#allocation141_spill] sm:$0xff] %v6483_v29  ;;  %8129 = vst [vmem:[#allocation142_spill] sm:$0xff] %v6486_v47  ;;  %v6502_v29 = vrot.slane %v1175_v6, %v6389_v15  ;;  %v1211_v6 = vmin.f32 %v1193_v62, %v1209_v31  ;;  %v1275_v19 = vmin.f32 %v1259_v58, %v1273_v22 }
 0x5cb   : > { %8130 = vst [vmem:[#allocation143_spill] sm:$0xff] %v6489_v57  ;;  %8131 = vst [vmem:[#allocation144_spill] sm:$0xff] %v6492_v18  ;;  %v6504_v47 = vpop.permute.xlu1 %1997  ;;  %v6507_v57 = vrot.slane %v1171_v35, %v6389_v15  ;;  %v6511_v18 = vrot.slane %v6416_v9, %v5845_v33  ;;  %v1305_v35 = vmul.f32 %v6402_v59, %v6035_v36 }
 0x5cc   : > { %8133 = vst [vmem:[#allocation146_spill] sm:$0xff] %v6504_v47  ;;  %8135 = vst [vmem:[#allocation148_spill] sm:$0xff] %v6519_v60  ;;  %v6527_v0 = vrot.slane %v6416_v9, %v5871_v63  ;;  %v1337_v47 = vmul.f32 %v6378_v50, %v6108_v52  ;;  %v6537_v60 = vrot.slane %v6386_v40, %v6345_v12 }
 0x5cd   : > { %8136 = vst [vmem:[#allocation149_spill] sm:$0xff] %v6521_v49  ;;  %v1226_v58 = vmul.f32 %v6342_v28, %v6211_v30  ;;  %v1245_v31 = vadd.f32 %v1243_v7, %v1211_v6  ;;  %v1291_v36 = vmul.f32 %v6396_v46, %v6029_v1  ;;  %v1323_v62 = vmul.f32 %v6408_v17, %v6041_v2 }
 0x5ce   : > { %8137 = vst [vmem:[#allocation150_spill] sm:$0xff] %v6537_v60  ;;  %v6547_v52 = vrot.slane %v6416_v9, %v6334_v61  ;;  %v1401_v49 = vmul.f32 %v6384_v13, %v6116_v42  ;;  %v1240_v60 = vmul.f32 %v6374_v48, %v6197_v55  ;;  %v1208_v30 = vmul.f32 %v6368_v54, %v6205_v16 }
 0x5cf   : > { %v6549_v22 = vpop.permute.xlu1 %1987  ;;  %v1272_v1 = vmul.f32 %v6371_v24, %v6215_v37  ;;  %v1277_v7 = vadd.f32 %v1275_v19, %v1245_v31  ;;  %v6561_v2 = vmul.f32 %v6399_v26, %v6128_v43  ;;  %v1307_v28 = vmin.f32 %v1291_v36, %v1305_v35  ;;  %v6573_v37 = vpop.permute.xlu0 %1983  ;;  %v8140_v19 = vld [vmem:[#allocation51_spill] sm:$0xff]  ;;  %v8142_v31 = vld [vmem:[#allocation80_spill] sm:$0xff] }
 0x5d0   : > { %8138 = vst [vmem:[#allocation151_spill] sm:$0xff] %v6549_v22  ;;  %v6565_v6 = vrot.slane %v6386_v40, %v6353_v44  ;;  %v1192_v42 = vmul.f32 %v6350_v20, %v6190_v21  ;;  %v1258_v55 = vmul.f32 %v6381_v11, %v6203_v38  ;;  %v1242_v16 = vmin.f32 %v1226_v58, %v1240_v60  ;;  %v8141_v35 = vld [vmem:[#allocation131_spill] sm:$0xff] }
 0x5d1   : > { %v1290_v48 = vmul.f32 %v6396_v46, %v6221_v23  ;;  %v6577_v43 = vmul.f32 %v6405_v51, %v6136_v56  ;;  %v1339_v54 = vmin.f32 %v1323_v62, %v1337_v47  ;;  %v1369_v24 = vmul.f32 %v6425_v8, %v6051_v4  ;;  %v8139_v4 = vld [vmem:[#allocation128_spill] sm:$0xff]  ;;  %v8143_v62 = vld [vmem:[#allocation83_spill] sm:$0xff] }
 0x5d2   : > { %v6583_v21 = vrot.slane %v6416_v9, %v6337_v14  ;;  %v1304_v38 = vmul.f32 %v6402_v59, %v6209_v27  ;;  %v1210_v20 = vmin.f32 %v1192_v42, %v1208_v30  ;;  %v1274_v11 = vmin.f32 %v1258_v55, %v1272_v1  ;;  %v8144_v30 = vld [vmem:[#allocation66_spill] sm:$0xff]  ;;  %v8145_v1 = vld [vmem:[#allocation129_spill] sm:$0xff] }
 0x5d3   : > { %v1336_v23 = vmul.f32 %v6378_v50, %v6226_v10  ;;  %v1309_v56 = vadd.f32 %v1307_v28, %v1277_v7  ;;  %v6593_v47 = vmul.f32 %v6411_v32, %v6144_v45  ;;  %v1355_v60 = vmul.f32 %v8139_v4, %v6047_v3  ;;  %v8146_v28 = vld [vmem:[#allocation53_spill] sm:$0xff] }
 0x5d4   : > { %v6589_v46 = vpop.permute.xlu1 %2015  ;;  %v1387_v58 = vmul.f32 %v8141_v35, %v8140_v19  ;;  %v1322_v59 = vmul.f32 %v6408_v17, %v8142_v31  ;;  %v1244_v27 = vadd.f32 %v1242_v16, %v1210_v20  ;;  %v1306_v36 = vmin.f32 %v1290_v48, %v1304_v38  ;;  %v8147_v42 = vld [vmem:[#allocation81_spill] sm:$0xff]  ;;  %v6613_v48 = vpop.permute.xlu0 %2001  ;;  %v8152_v20 = vld [vmem:[#allocation130_spill] sm:$0xff] }
 0x5d5   : > { %v1354_v10 = vmul.f32 %v8139_v4, %v8143_v62  ;;  %v1341_v50 = vadd.f32 %v1339_v54, %v1309_v56  ;;  %v6605_v7 = vmul.f32 %v8145_v1, %v8144_v30  ;;  %v1371_v45 = vmin.f32 %v1355_v60, %v1369_v24  ;;  %v8148_v17 = vld [vmem:[#allocation85_spill] sm:$0xff]  ;;  %8149 = vst [vmem:[#allocation128_spill] sm:$0xff] %v6613_v48  ;;  %v8153_v4 = vld [vmem:[#allocation52_spill] sm:$0xff]  ;;  %v8154_v31 = vld [vmem:[#allocation54_spill] sm:$0xff] }
 0x5d6   : > { %v1433_v3 = vmul.f32 %v6455_v34, %v8146_v28  ;;  %v1368_v55 = vmul.f32 %v6425_v8, %v8147_v42  ;;  %v1276_v19 = vadd.f32 %v1274_v11, %v1244_v27  ;;  %v1338_v22 = vmin.f32 %v1322_v59, %v1336_v23  ;;  %v8151_v54 = vld [vmem:[#allocation69_spill] sm:$0xff]  ;;  %v8155_v11 = vld [vmem:[#allocation82_spill] sm:$0xff]  ;;  %v8156_v27 = vld [vmem:[#allocation87_spill] sm:$0xff] }
 0x5d7   : > { %v1400_v16 = vmul.f32 %v6384_v13, %v8148_v17  ;;  %v6619_v56 = vmul.f32 %v8152_v20, %v8151_v54  ;;  %v1403_v24 = vmin.f32 %v1387_v58, %v1401_v49  ;;  %v1419_v60 = vmul.f32 %v6439_v5, %v8153_v4  ;;  %v8157_v28 = vld [vmem:[#allocation71_spill] sm:$0xff]  ;;  %v8158_v42 = vld [vmem:[#allocation132_spill] sm:$0xff] }
 0x5d8   : > { %v6615_v38 = vpop.permute.xlu1 %2019  ;;  %v1451_v8 = vmul.f32 %v6462_v53, %v8154_v31  ;;  %v1386_v23 = vmul.f32 %v8141_v35, %v8155_v11  ;;  %v1308_v59 = vadd.f32 %v1306_v36, %v1276_v19  ;;  %v1370_v13 = vmin.f32 %v1354_v10, %v1368_v55  ;;  %v8159_v54 = vld [vmem:[#allocation84_spill] sm:$0xff] }
 0x5d9   : > { %8150 = vst [vmem:[#allocation51_spill] sm:$0xff] %v6615_v38  ;;  %v1418_v62 = vmul.f32 %v6439_v5, %v8156_v27  ;;  %v1373_v30 = vadd.f32 %v1371_v45, %v1341_v50  ;;  %v6631_v17 = vmul.f32 %v8158_v42, %v8157_v28  ;;  %v1435_v49 = vmin.f32 %v1419_v60, %v1433_v3  ;;  %v8160_v36 = vld [vmem:[#allocation88_spill] sm:$0xff]  ;;  %v8162_v50 = vld [vmem:[#allocation73_spill] sm:$0xff]  ;;  %v8164_v60 = vld [vmem:[#allocation138_spill] sm:$0xff]  ;;  %v6654_v28 = vpop.permute.xlu0 %2029 }
 0x5da   : > { %v6635_v58 = vrot.slane %v6386_v40, %v6337_v14  ;;  %v1432_v4 = vmul.f32 %v6455_v34, %v8159_v54  ;;  %v1340_v31 = vadd.f32 %v1338_v22, %v1308_v59  ;;  %v1402_v35 = vmin.f32 %v1386_v23, %v1400_v16  ;;  %v8163_v19 = vld [vmem:[#allocation56_spill] sm:$0xff]  ;;  %v8165_v27 = vld [vmem:[#allocation86_spill] sm:$0xff]  ;;  %v8167_v59 = vld [vmem:[#allocation137_spill] sm:$0xff]  ;;  %8168 = vst [vmem:[#allocation80_spill] sm:$0xff] %v6654_v28 }
 0x5db   : > { %v1464_v10 = vmul.f32 %v6399_v26, %v8160_v36  ;;  %v1405_v5 = vadd.f32 %v1403_v24, %v1373_v30  ;;  %v6645_v45 = vmul.f32 %v6443_v39, %v8162_v50  ;;  %v1467_v3 = vmin.f32 %v1451_v8, %v6561_v2  ;;  %v8166_v23 = vld [vmem:[#allocation90_spill] sm:$0xff]  ;;  %v8169_v30 = vld [vmem:[#allocation55_spill] sm:$0xff]  ;;  %v8170_v36 = vld [vmem:[#allocation57_spill] sm:$0xff] }
 0x5dc   : > { %v6641_v55 = vpop.permute.xlu1 %2033  ;;  %v1497_v11 = vmul.f32 %v8164_v60, %v8163_v19  ;;  %v1450_v34 = vmul.f32 %v6462_v53, %v8165_v27  ;;  %v1372_v22 = vadd.f32 %v1370_v13, %v1340_v31  ;;  %v1434_v16 = vmin.f32 %v1418_v62, %v1432_v4  ;;  %v8171_v50 = vld [vmem:[#allocation139_spill] sm:$0xff]  ;;  %v8172_v19 = vld [vmem:[#allocation89_spill] sm:$0xff]  ;;  %v8174_v27 = vld [vmem:[#allocation76_spill] sm:$0xff] }
 0x5dd   : > { %8161 = vst [vmem:[#allocation131_spill] sm:$0xff] %v6641_v55  ;;  %v1482_v26 = vmul.f32 %v8167_v59, %v8166_v23  ;;  %v1437_v24 = vadd.f32 %v1435_v49, %v1405_v5  ;;  %v1483_v54 = vmul.f32 %v8167_v59, %v8169_v30  ;;  %v1515_v2 = vmul.f32 %v8171_v50, %v8170_v36  ;;  %v6666_v62 = vld [vmem:[#allocation2 + $0x18] sm:$0xff]  ;;  %v8181_v55 = vld [vmem:[#allocation141_spill] sm:$0xff] }
 0x5de   : > { %v6662_v8 = vrot.slane %v6416_v9, %v6389_v15  ;;  %v1496_v53 = vmul.f32 %v8164_v60, %v8172_v19  ;;  %v1404_v13 = vadd.f32 %v1402_v35, %v1372_v22  ;;  %v6668_v4 = vld [vmem:[#allocation3 + $0x18] sm:$0xff]  ;;  %v1466_v31 = vmin.f32 %v1450_v34, %v1464_v10  ;;  %v8178_v34 = vld [vmem:[#allocation94_spill] sm:$0xff] }
 0x5df   : > { %v8173_v49 = vld [vmem:[#allocation92_spill] sm:$0xff]  ;;  %v1469_v30 = vadd.f32 %v1467_v3, %v1437_v24  ;;  %v1499_v36 = vmin.f32 %v1483_v54, %v1497_v11  ;;  %v6678_v9 = vrot.slane %v6386_v40, %v6389_v15  ;;  %v8177_v35 = vld [vmem:[#allocation91_spill] sm:$0xff]  ;;  %v6691_v11 = vrot.slane %v6666_v62, %v5845_v33  ;;  %v8182_v24 = vld [vmem:[#allocation93_spill] sm:$0xff] }
 0x5e0   : > { %v1528_v5 = vmul.f32 %v6405_v51, %v8173_v49  ;;  %v8175_v23 = vld [vmem:[#allocation136_spill] sm:$0xff]  ;;  %v1514_v22 = vmul.f32 %v8171_v50, %v8177_v35  ;;  %v1436_v19 = vadd.f32 %v1434_v16, %v1404_v13  ;;  %v1498_v10 = vmin.f32 %v1482_v26, %v1496_v53  ;;  %v6699_v50 = vpop.permute.xlu0 %2047  ;;  %v8185_v13 = vld [vmem:[#allocation58_spill] sm:$0xff] }
 0x5e1   : > { %v6674_v59 = vmul.f32 %v8175_v23, %v8174_v27  ;;  %v6680_v60 = vpop.permute.xlu1 %2061  ;;  %v8179_v38 = vld [vmem:[#allocation140_spill] sm:$0xff]  ;;  %v1531_v49 = vmin.f32 %v1515_v2, %v6577_v43  ;;  %v8180_v27 = vld [vmem:[#allocation59_spill] sm:$0xff]  ;;  %v6695_v40 = vrot.slane %v6668_v4, %v5852_v41  ;;  %v1560_v16 = vmul.f32 %v8181_v55, %v8182_v24  ;;  %8183 = vst [vmem:[#allocation66_spill] sm:$0xff] %v6699_v50 }
 0x5e2   : > { %8176 = vst [vmem:[#allocation83_spill] sm:$0xff] %v6680_v60  ;;  %v1546_v51 = vmul.f32 %v8179_v38, %v8178_v34  ;;  %v1561_v3 = vmul.f32 %v8181_v55, %v8180_v27  ;;  %v1468_v26 = vadd.f32 %v1466_v31, %v1436_v19  ;;  %v1530_v54 = vmin.f32 %v1514_v22, %v1528_v5  ;;  %v8184_v53 = vld [vmem:[#allocation96_spill] sm:$0xff]  ;;  %v8187_v27 = vld [vmem:[#allocation142_spill] sm:$0xff]  ;;  %v8189_v55 = vld [vmem:[#allocation95_spill] sm:$0xff] }
 0x5e3   : > { %v1592_v43 = vmul.f32 %v6411_v32, %v8184_v53  ;;  %v1501_v2 = vadd.f32 %v1499_v36, %v1469_v30  ;;  %v1547_v35 = vmul.f32 %v8179_v38, %v8185_v13  ;;  %v8186_v34 = vld [vmem:[#allocation60_spill] sm:$0xff]  ;;  %v6709_v48 = vrot.slane %v6666_v62, %v5852_v41  ;;  %v8190_v19 = vld [vmem:[#allocation98_spill] sm:$0xff]  ;;  %v8191_v32 = vld [vmem:[#allocation143_spill] sm:$0xff] }
 0x5e4   : > { %v1579_v15 = vmul.f32 %v8187_v27, %v8186_v34  ;;  %v1578_v31 = vmul.f32 %v8187_v27, %v8189_v55  ;;  %v1500_v5 = vadd.f32 %v1498_v10, %v1468_v26  ;;  %v1562_v22 = vmin.f32 %v1546_v51, %v1560_v16  ;;  %v8192_v38 = vld [vmem:[#allocation62_spill] sm:$0xff]  ;;  %v8193_v53 = vld [vmem:[#allocation144_spill] sm:$0xff]  ;;  %v8194_v41 = vld [vmem:[#allocation97_spill] sm:$0xff] }
 0x5e5   : > { %v6711_v60 = vpop.permute.xlu1 %2051  ;;  %v1610_v30 = vmul.f32 %v8191_v32, %v8190_v19  ;;  %v1533_v36 = vadd.f32 %v1531_v49, %v1501_v2  ;;  %v1563_v24 = vmin.f32 %v1547_v35, %v1561_v3  ;;  %v1625_v13 = vmul.f32 %v8193_v53, %v8192_v38  ;;  %v8195_v27 = vld [vmem:[#allocation99_spill] sm:$0xff]  ;;  %v8196_v16 = vld [vmem:[#allocation61_spill] sm:$0xff]  ;;  %v8199_v55 = vld [vmem:[#allocation100_spill] sm:$0xff] }
 0x5e6   : > { %8188 = vst [vmem:[#allocation129_spill] sm:$0xff] %v6711_v60  ;;  %v6721_v34 = vrot.slane %v6666_v62, %v5871_v63  ;;  %v1624_v60 = vmul.f32 %v8193_v53, %v8194_v41  ;;  %v1532_v50 = vadd.f32 %v1530_v54, %v1500_v5  ;;  %v1594_v28 = vmin.f32 %v1578_v31, %v1592_v43  ;;  %v8197_v3 = vld [vmem:[#allocation63_spill] sm:$0xff]  ;;  %v8198_v26 = vld [vmem:[#allocation145_spill] sm:$0xff]  ;;  %v6738_v43 = vpop.permute.xlu0 %2065 }
 0x5e7   : > { %v1656_v10 = vmul.f32 %v8145_v1, %v8195_v27  ;;  %v1595_v51 = vmin.f32 %v1579_v15, %v6593_v47  ;;  %v1611_v49 = vmul.f32 %v8191_v32, %v8196_v16  ;;  %v1643_v2 = vmul.f32 %v8198_v26, %v8197_v3  ;;  %v8200_v1 = vld [vmem:[#allocation101_spill] sm:$0xff]  ;;  %v8202_v27 = vld [vmem:[#allocation102_spill] sm:$0xff] }
 0x5e8   : > { %v6734_v35 = vrot.slane %v6668_v4, %v6345_v12  ;;  %v1642_v41 = vmul.f32 %v8198_v26, %v8199_v55  ;;  %v1564_v54 = vadd.f32 %v1562_v22, %v1532_v50  ;;  %v1626_v31 = vmin.f32 %v1610_v30, %v1624_v60  ;;  %v8201_v32 = vld [vmem:[#allocation65_spill] sm:$0xff]  ;;  %v8203_v60 = vld [vmem:[#allocation103_spill] sm:$0xff]  ;;  %v8206_v55 = vld [vmem:[#allocation104_spill] sm:$0xff] }
 0x5e9   : > { %v1674_v15 = vmul.f32 %v6502_v29, %v8200_v1  ;;  %v1565_v5 = vadd.f32 %v1563_v24, %v1533_v36  ;;  %v1627_v19 = vmin.f32 %v1611_v49, %v1625_v13  ;;  %v1689_v38 = vmul.f32 %v6507_v57, %v8201_v32  ;;  %v8204_v36 = vld [vmem:[#allocation64_spill] sm:$0xff]  ;;  %v8205_v13 = vld [vmem:[#allocation67_spill] sm:$0xff] }
 0x5ea   : > { %v6742_v47 = vpop.permute.xlu1 %2079  ;;  %v6748_v53 = vrot.slane %v6666_v62, %v6345_v12  ;;  %v1688_v50 = vmul.f32 %v6507_v57, %v8202_v27  ;;  %v1596_v22 = vadd.f32 %v1594_v28, %v1564_v54  ;;  %v1658_v16 = vmin.f32 %v1642_v41, %v1656_v10  ;;  %v8207_v57 = vld [vmem:[#allocation105_spill] sm:$0xff]  ;;  %v8208_v28 = vld [vmem:[#allocation147_spill] sm:$0xff]  ;;  %v8209_v54 = vld [vmem:[#allocation70_spill] sm:$0xff] }
 0x5eb   : > { %v1720_v30 = vmul.f32 %v8152_v20, %v8203_v60  ;;  %v1597_v3 = vadd.f32 %v1595_v51, %v1565_v5  ;;  %v1659_v26 = vmin.f32 %v1643_v2, %v6605_v7  ;;  %v1675_v24 = vmul.f32 %v6502_v29, %v8204_v36  ;;  %v8210_v7 = vld [vmem:[#allocation148_spill] sm:$0xff]  ;;  %v8211_v5 = vld [vmem:[#allocation106_spill] sm:$0xff] }
 0x5ec   : > { %v1707_v49 = vmul.f32 %v6511_v18, %v8205_v13  ;;  %v1706_v1 = vmul.f32 %v6511_v18, %v8206_v55  ;;  %v1628_v32 = vadd.f32 %v1626_v31, %v1596_v22  ;;  %v1690_v12 = vmin.f32 %v1674_v15, %v1688_v50  ;;  %v6773_v18 = vpop.permute.xlu0 %2093  ;;  %v8212_v50 = vld [vmem:[#allocation107_spill] sm:$0xff]  ;;  %v8214_v36 = vld [vmem:[#allocation72_spill] sm:$0xff] }
 0x5ed   : > { %v1738_v10 = vmul.f32 %v8208_v28, %v8207_v57  ;;  %v1629_v20 = vadd.f32 %v1627_v19, %v1597_v3  ;;  %v1691_v51 = vmin.f32 %v1675_v24, %v1689_v38  ;;  %v1753_v2 = vmul.f32 %v8210_v7, %v8209_v54  ;;  %v8213_v38 = vld [vmem:[#allocation68_spill] sm:$0xff] }
 0x5ee   : > { %v6763_v41 = vpop.permute.xlu1 %2083  ;;  %v6769_v29 = vrot.slane %v6666_v62, %v6334_v61  ;;  %v1752_v27 = vmul.f32 %v8210_v7, %v8211_v5  ;;  %v1660_v31 = vadd.f32 %v1658_v16, %v1628_v32  ;;  %v1722_v15 = vmin.f32 %v1706_v1, %v1720_v30  ;;  %v8215_v13 = vld [vmem:[#allocation108_spill] sm:$0xff]  ;;  %v8216_v7 = vld [vmem:[#allocation109_spill] sm:$0xff]  ;;  %v8217_v1 = vld [vmem:[#allocation75_spill] sm:$0xff] }
 0x5ef   : > { %v1784_v22 = vmul.f32 %v8158_v42, %v8212_v50  ;;  %v1661_v60 = vadd.f32 %v1659_v26, %v1629_v20  ;;  %v1723_v19 = vmin.f32 %v1707_v49, %v6619_v56  ;;  %v1739_v3 = vmul.f32 %v8208_v28, %v8213_v38  ;;  %v8218_v56 = vld [vmem:[#allocation150_spill] sm:$0xff]  ;;  %v8219_v28 = vld [vmem:[#allocation111_spill] sm:$0xff]  ;;  %v8222_v50 = vld [vmem:[#allocation77_spill] sm:$0xff] }
 0x5f0   : > { %v1771_v24 = vmul.f32 %v6527_v0, %v8214_v36  ;;  %v1770_v55 = vmul.f32 %v6527_v0, %v8215_v13  ;;  %v1692_v57 = vadd.f32 %v1690_v12, %v1660_v31  ;;  %v1754_v54 = vmin.f32 %v1738_v10, %v1752_v27  ;;  %v8220_v10 = vld [vmem:[#allocation110_spill] sm:$0xff]  ;;  %v8223_v38 = vld [vmem:[#allocation113_spill] sm:$0xff]  ;;  %v6805_v36 = vpop.permute.xlu0 %2111 }
 0x5f1   : > { %v1802_v16 = vmul.f32 %v6533_v25, %v8216_v7  ;;  %v1693_v42 = vadd.f32 %v1691_v51, %v1661_v60  ;;  %v1755_v26 = vmin.f32 %v1739_v3, %v1753_v2  ;;  %v1817_v49 = vmul.f32 %v8218_v56, %v8217_v1  ;;  %v8221_v51 = vld [vmem:[#allocation74_spill] sm:$0xff]  ;;  %v8226_v7 = vld [vmem:[#allocation115_spill] sm:$0xff] }
 0x5f2   : > { %v6786_v30 = vpop.permute.xlu1 %2097  ;;  %v6792_v32 = vrot.slane %v6668_v4, %v6353_v44  ;;  %v1816_v20 = vmul.f32 %v8218_v56, %v8219_v28  ;;  %v1724_v0 = vadd.f32 %v1722_v15, %v1692_v57  ;;  %v1786_v12 = vmin.f32 %v1770_v55, %v1784_v22  ;;  %v8224_v22 = vld [vmem:[#allocation112_spill] sm:$0xff]  ;;  %v8225_v57 = vld [vmem:[#allocation78_spill] sm:$0xff] }
 0x5f3   : > { %v1848_v5 = vmul.f32 %v6443_v39, %v8220_v10  ;;  %v1725_v27 = vadd.f32 %v1723_v19, %v1693_v42  ;;  %v1787_v31 = vmin.f32 %v1771_v24, %v6631_v17  ;;  %v1803_v2 = vmul.f32 %v6533_v25, %v8221_v51  ;;  %v8231_v51 = vld [vmem:[#allocation79_spill] sm:$0xff] }
 0x5f4   : > { %v1835_v60 = vmul.f32 %v6547_v52, %v8222_v50  ;;  %v1834_v3 = vmul.f32 %v6547_v52, %v8223_v38  ;;  %v1756_v13 = vadd.f32 %v1754_v54, %v1724_v0  ;;  %v1818_v15 = vmin.f32 %v1802_v16, %v1816_v20  ;;  %v8227_v54 = vld [vmem:[#allocation114_spill] sm:$0xff]  ;;  %v8229_v20 = vld [vmem:[#allocation116_spill] sm:$0xff] }
 0x5f5   : > { %v1866_v55 = vmul.f32 %v8175_v23, %v8224_v22  ;;  %v1757_v39 = vadd.f32 %v1755_v26, %v1725_v27  ;;  %v1819_v19 = vmin.f32 %v1803_v2, %v1817_v49  ;;  %v1881_v17 = vmul.f32 %v6565_v6, %v8225_v57  ;;  %v8228_v26 = vld [vmem:[#allocation119_spill] sm:$0xff]  ;;  %v8235_v57 = vld [vmem:[#allocation149_spill] sm:$0xff] }
 0x5f6   : > { %v1961_v25 = vrot.slane %v6668_v4, %v5845_v33  ;;  %v1880_v52 = vmul.f32 %v6565_v6, %v8226_v7  ;;  %v1788_v42 = vadd.f32 %v1786_v12, %v1756_v13  ;;  %v1850_v1 = vmin.f32 %v1834_v3, %v1848_v5  ;;  %v8230_v12 = vld [vmem:[#allocation117_spill] sm:$0xff] }
 0x5f7   : > { %v6813_v24 = vpop.permute.xlu1 %2125  ;;  %v1898_v16 = vmul.f32 %v6583_v21, %v8227_v54  ;;  %v1789_v56 = vadd.f32 %v1787_v31, %v1757_v39  ;;  %v1851_v23 = vmin.f32 %v1835_v60, %v6645_v45  ;;  %v1913_v49 = vmul.f32 %v6635_v58, %v8228_v26  ;;  %v8232_v60 = vld [vmem:[#allocation122_spill] sm:$0xff] }
 0x5f8   : > { %v6824_v28 = vrot.slane %v6666_v62, %v6353_v44  ;;  %v1912_v0 = vmul.f32 %v6635_v58, %v8229_v20  ;;  %v1820_v10 = vadd.f32 %v1818_v15, %v1788_v42  ;;  %v1882_v6 = vmin.f32 %v1866_v55, %v1880_v52  ;;  %v6839_v58 = vpop.permute.xlu0 %2129  ;;  %v8233_v15 = vld [vmem:[#allocation120_spill] sm:$0xff]  ;;  %v8236_v42 = vld [vmem:[#allocation146_spill] sm:$0xff] }
 0x5f9   : > { %v1944_v5 = vmul.f32 %v6678_v9, %v8230_v12  ;;  %v1821_v27 = vadd.f32 %v1819_v19, %v1789_v56  ;;  %v1883_v31 = vmin.f32 %v6674_v59, %v1881_v17  ;;  %v1899_v45 = vmul.f32 %v6583_v21, %v8231_v51  ;;  %v8234_v21 = vld [vmem:[#allocation118_spill] sm:$0xff]  ;;  %v8240_v51 = vld [vmem:[#allocation151_spill] sm:$0xff] }
 0x5fa   : > { %v2025_v2 = vrot.slane %v6668_v4, %v5871_v63  ;;  %v1930_v38 = vmul.f32 %v6662_v8, %v8232_v60  ;;  %v1852_v3 = vadd.f32 %v1850_v1, %v1820_v10  ;;  %v1914_v13 = vmin.f32 %v1898_v16, %v1912_v0  ;;  %v8237_v16 = vld [vmem:[#allocation133_spill] sm:$0xff]  ;;  %v8238_v26 = vld [vmem:[#allocation134_spill] sm:$0xff] }
 0x5fb   : > { %v6835_v50 = vpop.permute.xlu1 %2115  ;;  %v1962_v22 = vmul.f32 %v1961_v25, %v8233_v15  ;;  %v1853_v55 = vadd.f32 %v1851_v23, %v1821_v27  ;;  %v1915_v39 = vmin.f32 %v1899_v45, %v1913_v49  ;;  %v6844_v59 = vrot.slane %v6666_v62, %v6337_v14  ;;  %v8239_v27 = vld [vmem:[#allocation126_spill] sm:$0xff]  ;;  %v8241_v45 = vld [vmem:[#allocation80_spill] sm:$0xff] }
 0x5fc   : > { %v1931_v19 = vmul.f32 %v6662_v8, %v8234_v21  ;;  %v1976_v17 = vmul.f32 %v6691_v11, %v8235_v57  ;;  %v1884_v7 = vadd.f32 %v1882_v6, %v1852_v3  ;;  %v1946_v52 = vmin.f32 %v1930_v38, %v1944_v5  ;;  %v2158_v60 = vpop.permute.xlu0 %2157  ;;  %v8242_v3 = vld [vmem:[#allocation83_spill] sm:$0xff] }
 0x5fd   : > { %v2008_v1 = vmul.f32 %v6709_v48, %v8236_v42  ;;  %v1885_v54 = vadd.f32 %v1883_v31, %v1853_v55  ;;  %v1945_v56 = vmul.f32 %v6678_v9, %v8237_v16  ;;  %v1994_v23 = vmul.f32 %v6695_v40, %v6573_v37 }
 0x5fe   : > { %v1977_v49 = vmul.f32 %v6691_v11, %v8238_v26  ;;  %v1916_v20 = vadd.f32 %v1914_v13, %v1884_v7  ;;  %v1978_v8 = vmin.f32 %v1962_v22, %v1976_v17  ;;  %v2026_v0 = vmul.f32 %v2025_v2, %v6589_v46  ;;  %v8243_v13 = vld [vmem:[#allocation128_spill] sm:$0xff]  ;;  %v8244_v22 = vld [vmem:[#allocation66_spill] sm:$0xff] }
 0x5ff   : > { %v2089_v10 = vrot.slane %v6668_v4, %v6334_v61  ;;  %v1917_v12 = vadd.f32 %v1915_v39, %v1885_v54  ;;  %v1947_v5 = vmin.f32 %v1931_v19, %v1945_v56  ;;  %v1963_v31 = vmul.f32 %v1961_v25, %v8239_v27  ;;  %v8245_v25 = vld [vmem:[#allocation131_spill] sm:$0xff] }
 0x600   : > { %v2144_v6 = vpop.permute.xlu1 %2143  ;;  %v1995_v9 = vmul.f32 %v6695_v40, %v8240_v51  ;;  %v2040_v37 = vmul.f32 %v6721_v34, %v8241_v45  ;;  %v1948_v11 = vadd.f32 %v1946_v52, %v1916_v20  ;;  %v2010_v38 = vmin.f32 %v1994_v23, %v2008_v1  ;;  %v8246_v1 = vld [vmem:[#allocation51_spill] sm:$0xff] }
 0x601   : > { %v2072_v46 = vmul.f32 %v6748_v53, %v8242_v3  ;;  %v2009_v15 = vmul.f32 %v6709_v48, %v8243_v13  ;;  %v2058_v55 = vmul.f32 %v6734_v35, %v8244_v22  ;;  %v1979_v39 = vmin.f32 %v1963_v31, %v1977_v49  ;;  %v8247_v48 = vld [vmem:[#allocation129_spill] sm:$0xff]  ;;  %v8249_v3 = vld [vmem:[#allocation123_spill] sm:$0xff] }
 0x602   : > { %v2041_v21 = vmul.f32 %v6721_v34, %v8245_v25  ;;  %v1980_v40 = vadd.f32 %v1978_v8, %v1948_v11  ;;  %v2042_v19 = vmin.f32 %v2026_v0, %v2040_v37  ;;  %v2090_v57 = vmul.f32 %v2089_v10, %v6742_v47  ;;  %v8248_v31 = vld [vmem:[#allocation125_spill] sm:$0xff]  ;;  %v8254_v25 = vld [vmem:[#allocation47_spill] sm:$0xff] }
 0x603   : > { %v2153_v17 = vrot.slane %v6668_v4, %v6337_v14  ;;  %v1949_v52 = vadd.f32 %v1947_v5, %v1917_v12  ;;  %v2011_v42 = vmin.f32 %v1995_v9, %v2009_v15  ;;  %v2027_v54 = vmul.f32 %v2025_v2, %v8246_v1  ;;  %v2176_v2 = vpop.permute.xlu0 %2175  ;;  %v8252_v13 = vld [vmem:[#allocation49_spill] sm:$0xff] }
 0x604   : > { %v2148_v7 = vpop.permute.xlu1 %2147  ;;  %v2059_v16 = vmul.f32 %v6734_v35, %v8247_v48  ;;  %v2104_v56 = vmul.f32 %v6769_v29, %v6773_v18  ;;  %v2012_v23 = vadd.f32 %v2010_v38, %v1980_v40  ;;  %v2074_v34 = vmin.f32 %v2058_v55, %v2072_v46  ;;  %v8250_v46 = vld [vmem:[#allocation124_spill] sm:$0xff] }
 0x605   : > { %v2136_v26 = vmul.f32 %v6824_v28, %v6813_v24  ;;  %v2073_v47 = vmul.f32 %v6748_v53, %v6738_v43  ;;  %v2122_v49 = vmul.f32 %v6792_v32, %v6805_v36  ;;  %v1981_v20 = vadd.f32 %v1979_v39, %v1949_v52 }
 0x606   : > { %v2043_v8 = vmin.f32 %v2027_v54, %v2041_v21  ;;  %v2044_v0 = vadd.f32 %v2042_v19, %v2012_v23  ;;  %v2106_v12 = vmin.f32 %v2090_v57, %v2104_v56  ;;  %v2105_v35 = vmul.f32 %v6769_v29, %v6786_v30 }
 0x607   : > { %v2154_v18 = vmul.f32 %v2153_v17, %v2144_v6  ;;  %v2168_v27 = vmul.f32 %v6844_v59, %v2158_v60  ;;  %v2185_v24 = vrot.slane %v6668_v4, %v8248_v31  ;;  %v2013_v51 = vadd.f32 %v2011_v42, %v1981_v20 }
 0x608   : > { %v2162_v5 = vpop.permute.xlu1 %2161  ;;  %v2075_v43 = vmin.f32 %v2059_v16, %v2073_v47  ;;  %v2076_v53 = vadd.f32 %v2074_v34, %v2044_v0  ;;  %v2091_v36 = vmul.f32 %v2089_v10, %v6763_v41  ;;  %v2138_v9 = vmin.f32 %v2122_v49, %v2136_v26  ;;  %v8258_v47 = vld [vmem:[#allocation127_spill] sm:$0xff] }
 0x609   : > { %v2123_v45 = vmul.f32 %v6792_v32, %v6835_v50  ;;  %v2137_v29 = vmul.f32 %v6824_v28, %v6839_v58  ;;  %v2199_v30 = vrot.slane %v6666_v62, %v8248_v31  ;;  %v2045_v6 = vadd.f32 %v2043_v8, %v2013_v51  ;;  %v2194_v58 = vpop.permute.xlu0 %2193  ;;  %v2246_v51 = vld [vmem:[#allocation4 + $0x8] sm:$0xff] }
 0x60a   : > { %v2108_v4 = vadd.f32 %v2106_v12, %v2076_v53  ;;  %v2107_v37 = vmin.f32 %v2091_v36, %v2105_v35  ;;  %v2170_v60 = vmin.f32 %v2154_v18, %v2168_v27  ;;  %v2169_v11 = vmul.f32 %v6844_v59, %v2162_v5  ;;  %v8256_v59 = vld [vmem:[#allocation48_spill] sm:$0xff]  ;;  %v2247_v36 = vld [vmem:[#allocation4 + $0x10] sm:$0xff] }
 0x60b   : > { %v2186_v38 = vmul.f32 %v2185_v24, %v2176_v2  ;;  %v2077_v41 = vadd.f32 %v2075_v43, %v2045_v6  ;;  %v2214_v32 = vadd.f32 %v8250_v46, %v8249_v3  ;;  %v8251_v50 = vstv %s6329_s13 }
 0x60c   : > { %v2218_v28 = vmul.f32 %v8252_v13, %v8251_v50  ;;  %v2140_v15 = vadd.f32 %v2138_v9, %v2108_v4  ;;  %v2139_v62 = vmin.f32 %v2123_v45, %v2137_v29  ;;  %v2155_v22 = vmul.f32 %v2153_v17, %v2148_v7  ;;  %v2248_v9 = vld [vmem:[#allocation4 + $0x18] sm:$0xff]  ;;  %v4015_v45 = vld [vmem:[#allocation5 + $0x1] ss:$0 sm:$0xff] }
 0x60d   : > { %v2190_v10 = vpop.permute.xlu1 %2189  ;;  %v8253_v39 = vstv %s6323_s12  ;;  %v8255_v40 = vstv %s6325_s9  ;;  %v2109_v57 = vadd.f32 %v2107_v37, %v2077_v41  ;;  %v2201_v54 = vmul.f32 %v2199_v30, %v2194_v58  ;;  %v2350_v58 = vld [vmem:[#allocation15 + $0x38] sm:$0xff]  ;;  %s5173_s12 = smov [#allocation22]  }
 0x60e   : > { %v2200_v55 = vmul.f32 %v2199_v30, %v2190_v10  ;;  %v2209_v21 = vmul.f32 %v8254_v25, %v8253_v39  ;;  %v2213_v19 = vmul.f32 %v8256_v59, %v8255_v40  ;;  %v2172_v52 = vadd.f32 %v2170_v60, %v2140_v15  ;;  %s4978_s9 = sshll.u32 %s5173_s12, 4  ;;  %s4979_s9 = int_to_ptr.vmem [resolvable:$false] %s4978_s9 }
 0x60f   : > { %v2171_v42 = vmin.f32 %v2155_v22, %v2169_v11  ;;  %v2220_v16 = vadd.f32 %v2218_v28, %v2214_v32  ;;  %v2141_v56 = vadd.f32 %v2139_v62, %v2109_v57  ;;  %v8257_v26 = vmov %v8251_v50  ;;  %v2347_v32 = vld [vmem:[#allocation15 + $0x20] sm:$0xff]  ;;  %v2348_v50 = vld [vmem:[#allocation15 + $0x28] sm:$0xff]  ;;  %v2349_v28 = vld [vmem:[#allocation15 + $0x30] sm:$0xff]  ;;  %s4980_s13 = scalar_lea.vmem %s4979_s9, 512  ;;  %p4981_p2 = scmp.lt.s32.totalorder %s7697_s3, %s4979_s9 }
 0x610   : > { %v2202_v1 = vmin.f32 %v2186_v38, %v2200_v55  ;;  %v2219_v17 = vmul.f32 %v8258_v47, %v8257_v26  ;;  %v2215_v8 = vadd.f32 %v2213_v19, %v2209_v21  ;;  %v8259_v53 = vmov 0  ;;  %p4982_p7 = scmp.lt.s32.totalorder %s4980_s13, %s4974_s27 }
 0x611   : > { %v2180_v48 = vpop.permute.xlu1 %2179  ;;  %v2173_v7 = vadd.f32 %v2171_v42, %v2141_v56  ;;  %v8260_v53 = vsel %vm6919_vm4, 4294967295, %v8259_v53  ;;  %v4194_v29 = vpack.c.bf16 %v2248_v9, %v2247_v36  ;;  %v8262_v30 = vmov 2  }
 0x612   : > { %v2204_v23 = vadd.f32 %v2202_v1, %v2172_v52  ;;  %v2187_v34 = vmul.f32 %v2185_v24, %v2180_v48  ;;  %v2221_v12 = vadd.f32 %v2219_v17, %v2215_v8  ;;  %v2245_v24 = vld [vmem:[#allocation4] sm:$0xff]  ;;  %8261 = vst [vmem:[#allocation53_spill] sm:$0xff] %v8260_v53  ;;  %v4200_v13 = vpack.c.bf16 %v2348_v50, %v2347_v32  ;;  %p4983_p3 = por %p4982_p7, %p4981_p2 }
 0x613   : > { %v4188_v43 = vpack.c.bf16 %v2246_v51, %v2245_v24  ;;  %v4204_v15 = vpack.c.bf16 %v2350_v58, %v2349_v28  ;;  %v8265_v26 = vmov 6   ;;  %v8266_v47 = vmov 8   ;;  %v7061_v50 = vld [vmem:[#allocation2 + $0x20] sm:$0xff]  ;;  %v8287_v28 = vld [vmem:[#allocation46_spill] sm:$0xff] }
 0x614   : > { %v2203_v49 = vmin.f32 %v2187_v34, %v2201_v54  ;;  %v2222_v20 = vadd.f32 %v2220_v16, %v2204_v23  ;;  %4201 = vmatprep.subr.bf16.mxu0 %v4200_v13  ;;  %v8263_v23 = vmov 4   ;;  %v8264_v34 = vmov 1   ;;  %p4984_p12 = pnand %p4983_p3, %p4977_p9 }
 0x615   : > { %4190 = vmatprep.subr.msk.bf16.mxu1 %vm6919_vm4, %v4188_v43  ;;  %4203 = vmatpush3.bf16.msra.mxu0 %v4200_v13  ;;  %v8267_v17 = vmov 10   ;;  %v8271_v8 = vmov 16   ;;  %v8278_v24 = vmov 26   ;;  %v8279_v36 = vmov 9  }
 0x616   : > { %v2205_v2 = vadd.f32 %v2203_v49, %v2173_v7  ;;  %v2224_v0 = vmul.f32 0.03125, %v2222_v20  ;;  %4193 = vmatpush3.bf16.xpose.msk.msra.mxu1 %vm6919_vm4, %v4188_v43  ;;  %4205 = vmatprep.subr.bf16.mxu0 %v4204_v15  ;;  %v8268_v7 = vmov 3   ;;  %v8269_v49 = vmov 12  }
 0x617   : > { %4196 = vmatprep.subr.msk.bf16.mxu1 %vm6919_vm4, %v4194_v29  ;;  %v8270_v20 = vmov 14   ;;  %v8280_v9 = vmov 28   ;;  %v7066_v58 = vrot.slane %v7061_v50, %v8287_v28 }
 0x618   : > { %v2227_v35 = vsel %vm2226_vm3, %v2224_v0, -inf  ;;  %v2223_v18 = vadd.f32 %v2221_v12, %v2205_v2  ;;  %v8272_v2 = vmov 5   ;;  %v8274_v12 = vmov 20  }
 0x619   : > { %2228 = vmax.xlane.f32.xlu1 %v2227_v35  ;;  %4207 = vmatpush3.bf16.msra.mxu0 %v4204_v15  ;;  %v8275_v35 = vmov 22   ;;  %v7069_v15 = vld [vmem:[#allocation3 + $0x20] sm:$0xff] }
 0x61a   : > { %v2225_v5 = vmul.f32 0.03125, %v2223_v18  ;;  %v8276_v18 = vmov 7  }
 0x61c   : > { %v2230_v27 = vsel %vm2226_vm3, %v2225_v5, -inf }
 0x61d   : > { %2231 = vmax.xlane.f32.xlu0 %v2230_v27 }
 0x61e   : > { %4199 = vmatpush3.bf16.xpose.msk.msra.mxu1 %vm6919_vm4, %v4194_v29  ;;  %v8281_v29 = vmov 30  }
 0x633   : > { %2440 = vperm.xlu0 %4576, %v4015_v45  }
 0x637   : > { %4580 = vset.pattern.permute.xlu0 %v8262_v30 }
 0x6a6   : > { %v2229_v6 = vpop.xlane.xlu1 %2228 }
 0x6a7   : > { %v2233_v4 = vsub.f32 %v2224_v0, %v2229_v6  ;;  %v8273_v0 = vmov 18  }
 0x6a9   : > { %v2235_v37 = vmul.f32 1.442695, %v2233_v4  ;;  %v8282_v4 = vmov 11  }
 0x6aa   : > { %v2232_v60 = vpop.xlane.xlu0 %2231 }
 0x6ab   : > { %4705 = vpow2.f32 %v2235_v37  ;;  %v2234_v11 = vsub.f32 %v2225_v5, %v2232_v60  ;;  %v8277_v5 = vmov 24   ;;  %v8283_v60 = vmov 13  }
 0x6ad   : > { %v2237_v38 = vmul.f32 1.442695, %v2234_v11  ;;  %v8284_v11 = vmov 15  }
 0x6af   : > { %4707 = vpow2.f32 %v2237_v38  ;;  %v8285_v38 = vmov 17  }
 0x6b2   : > { %v6936_v62 = vpop.permute.xlu0 %2440 }
 0x6b5   : > { %v4706_v41 = vpop.eup %4705 }
 0x6b6   : > { %4136 = vmatprep.mubr.msk.f32.mxu1 %vm2226_vm3, %v4706_v41  ;;  %v2239_v10 = vsel %vm2226_vm3, %v4706_v41, 0.0 }
 0x6b7   : > { %2240 = vadd.xlane.f32.xlu0 %v2239_v10 }
 0x6b9   : > { %v4708_v3 = vpop.eup %4707 }
 0x6ba   : > { %4137 = vmatmul.mubr.msk.f32.vlgmr.msra.gmra.mrb[0].mxu1 %vm2226_vm3, %v4708_v3  ;;  %v2242_v46 = vsel %vm2226_vm3, %v4708_v3, 0.0  ;;  %v8286_v3 = vmov 19  }
 0x6bb   : > { %2243 = vadd.xlane.f32.xlu1 %v2242_v46 }
 0x744   : > { %v2241_v22 = vpop.xlane.xlu0 %2240 }
 0x745   : > { %4709 = vrcp.f32 %v2241_v22  ;;  %v7077_v22 = vrot.slane %v7069_v15, %v8287_v28 }
 0x748   : > { %v2244_v55 = vpop.xlane.xlu1 %2243 }
 0x749   : > { %4711 = vrcp.f32 %v2244_v55  ;;  %v7081_v55 = vrot.slane %v7069_v15, %v5871_v63 }
 0x74b   : > { %8288 = vst [vmem:[#allocation81_spill] sm:$0xff] %v7081_v55 }
 0x74f   : > { %v4710_v25 = vpop.eup %4709 }
 0x753   : > { %v4712_v40 = vpop.eup %4711 }
 0x78d   : > { %v4138_v39 = vpop.f32.mrb[0].mxu1 }
 0x78e   : > { %v2333_v21 = vpop.f32.mrb[1].mxu1  ;;  %v2345_v19 = vmul.f32 %v4712_v40, %v4138_v39  ;;  %v8289_v39 = vmov 21  }
 0x78f   : > { %v2344_v59 = vmul.f32 %v4710_v25, %v2333_v21  ;;  %v7087_v25 = vrot.slane %v7061_v50, %v5871_v63  ;;  %v7091_v21 = vrot.slane %v7069_v15, %v5845_v33 }
 0x791   : > { %4147 = vmatprep.mubr.msk.f32.mxu0 %vm1066_vm2, %v2344_v59  ;;  %8290 = vst [vmem:[#allocation85_spill] sm:$0xff] %v7087_v25 }
 0x792   : > { %4148 = vmatmul.mubr.msk.f32.vlgmr.msra.gmra.mrb[2].mxu0 %vm1066_vm2, %v2345_v19 }
 0x865   : > { %v4149_v57 = vpop.f32.mrb[2].mxu0 }
 0x866   : > { %v2444_v52 = vsub.f32 %v4149_v57, %v6936_v62  ;;  %v2450_v42 = vsub.f32 %v6936_v62, %v4149_v57  ;;  %v2423_v1 = vpop.f32.mrb[3].mxu0  ;;  %v8291_v57 = vld [vmem:[#allocation121_spill] sm:$0xff] }
 0x867   : > { %v2443_v27 = vsub.f32 %v2423_v1, %v6936_v62  ;;  %v2449_v43 = vsub.f32 %v6936_v62, %v2423_v1  ;;  %v7073_v62 = vrot.slane %v7061_v50, %v5845_v33 }
 0x868   : > { %v2447_v54 = vmul.f32 1.442695, %v2444_v52  ;;  %v2453_v48 = vmul.f32 1.442695, %v2450_v42  ;;  %v7098_v52 = vrot.slane %v7061_v50, %v8291_v57 }
 0x869   : > { %v2445_v51 = vmul.f32 1.442695, %v2443_v27  ;;  %v2451_v45 = vmul.f32 1.442695, %v2449_v43 }
 0x86a   : > { %4713 = vpow2.f32 %v2447_v54  ;;  %8292 = vst [vmem:[#allocation69_spill] sm:$0xff] %v7098_v52 }
 0x86b   : > { %4715 = vpow2.f32 %v2453_v48  ;;  %v7105_v48 = vrot.slane %v7069_v15, %v8291_v57 }
 0x86c   : > { %4717 = vpow2.f32 %v2445_v51 }
 0x86d   : > { %4719 = vpow2.f32 %v2451_v45  ;;  %8293 = vst [vmem:[#allocation130_spill] sm:$0xff] %v7105_v48 }
 0x874   : > { %v6942_v16 = vpop.eup %4713 }
 0x875   : > { %v6944_v56 = vpop.eup %4715  ;;  %2472 = vperm.xlu1 %4577, %v6942_v16  }
 0x876   : > { %2552 = vperm.xlu0 %4580, %v6944_v56   ;;  %v7004_v6 = vpop.eup %4717 }
 0x877   : > { %v7010_v37 = vpop.eup %4719 }
 0x879   : > { %2488 = vperm.xlu1 %4577, %v6944_v56  }
 0x87a   : > { %4583 = vset.pattern.permute.xlu0 %v8263_v23 }
 0x87b   : > { %2616 = vperm.xlu0 %4583, %v6944_v56  }
 0x87d   : > { %4578 = vset.pattern.permute.xlu1 %v8264_v34 }
 0x87e   : > { %2506 = vperm.xlu1 %4578, %v6942_v16  }
 0x87f   : > { %4586 = vset.pattern.permute.xlu0 %v8265_v26 }
 0x880   : > { %2680 = vperm.xlu0 %4586, %v6944_v56  }
 0x882   : > { %2520 = vperm.xlu1 %4578, %v6944_v56  }
 0x884   : > { %4589 = vset.pattern.permute.xlu0 %v8266_v47 }
 0x885   : > { %2744 = vperm.xlu0 %4589, %v6944_v56  }
 0x886   : > { %4579 = vset.pattern.permute.xlu1 %v8262_v30 }
 0x887   : > { %2538 = vperm.xlu1 %4579, %v6942_v16  }
 0x889   : > { %4592 = vset.pattern.permute.xlu0 %v8267_v17 }
 0x88a   : > { %2808 = vperm.xlu0 %4592, %v6944_v56  }
 0x88b   : > { %4581 = vset.pattern.permute.xlu1 %v8268_v7 }
 0x88c   : > { %2570 = vperm.xlu1 %4581, %v6942_v16  }
 0x88e   : > { %4595 = vset.pattern.permute.xlu0 %v8269_v49 }
 0x88f   : > { %2872 = vperm.xlu0 %4595, %v6944_v56  }
 0x890   : > { %2584 = vperm.xlu1 %4581, %v6944_v56  }
 0x893   : > { %4598 = vset.pattern.permute.xlu0 %v8270_v20 }
 0x894   : > { %2936 = vperm.xlu0 %4598, %v6944_v56   ;;  %4582 = vset.pattern.permute.xlu1 %v8263_v23 }
 0x895   : > { %2602 = vperm.xlu1 %4582, %v6942_v16  }
 0x898   : > { %4601 = vset.pattern.permute.xlu0 %v8271_v8 }
 0x899   : > { %3000 = vperm.xlu0 %4601, %v6944_v56   ;;  %4584 = vset.pattern.permute.xlu1 %v8272_v2 }
 0x89a   : > { %2634 = vperm.xlu1 %4584, %v6942_v16  }
 0x89d   : > { %4604 = vset.pattern.permute.xlu0 %v8273_v0 }
 0x89e   : > { %3064 = vperm.xlu0 %4604, %v6944_v56   ;;  %2648 = vperm.xlu1 %4584, %v6944_v56  }
 0x8a2   : > { %4607 = vset.pattern.permute.xlu0 %v8274_v12  ;;  %4585 = vset.pattern.permute.xlu1 %v8265_v26 }
 0x8a3   : > { %3128 = vperm.xlu0 %4607, %v6944_v56   ;;  %2666 = vperm.xlu1 %4585, %v6942_v16  }
 0x8a7   : > { %4610 = vset.pattern.permute.xlu0 %v8275_v35  ;;  %4587 = vset.pattern.permute.xlu1 %v8276_v18 }
 0x8a8   : > { %3192 = vperm.xlu0 %4610, %v6944_v56   ;;  %2698 = vperm.xlu1 %4587, %v6942_v16  }
 0x8ac   : > { %4613 = vset.pattern.permute.xlu0 %v8277_v5  ;;  %2712 = vperm.xlu1 %4587, %v6944_v56  }
 0x8ad   : > { %3256 = vperm.xlu0 %4613, %v6944_v56  }
 0x8b0   : > { %4588 = vset.pattern.permute.xlu1 %v8266_v47 }
 0x8b1   : > { %4616 = vset.pattern.permute.xlu0 %v8278_v24  ;;  %2730 = vperm.xlu1 %4588, %v6942_v16  }
 0x8b2   : > { %3320 = vperm.xlu0 %4616, %v6944_v56  }
 0x8b5   : > { %4590 = vset.pattern.permute.xlu1 %v8279_v36 }
 0x8b6   : > { %4619 = vset.pattern.permute.xlu0 %v8280_v9  ;;  %2762 = vperm.xlu1 %4590, %v6942_v16  }
 0x8b7   : > { %3384 = vperm.xlu0 %4619, %v6944_v56  }
 0x8ba   : > { %2776 = vperm.xlu1 %4590, %v6944_v56  }
 0x8bb   : > { %4622 = vset.pattern.permute.xlu0 %v8281_v29 }
 0x8bc   : > { %3448 = vperm.xlu0 %4622, %v6944_v56  }
 0x8be   : > { %4591 = vset.pattern.permute.xlu1 %v8267_v17 }
 0x8bf   : > { %2794 = vperm.xlu1 %4591, %v6942_v16  }
 0x8c0   : > { %4625 = vset.pattern.permute.xlu0 %v8262_v30 }
 0x8c1   : > { %2534 = vperm.xlu0 %4625, %v7004_v6  }
 0x8c3   : > { %4593 = vset.pattern.permute.xlu1 %v8282_v4 }
 0x8c4   : > { %2826 = vperm.xlu1 %4593, %v6942_v16  }
 0x8c5   : > { %4628 = vset.pattern.permute.xlu0 %v8268_v7 }
 0x8c6   : > { %2580 = vperm.xlu0 %4628, %v7010_v37  }
 0x8c8   : > { %2840 = vperm.xlu1 %4593, %v6944_v56  }
 0x8ca   : > { %4629 = vset.pattern.permute.xlu0 %v8263_v23 }
 0x8cb   : > { %2598 = vperm.xlu0 %4629, %v7004_v6  }
 0x8cc   : > { %4594 = vset.pattern.permute.xlu1 %v8269_v49 }
 0x8cd   : > { %2858 = vperm.xlu1 %4594, %v6942_v16  }
 0x8cf   : > { %4632 = vset.pattern.permute.xlu0 %v8272_v2 }
 0x8d0   : > { %2644 = vperm.xlu0 %4632, %v7010_v37  }
 0x8d1   : > { %4596 = vset.pattern.permute.xlu1 %v8283_v60 }
 0x8d2   : > { %2890 = vperm.xlu1 %4596, %v6942_v16  }
 0x8d4   : > { %4633 = vset.pattern.permute.xlu0 %v8265_v26 }
 0x8d5   : > { %2662 = vperm.xlu0 %4633, %v7004_v6  }
 0x8d6   : > { %2904 = vperm.xlu1 %4596, %v6944_v56  }
 0x8d9   : > { %4636 = vset.pattern.permute.xlu0 %v8276_v18 }
 0x8da   : > { %2708 = vperm.xlu0 %4636, %v7010_v37   ;;  %4597 = vset.pattern.permute.xlu1 %v8270_v20 }
 0x8db   : > { %2922 = vperm.xlu1 %4597, %v6942_v16  }
 0x8de   : > { %4637 = vset.pattern.permute.xlu0 %v8266_v47 }
 0x8df   : > { %2726 = vperm.xlu0 %4637, %v7004_v6   ;;  %4599 = vset.pattern.permute.xlu1 %v8284_v11 }
 0x8e0   : > { %2954 = vperm.xlu1 %4599, %v6942_v16  }
 0x8e3   : > { %4640 = vset.pattern.permute.xlu0 %v8279_v36 }
 0x8e4   : > { %2772 = vperm.xlu0 %4640, %v7010_v37   ;;  %2968 = vperm.xlu1 %4599, %v6944_v56  }
 0x8e8   : > { %4641 = vset.pattern.permute.xlu0 %v8267_v17  ;;  %4600 = vset.pattern.permute.xlu1 %v8271_v8 }
 0x8e9   : > { %2790 = vperm.xlu0 %4641, %v7004_v6   ;;  %2986 = vperm.xlu1 %4600, %v6942_v16  }
 0x8ed   : > { %4644 = vset.pattern.permute.xlu0 %v8282_v4  ;;  %4602 = vset.pattern.permute.xlu1 %v8285_v38 }
 0x8ee   : > { %2836 = vperm.xlu0 %4644, %v7010_v37   ;;  %3018 = vperm.xlu1 %4602, %v6942_v16  }
 0x8f2   : > { %4645 = vset.pattern.permute.xlu0 %v8269_v49  ;;  %3032 = vperm.xlu1 %4602, %v6944_v56  }
 0x8f3   : > { %2854 = vperm.xlu0 %4645, %v7004_v6  }
 0x8f4   : > { %v2473_v41 = vpop.permute.xlu1 %2472 }
 0x8f5   : > { %v2553_v19 = vpop.permute.xlu0 %2552  ;;  %v2480_v51 = vmul.f32 %v7091_v21, %v2473_v41 }
 0x8f6   : > { %4603 = vset.pattern.permute.xlu1 %v8273_v0  ;;  %v2560_v27 = vmul.f32 %v7087_v25, %v2553_v19  ;;  %v7120_v19 = vrot.slane %v7069_v15, %v6334_v61 }
 0x8f7   : > { %4648 = vset.pattern.permute.xlu0 %v8283_v60  ;;  %3050 = vperm.xlu1 %4603, %v6942_v16  }
 0x8f8   : > { %2900 = vperm.xlu0 %4648, %v7010_v37   ;;  %v2489_v10 = vpop.permute.xlu1 %2488  ;;  %8295 = vst [vmem:[#allocation54_spill] sm:$0xff] %v7120_v19 }
 0x8f9   : > { %v2496_v42 = vmul.f32 %v7073_v62, %v2489_v10 }
 0x8fa   : > { %v2617_v41 = vpop.permute.xlu0 %2616 }
 0x8fb   : > { %4605 = vset.pattern.permute.xlu1 %v8286_v3 }
 0x8fc   : > { %4649 = vset.pattern.permute.xlu0 %v8270_v20  ;;  %3082 = vperm.xlu1 %4605, %v6942_v16  }
 0x8fd   : > { %2918 = vperm.xlu0 %4649, %v7004_v6   ;;  %v2507_v46 = vpop.permute.xlu1 %2506 }
 0x8fe   : > { %v2514_v1 = vmul.f32 %v7077_v22, %v2507_v46  ;;  %v2498_v46 = vmin.f32 %v2480_v51, %v2496_v42  ;;  %v8296_v51 = vmov 23  }
 0x900   : > { %3096 = vperm.xlu1 %4605, %v6944_v56  }
 0x901   : > { %4652 = vset.pattern.permute.xlu0 %v8284_v11  ;;  %v2521_v32 = vpop.permute.xlu1 %2520 }
 0x902   : > { %2964 = vperm.xlu0 %4652, %v7010_v37   ;;  %v2528_v40 = vmul.f32 %v7066_v58, %v2521_v32  ;;  %v7112_v32 = vrot.slane %v7061_v50, %v6334_v61 }
 0x904   : > { %4606 = vset.pattern.permute.xlu1 %v8274_v12  ;;  %v2530_v43 = vmin.f32 %v2514_v1, %v2528_v40  ;;  %8294 = vst [vmem:[#allocation52_spill] sm:$0xff] %v7112_v32 }
 0x905   : > { %3114 = vperm.xlu1 %4606, %v6942_v16  }
 0x906   : > { %4653 = vset.pattern.permute.xlu0 %v8271_v8  ;;  %v2539_v13 = vpop.permute.xlu1 %2538  ;;  %v2532_v40 = vadd.f32 %v2530_v43, %v2498_v46  ;;  %v7137_v46 = vrot.slane %v7069_v15, %v6353_v44 }
 0x907   : > { %2982 = vperm.xlu0 %4653, %v7004_v6   ;;  %v2546_v54 = vmul.f32 %v7081_v55, %v2539_v13  ;;  %v8317_v55 = vmov 31  }
 0x908   : > { %8298 = vst [vmem:[#allocation87_spill] sm:$0xff] %v7137_v46 }
 0x909   : > { %4608 = vset.pattern.permute.xlu1 %v8289_v39  ;;  %v2562_v13 = vmin.f32 %v2546_v54, %v2560_v27 }
 0x90a   : > { %3146 = vperm.xlu1 %4608, %v6942_v16  }
 0x90b   : > { %4656 = vset.pattern.permute.xlu0 %v8285_v38  ;;  %v2571_v59 = vpop.permute.xlu1 %2570  ;;  %v2564_v42 = vadd.f32 %v2562_v13, %v2532_v40 }
 0x90c   : > { %3028 = vperm.xlu0 %4656, %v7010_v37   ;;  %v2578_v53 = vmul.f32 %v7105_v48, %v2571_v59 }
 0x90e   : > { %3160 = vperm.xlu1 %4608, %v6944_v56  }
 0x90f   : > { %v2585_v45 = vpop.permute.xlu1 %2584 }
 0x910   : > { %v2592_v10 = vmul.f32 %v7098_v52, %v2585_v45  ;;  %4657 = vset.pattern.permute.xlu0 %v8273_v0  ;;  %v2624_v52 = vmul.f32 %v7112_v32, %v2617_v41  ;;  %v7144_v41 = vrot.slane %v7061_v50, %v6337_v14 }
 0x911   : > { %3046 = vperm.xlu0 %4657, %v7004_v6  }
 0x912   : > { %4609 = vset.pattern.permute.xlu1 %v8275_v35  ;;  %v2594_v1 = vmin.f32 %v2578_v53, %v2592_v10  ;;  %v7133_v10 = vrot.slane %v7061_v50, %v6353_v44  ;;  %8299 = vst [vmem:[#allocation71_spill] sm:$0xff] %v7144_v41 }
 0x913   : > { %3178 = vperm.xlu1 %4609, %v6942_v16  }
 0x914   : > { %v2603_v45 = vpop.permute.xlu1 %2602  ;;  %v2596_v59 = vadd.f32 %v2594_v1, %v2564_v42  ;;  %8297 = vst [vmem:[#allocation82_spill] sm:$0xff] %v7133_v10  ;;  %v7150_v1 = vrot.slane %v7069_v15, %v6337_v14 }
 0x915   : > { %v2610_v54 = vmul.f32 %v7120_v19, %v2603_v45  ;;  %4660 = vset.pattern.permute.xlu0 %v8286_v3  ;;  %v2681_v45 = vpop.permute.xlu0 %2680 }
 0x916   : > { %3092 = vperm.xlu0 %4660, %v7010_v37   ;;  %8300 = vst [vmem:[#allocation132_spill] sm:$0xff] %v7150_v1 }
 0x917   : > { %v2626_v27 = vmin.f32 %v2610_v54, %v2624_v52  ;;  %4611 = vset.pattern.permute.xlu1 %v8296_v51 }
 0x918   : > { %3210 = vperm.xlu1 %4611, %v6942_v16  }
 0x919   : > { %v2628_v43 = vadd.f32 %v2626_v27, %v2596_v59  ;;  %v2635_v53 = vpop.permute.xlu1 %2634  ;;  %v2688_v59 = vmul.f32 %v7144_v41, %v2681_v45  ;;  %v7174_v45 = vld [vmem:[#allocation3 + $0x28] sm:$0xff] }
 0x91a   : > { %4661 = vset.pattern.permute.xlu0 %v8274_v12  ;;  %v2642_v40 = vmul.f32 %v7137_v46, %v2635_v53 }
 0x91b   : > { %3110 = vperm.xlu0 %4661, %v7004_v6  }
 0x91c   : > { %3224 = vperm.xlu1 %4611, %v6944_v56  }
 0x91d   : > { %v2649_v52 = vpop.permute.xlu1 %2648 }
 0x91e   : > { %v2656_v13 = vmul.f32 %v7133_v10, %v2649_v52  ;;  %v8301_v10 = vmov 25  }
 0x91f   : > { %4664 = vset.pattern.permute.xlu0 %v8289_v39 }
 0x920   : > { %3156 = vperm.xlu0 %4664, %v7010_v37   ;;  %4612 = vset.pattern.permute.xlu1 %v8277_v5  ;;  %v2658_v42 = vmin.f32 %v2642_v40, %v2656_v13  ;;  %v7163_v13 = vrot.slane %v7061_v50, %v8248_v31  ;;  %v7167_v40 = vrot.slane %v7069_v15, %v8248_v31 }
 0x921   : > { %3242 = vperm.xlu1 %4612, %v6942_v16  }
 0x922   : > { %v2667_v54 = vpop.permute.xlu1 %2666  ;;  %v2660_v53 = vadd.f32 %v2658_v42, %v2628_v43  ;;  %8302 = vst [vmem:[#allocation84_spill] sm:$0xff] %v7163_v13  ;;  %8303 = vst [vmem:[#allocation88_spill] sm:$0xff] %v7167_v40  ;;  %v7170_v43 = vld [vmem:[#allocation2 + $0x28] sm:$0xff] }
 0x923   : > { %v2674_v27 = vmul.f32 %v7150_v1, %v2667_v54  ;;  %v7179_v50 = vrot.slane %v7170_v43, %v5845_v33  ;;  %v8306_v1 = vmov 27   ;;  %v7198_v41 = vrot.slane %v7170_v43, %v8287_v28 }
 0x924   : > { %4665 = vset.pattern.permute.xlu0 %v8275_v35  ;;  %v7229_v32 = vrot.slane %v7170_v43, %v8291_v57  ;;  %v7284_v25 = vrot.slane %v7170_v43, %v8248_v31 }
 0x925   : > { %v2690_v52 = vmin.f32 %v2674_v27, %v2688_v59  ;;  %3174 = vperm.xlu0 %4665, %v7004_v6   ;;  %4614 = vset.pattern.permute.xlu1 %v8301_v10  ;;  %8304 = vst [vmem:[#allocation73_spill] sm:$0xff] %v7179_v50  ;;  %v7184_v59 = vrot.slane %v7174_v45, %v5845_v33  ;;  %v2745_v27 = vpop.permute.xlu0 %2744  ;;  %8307 = vst [vmem:[#allocation138_spill] sm:$0xff] %v7198_v41 }
 0x926   : > { %3274 = vperm.xlu1 %4614, %v6942_v16   ;;  %8312 = vst [vmem:[#allocation55_spill] sm:$0xff] %v7229_v32  ;;  %8320 = vst [vmem:[#allocation136_spill] sm:$0xff] %v7284_v25 }
 0x927   : > { %v2692_v46 = vadd.f32 %v2690_v52, %v2660_v53  ;;  %v2699_v19 = vpop.permute.xlu1 %2698  ;;  %8305 = vst [vmem:[#allocation56_spill] sm:$0xff] %v7184_v59 }
 0x928   : > { %v2706_v15 = vmul.f32 %v7167_v40, %v2699_v19 }
 0x929   : > { %4668 = vset.pattern.permute.xlu0 %v8296_v51 }
 0x92a   : > { %3220 = vperm.xlu0 %4668, %v7010_v37   ;;  %3288 = vperm.xlu1 %4614, %v6944_v56  }
 0x92b   : > { %v2713_v42 = vpop.permute.xlu1 %2712 }
 0x92c   : > { %v2720_v54 = vmul.f32 %v7163_v13, %v2713_v42  ;;  %v2752_v42 = vmul.f32 %v7179_v50, %v2745_v27  ;;  %v7202_v27 = vrot.slane %v7174_v45, %v8287_v28  ;;  %v8311_v50 = vmov 29  }
 0x92e   : > { %4669 = vset.pattern.permute.xlu0 %v8277_v5  ;;  %4615 = vset.pattern.permute.xlu1 %v8278_v24  ;;  %v2722_v53 = vmin.f32 %v2706_v15, %v2720_v54  ;;  %8308 = vst [vmem:[#allocation86_spill] sm:$0xff] %v7202_v27 }
 0x92f   : > { %3238 = vperm.xlu0 %4669, %v7004_v6   ;;  %3306 = vperm.xlu1 %4615, %v6942_v16  }
 0x930   : > { %v2731_v52 = vpop.permute.xlu1 %2730  ;;  %v2724_v19 = vadd.f32 %v2722_v53, %v2692_v46 }
 0x931   : > { %v2738_v13 = vmul.f32 %v7184_v59, %v2731_v52  ;;  %v7215_v52 = vrot.slane %v7174_v45, %v5871_v63 }
 0x933   : > { %v2754_v40 = vmin.f32 %v2738_v13, %v2752_v42  ;;  %4672 = vset.pattern.permute.xlu0 %v8301_v10  ;;  %4617 = vset.pattern.permute.xlu1 %v8306_v1  ;;  %8310 = vst [vmem:[#allocation137_spill] sm:$0xff] %v7215_v52  ;;  %v2809_v42 = vpop.permute.xlu0 %2808 }
 0x934   : > { %3284 = vperm.xlu0 %4672, %v7010_v37   ;;  %3338 = vperm.xlu1 %4617, %v6942_v16  }
 0x935   : > { %v2756_v54 = vadd.f32 %v2754_v40, %v2724_v19  ;;  %v2763_v15 = vpop.permute.xlu1 %2762  ;;  %v7210_v40 = vrot.slane %v7170_v43, %v5871_v63 }
 0x936   : > { %v2770_v53 = vmul.f32 %v7202_v27, %v2763_v15 }
 0x937   : > { %8309 = vst [vmem:[#allocation90_spill] sm:$0xff] %v7210_v40 }
 0x938   : > { %4673 = vset.pattern.permute.xlu0 %v8278_v24  ;;  %3352 = vperm.xlu1 %4617, %v6944_v56  }
 0x939   : > { %3302 = vperm.xlu0 %4673, %v7004_v6   ;;  %v2777_v46 = vpop.permute.xlu1 %2776 }
 0x93a   : > { %v2784_v13 = vmul.f32 %v7198_v41, %v2777_v46  ;;  %v2816_v41 = vmul.f32 %v7210_v40, %v2809_v42  ;;  %v7233_v42 = vrot.slane %v7174_v45, %v8291_v57  ;;  %v8316_v40 = vmov 0  }
 0x93c   : > { %4618 = vset.pattern.permute.xlu1 %v8280_v9  ;;  %v2786_v19 = vmin.f32 %v2770_v53, %v2784_v13  ;;  %8313 = vst [vmem:[#allocation57_spill] sm:$0xff] %v7233_v42 }
 0x93d   : > { %4676 = vset.pattern.permute.xlu0 %v8306_v1  ;;  %3370 = vperm.xlu1 %4618, %v6942_v16  }
 0x93e   : > { %3348 = vperm.xlu0 %4676, %v7010_v37   ;;  %v2795_v46 = vpop.permute.xlu1 %2794  ;;  %v2788_v15 = vadd.f32 %v2786_v19, %v2756_v54  ;;  %v7241_v54 = vrot.slane %v7170_v43, %v6334_v61  ;;  %v7246_v19 = vrot.slane %v7174_v45, %v6334_v61 }
 0x93f   : > { %v2802_v59 = vmul.f32 %v7215_v52, %v2795_v46  ;;  %v2873_v46 = vpop.permute.xlu0 %2872 }
 0x940   : > { %8314 = vst [vmem:[#allocation139_spill] sm:$0xff] %v7241_v54  ;;  %8315 = vst [vmem:[#allocation89_spill] sm:$0xff] %v7246_v19 }
 0x941   : > { %v2818_v27 = vmin.f32 %v2802_v59, %v2816_v41  ;;  %4620 = vset.pattern.permute.xlu1 %v8311_v50 }
 0x942   : > { %4677 = vset.pattern.permute.xlu0 %v8280_v9  ;;  %3402 = vperm.xlu1 %4620, %v6942_v16  }
 0x943   : > { %v2820_v13 = vadd.f32 %v2818_v27, %v2788_v15  ;;  %3366 = vperm.xlu0 %4677, %v7004_v6   ;;  %v2827_v53 = vpop.permute.xlu1 %2826 }
 0x944   : > { %v2834_v27 = vmul.f32 %v7233_v42, %v2827_v53 }
 0x946   : > { %3416 = vperm.xlu1 %4620, %v6944_v56  }
 0x947   : > { %4680 = vset.pattern.permute.xlu0 %v8311_v50  ;;  %v2841_v41 = vpop.permute.xlu1 %2840 }
 0x948   : > { %v2848_v59 = vmul.f32 %v7229_v32, %v2841_v41  ;;  %3412 = vperm.xlu0 %4680, %v7010_v37   ;;  %v2880_v32 = vmul.f32 %v7241_v54, %v2873_v46  ;;  %v7264_v46 = vrot.slane %v7174_v45, %v6353_v44 }
 0x94a   : > { %4621 = vset.pattern.permute.xlu1 %v8281_v29  ;;  %v2850_v15 = vmin.f32 %v2834_v27, %v2848_v59  ;;  %v7260_v27 = vrot.slane %v7170_v43, %v6353_v44  ;;  %8319 = vst [vmem:[#allocation76_spill] sm:$0xff] %v7264_v46 }
 0x94b   : > { %3434 = vperm.xlu1 %4621, %v6942_v16  }
 0x94c   : > { %4681 = vset.pattern.permute.xlu0 %v8281_v29  ;;  %v2859_v41 = vpop.permute.xlu1 %2858  ;;  %v2852_v53 = vadd.f32 %v2850_v15, %v2820_v13  ;;  %8318 = vst [vmem:[#allocation92_spill] sm:$0xff] %v7260_v27  ;;  %v2937_v15 = vpop.permute.xlu0 %2936 }
 0x94d   : > { %v2866_v52 = vmul.f32 %v7246_v19, %v2859_v41  ;;  %3430 = vperm.xlu0 %4681, %v7004_v6  }
 0x94f   : > { %v2882_v42 = vmin.f32 %v2866_v52, %v2880_v32  ;;  %4623 = vset.pattern.permute.xlu1 %v8316_v40  ;;  %v7270_v52 = vrot.slane %v7170_v43, %v6337_v14 }
 0x950   : > { %2467 = vperm.xlu1 %4623, %v7004_v6  }
 0x951   : > { %v2884_v48 = vadd.f32 %v2882_v42, %v2852_v53  ;;  %4684 = vset.pattern.permute.xlu0 %v8317_v55  ;;  %v2891_v59 = vpop.permute.xlu1 %2890  ;;  %v7275_v42 = vrot.slane %v7174_v45, %v6337_v14  ;;  %v2944_v19 = vmul.f32 %v7270_v52, %v2937_v15 }
 0x952   : > { %3476 = vperm.xlu0 %4684, %v7010_v37   ;;  %v2898_v13 = vmul.f32 %v7264_v46, %v2891_v59 }
 0x954   : > { %2483 = vperm.xlu1 %4623, %v7010_v37  }
 0x955   : > { %v2905_v32 = vpop.permute.xlu1 %2904 }
 0x956   : > { %v2912_v40 = vmul.f32 %v7260_v27, %v2905_v32 }
 0x958   : > { %4624 = vset.pattern.permute.xlu1 %v8264_v34  ;;  %v2914_v41 = vmin.f32 %v2898_v13, %v2912_v40  ;;  %v7288_v34 = vrot.slane %v7174_v45, %v8248_v31  ;;  %v7291_v40 = vld [vmem:[#allocation2 + $0x30] sm:$0xff] }
 0x959   : > { %2502 = vperm.xlu1 %4624, %v7004_v6  }
 0x95a   : > { %v2923_v53 = vpop.permute.xlu1 %2922  ;;  %v2916_v27 = vadd.f32 %v2914_v41, %v2884_v48  ;;  %8321 = vst [vmem:[#allocation91_spill] sm:$0xff] %v7288_v34  ;;  %v7294_v48 = vld [vmem:[#allocation3 + $0x30] sm:$0xff] }
 0x95b   : > { %v2930_v32 = vmul.f32 %v7275_v42, %v2923_v53  ;;  %v7304_v45 = vrot.slane %v7294_v48, %v5845_v33 }
 0x95d   : > { %v2946_v54 = vmin.f32 %v2930_v32, %v2944_v19  ;;  %2516 = vperm.xlu1 %4624, %v7010_v37  }
 0x95f   : > { %v2948_v59 = vadd.f32 %v2946_v54, %v2916_v27  ;;  %v2955_v46 = vpop.permute.xlu1 %2954  ;;  %v7299_v27 = vrot.slane %v7291_v40, %v5845_v33 }
 0x960   : > { %v2962_v43 = vmul.f32 %v7288_v34, %v2955_v46  ;;  %v7314_v34 = vrot.slane %v7291_v40, %v8287_v28 }
 0x961   : > { %4626 = vset.pattern.permute.xlu1 %v8262_v30  ;;  %v3001_v30 = vpop.permute.xlu0 %3000 }
 0x962   : > { %2548 = vperm.xlu1 %4626, %v7010_v37   ;;  %v3008_v41 = vmul.f32 %v7299_v27, %v3001_v30  ;;  %v7330_v30 = vrot.slane %v7294_v48, %v5871_v63 }
 0x963   : > { %v2969_v19 = vpop.permute.xlu1 %2968 }
 0x964   : > { %v2976_v54 = vmul.f32 %v7284_v25, %v2969_v19  ;;  %8322 = vst [vmem:[#allocation94_spill] sm:$0xff] %v7330_v30 }
 0x966   : > { %4627 = vset.pattern.permute.xlu1 %v8268_v7  ;;  %v2978_v13 = vmin.f32 %v2962_v43, %v2976_v54  ;;  %v7318_v7 = vrot.slane %v7294_v48, %v8287_v28 }
 0x967   : > { %2566 = vperm.xlu1 %4627, %v7004_v6  }
 0x968   : > { %v2987_v15 = vpop.permute.xlu1 %2986  ;;  %v2980_v32 = vadd.f32 %v2978_v13, %v2948_v59  ;;  %v3065_v13 = vpop.permute.xlu0 %3064 }
 0x969   : > { %v2994_v53 = vmul.f32 %v7304_v45, %v2987_v15 }
 0x96b   : > { %v3010_v19 = vmin.f32 %v2994_v53, %v3008_v41  ;;  %4630 = vset.pattern.permute.xlu1 %v8263_v23  ;;  %v7325_v23 = vrot.slane %v7291_v40, %v5871_v63 }
 0x96c   : > { %2612 = vperm.xlu1 %4630, %v7010_v37  }
 0x96d   : > { %v3012_v46 = vadd.f32 %v3010_v19, %v2980_v32  ;;  %v3019_v25 = vpop.permute.xlu1 %3018  ;;  %v3072_v41 = vmul.f32 %v7325_v23, %v3065_v13 }
 0x96e   : > { %v3026_v43 = vmul.f32 %v7318_v7, %v3019_v25 }
 0x970   : > { %4631 = vset.pattern.permute.xlu1 %v8272_v2 }
 0x971   : > { %v3033_v54 = vpop.permute.xlu1 %3032  ;;  %2630 = vperm.xlu1 %4631, %v7004_v6  }
 0x972   : > { %v3040_v59 = vmul.f32 %v7314_v34, %v3033_v54 }
 0x974   : > { %v3042_v15 = vmin.f32 %v3026_v43, %v3040_v59  ;;  %v7340_v59 = vrot.slane %v7291_v40, %v8291_v57 }
 0x975   : > { %4634 = vset.pattern.permute.xlu1 %v8265_v26  ;;  %v7344_v26 = vrot.slane %v7294_v48, %v8291_v57 }
 0x976   : > { %v3051_v2 = vpop.permute.xlu1 %3050  ;;  %2676 = vperm.xlu1 %4634, %v7010_v37   ;;  %v3044_v32 = vadd.f32 %v3042_v15, %v3012_v46  ;;  %8323 = vst [vmem:[#allocation140_spill] sm:$0xff] %v7340_v59  ;;  %v7356_v15 = vrot.slane %v7294_v48, %v6334_v61 }
 0x977   : > { %v3058_v53 = vmul.f32 %v7330_v30, %v3051_v2  ;;  %v3129_v2 = vpop.permute.xlu0 %3128 }
 0x978   : > { %8324 = vst [vmem:[#allocation59_spill] sm:$0xff] %v7356_v15 }
 0x979   : > { %v3074_v19 = vmin.f32 %v3058_v53, %v3072_v41 }
 0x97a   : > { %4635 = vset.pattern.permute.xlu1 %v8276_v18  ;;  %v7351_v18 = vrot.slane %v7291_v40, %v6334_v61 }
 0x97b   : > { %v3076_v25 = vadd.f32 %v3074_v19, %v3044_v32  ;;  %v3083_v54 = vpop.permute.xlu1 %3082  ;;  %2694 = vperm.xlu1 %4635, %v7004_v6  }
 0x97c   : > { %v3090_v13 = vmul.f32 %v7344_v26, %v3083_v54  ;;  %v7366_v54 = vrot.slane %v7291_v40, %v6353_v44 }
 0x97e   : > { %8325 = vst [vmem:[#allocation141_spill] sm:$0xff] %v7366_v54 }
 0x97f   : > { %v3097_v43 = vpop.permute.xlu1 %3096  ;;  %4638 = vset.pattern.permute.xlu1 %v8266_v47  ;;  %v3136_v47 = vmul.f32 %v7351_v18, %v3129_v2  ;;  %v7382_v2 = vrot.slane %v7294_v48, %v6337_v14 }
 0x980   : > { %v3104_v46 = vmul.f32 %v7340_v59, %v3097_v43  ;;  %2740 = vperm.xlu1 %4638, %v7010_v37  }
 0x981   : > { %8328 = vst [vmem:[#allocation58_spill] sm:$0xff] %v7382_v2 }
 0x982   : > { %v3106_v41 = vmin.f32 %v3090_v13, %v3104_v46 }
 0x984   : > { %v3115_v53 = vpop.permute.xlu1 %3114  ;;  %4639 = vset.pattern.permute.xlu1 %v8279_v36  ;;  %v3108_v19 = vadd.f32 %v3106_v41, %v3076_v25  ;;  %v7370_v36 = vrot.slane %v7294_v48, %v6353_v44  ;;  %v7376_v25 = vrot.slane %v7291_v40, %v6337_v14  ;;  %v3193_v41 = vpop.permute.xlu0 %3192 }
 0x985   : > { %v3122_v32 = vmul.f32 %v7356_v15, %v3115_v53  ;;  %2758 = vperm.xlu1 %4639, %v7004_v6   ;;  %v8358_v15 = vld [vmem:[#allocation71_spill] sm:$0xff] }
 0x986   : > { %8326 = vst [vmem:[#allocation93_spill] sm:$0xff] %v7370_v36  ;;  %8327 = vst [vmem:[#allocation96_spill] sm:$0xff] %v7376_v25 }
 0x987   : > { %v3138_v43 = vmin.f32 %v3122_v32, %v3136_v47  ;;  %v3200_v32 = vmul.f32 %v7376_v25, %v3193_v41 }
 0x989   : > { %v3140_v59 = vadd.f32 %v3138_v43, %v3108_v19  ;;  %v3147_v30 = vpop.permute.xlu1 %3146  ;;  %4642 = vset.pattern.permute.xlu1 %v8267_v17 }
 0x98a   : > { %2804 = vperm.xlu1 %4642, %v7010_v37   ;;  %v3154_v17 = vmul.f32 %v7370_v36, %v3147_v30 }
 0x98d   : > { %v3161_v46 = vpop.permute.xlu1 %3160 }
 0x98e   : > { %v3168_v13 = vmul.f32 %v7366_v54, %v3161_v46  ;;  %4643 = vset.pattern.permute.xlu1 %v8282_v4  ;;  %v7390_v54 = vrot.slane %v7294_v48, %v8248_v31 }
 0x98f   : > { %2822 = vperm.xlu1 %4643, %v7004_v6  }
 0x990   : > { %v3170_v53 = vmin.f32 %v3154_v17, %v3168_v13  ;;  %8329 = vst [vmem:[#allocation60_spill] sm:$0xff] %v7390_v54  ;;  %v7395_v13 = vrot.slane %v7291_v40, %v8248_v31  ;;  %v7398_v17 = vld [vmem:[#allocation2 + $0x38] sm:$0xff]  ;;  %v3257_v40 = vpop.permute.xlu0 %3256 }
 0x991   : > { %8331 = vst [vmem:[#allocation95_spill] sm:$0xff] %v7398_v17  ;;  %v7406_v48 = vrot.slane %v7398_v17, %v5845_v33 }
 0x992   : > { %v3179_v47 = vpop.permute.xlu1 %3178  ;;  %v3172_v4 = vadd.f32 %v3170_v53, %v3140_v59  ;;  %8330 = vst [vmem:[#allocation142_spill] sm:$0xff] %v7395_v13 }
 0x993   : > { %v3186_v19 = vmul.f32 %v7382_v2, %v3179_v47  ;;  %4646 = vset.pattern.permute.xlu1 %v8269_v49  ;;  %v7400_v49 = vld [vmem:[#allocation3 + $0x38] sm:$0xff]  ;;  %8333 = vst [vmem:[#allocation143_spill] sm:$0xff] %v7406_v48  ;;  %v8355_v2 = vld [vmem:[#allocation54_spill] sm:$0xff] }
 0x994   : > { %2868 = vperm.xlu1 %4646, %v7010_v37   ;;  %8332 = vst [vmem:[#allocation98_spill] sm:$0xff] %v7400_v49 }
 0x995   : > { %v3202_v43 = vmin.f32 %v3186_v19, %v3200_v32 }
 0x997   : > { %v3204_v30 = vadd.f32 %v3202_v43, %v3172_v4  ;;  %v3211_v46 = vpop.permute.xlu1 %3210  ;;  %v3264_v4 = vmul.f32 %v7406_v48, %v3257_v40  ;;  %v7432_v40 = vrot.slane %v7398_v17, %v5871_v63  ;;  %v8353_v48 = vld [vmem:[#allocation52_spill] sm:$0xff] }
 0x998   : > { %4647 = vset.pattern.permute.xlu1 %v8283_v60  ;;  %v3218_v41 = vmul.f32 %v7390_v54, %v3211_v46  ;;  %v7411_v60 = vrot.slane %v7400_v49, %v5845_v33  ;;  %v7420_v33 = vrot.slane %v7400_v49, %v8287_v28 }
 0x999   : > { %2886 = vperm.xlu1 %4647, %v7004_v6   ;;  %8337 = vst [vmem:[#allocation99_spill] sm:$0xff] %v7432_v40 }
 0x99a   : > { %8334 = vst [vmem:[#allocation62_spill] sm:$0xff] %v7411_v60  ;;  %8335 = vst [vmem:[#allocation144_spill] sm:$0xff] %v7420_v33 }
 0x99b   : > { %v3225_v59 = vpop.permute.xlu1 %3224 }
 0x99c   : > { %v3232_v53 = vmul.f32 %v7395_v13, %v3225_v59 }
 0x99d   : > { %4650 = vset.pattern.permute.xlu1 %v8270_v20 }
 0x99e   : > { %v3234_v47 = vmin.f32 %v3218_v41, %v3232_v53  ;;  %2932 = vperm.xlu1 %4650, %v7010_v37   ;;  %v7424_v41 = vrot.slane %v7398_v17, %v8287_v28 }
 0x9a0   : > { %v3236_v32 = vadd.f32 %v3234_v47, %v3204_v30  ;;  %v3243_v19 = vpop.permute.xlu1 %3242  ;;  %8336 = vst [vmem:[#allocation97_spill] sm:$0xff] %v7424_v41  ;;  %v7436_v47 = vrot.slane %v7400_v49, %v5871_v63 }
 0x9a1   : > { %v3250_v43 = vmul.f32 %v7411_v60, %v3243_v19 }
 0x9a2   : > { %4651 = vset.pattern.permute.xlu1 %v8284_v11  ;;  %8338 = vst [vmem:[#allocation61_spill] sm:$0xff] %v7436_v47 }
 0x9a3   : > { %v3266_v46 = vmin.f32 %v3250_v43, %v3264_v4  ;;  %2950 = vperm.xlu1 %4651, %v7004_v6  }
 0x9a5   : > { %v3268_v20 = vadd.f32 %v3266_v46, %v3236_v32  ;;  %v3275_v59 = vpop.permute.xlu1 %3274  ;;  %v3321_v32 = vpop.permute.xlu0 %3320 }
 0x9a6   : > { %v3282_v11 = vmul.f32 %v7420_v33, %v3275_v59  ;;  %v3328_v4 = vmul.f32 %v7432_v40, %v3321_v32  ;;  %v7458_v32 = vrot.slane %v7398_v17, %v6334_v61 }
 0x9a7   : > { %4654 = vset.pattern.permute.xlu1 %v8271_v8 }
 0x9a8   : > { %2996 = vperm.xlu1 %4654, %v7010_v37   ;;  %8341 = vst [vmem:[#allocation100_spill] sm:$0xff] %v7458_v32 }
 0x9a9   : > { %v3289_v30 = vpop.permute.xlu1 %3288 }
 0x9aa   : > { %v3296_v53 = vmul.f32 %v7424_v41, %v3289_v30  ;;  %v7446_v30 = vrot.slane %v7400_v49, %v8291_v57  ;;  %v8352_v41 = vld [vmem:[#allocation69_spill] sm:$0xff] }
 0x9ac   : > { %v3298_v28 = vmin.f32 %v3282_v11, %v3296_v53  ;;  %4655 = vset.pattern.permute.xlu1 %v8285_v38  ;;  %8339 = vst [vmem:[#allocation63_spill] sm:$0xff] %v7446_v30  ;;  %v7450_v38 = vrot.slane %v7398_v17, %v8291_v57 }
 0x9ad   : > { %3014 = vperm.xlu1 %4655, %v7004_v6  }
 0x9ae   : > { %v3300_v8 = vadd.f32 %v3298_v28, %v3268_v20  ;;  %v3307_v19 = vpop.permute.xlu1 %3306  ;;  %8340 = vst [vmem:[#allocation145_spill] sm:$0xff] %v7450_v38  ;;  %v3385_v20 = vpop.permute.xlu0 %3384  ;;  %v7462_v28 = vrot.slane %v7400_v49, %v6334_v61 }
 0x9af   : > { %v3314_v43 = vmul.f32 %v7436_v47, %v3307_v19  ;;  %v8351_v47 = vld [vmem:[#allocation130_spill] sm:$0xff] }
 0x9b0   : > { %8342 = vst [vmem:[#allocation101_spill] sm:$0xff] %v7462_v28 }
 0x9b1   : > { %v3330_v46 = vmin.f32 %v3314_v43, %v3328_v4  ;;  %4658 = vset.pattern.permute.xlu1 %v8273_v0  ;;  %v3392_v4 = vmul.f32 %v7458_v32, %v3385_v20 }
 0x9b2   : > { %3060 = vperm.xlu1 %4658, %v7010_v37  }
 0x9b3   : > { %v3332_v59 = vadd.f32 %v3330_v46, %v3300_v8  ;;  %v3339_v63 = vpop.permute.xlu1 %3338  ;;  %v3449_v8 = vpop.permute.xlu0 %3448 }
 0x9b4   : > { %v3346_v0 = vmul.f32 %v7446_v30, %v3339_v63 }
 0x9b6   : > { %4659 = vset.pattern.permute.xlu1 %v8286_v3 }
 0x9b7   : > { %v3353_v11 = vpop.permute.xlu1 %3352  ;;  %3078 = vperm.xlu1 %4659, %v7004_v6   ;;  %v7470_v61 = vpop.permute.xlu0 %2534 }
 0x9b8   : > { %v3360_v53 = vmul.f32 %v7450_v38, %v3353_v11  ;;  %v8350_v38 = vld [vmem:[#allocation81_spill] sm:$0xff] }
 0x9b9   : > { %v2545_v30 = vmul.f32 %v8350_v38, %v7470_v61  ;;  %v8357_v38 = vld [vmem:[#allocation82_spill] sm:$0xff] }
 0x9ba   : > { %v3362_v57 = vmin.f32 %v3346_v0, %v3360_v53  ;;  %v7486_v53 = vrot.slane %v7398_v17, %v6337_v14 }
 0x9bb   : > { %4662 = vset.pattern.permute.xlu1 %v8274_v12  ;;  %v7474_v12 = vrot.slane %v7400_v49, %v6353_v44 }
 0x9bc   : > { %v3364_v3 = vadd.f32 %v3362_v57, %v3332_v59  ;;  %v3371_v19 = vpop.permute.xlu1 %3370  ;;  %3124 = vperm.xlu1 %4662, %v7010_v37   ;;  %v7478_v59 = vrot.slane %v7398_v17, %v6353_v44  ;;  %8345 = vst [vmem:[#allocation103_spill] sm:$0xff] %v7486_v53  ;;  %v7490_v57 = vrot.slane %v7400_v49, %v6337_v14 }
 0x9bd   : > { %v3378_v43 = vmul.f32 %v7462_v28, %v3371_v19  ;;  %8343 = vst [vmem:[#allocation65_spill] sm:$0xff] %v7474_v12 }
 0x9be   : > { %8344 = vst [vmem:[#allocation102_spill] sm:$0xff] %v7478_v59  ;;  %8346 = vst [vmem:[#allocation64_spill] sm:$0xff] %v7490_v57 }
 0x9bf   : > { %v3394_v46 = vmin.f32 %v3378_v43, %v3392_v4 }
 0x9c0   : > { %4663 = vset.pattern.permute.xlu1 %v8289_v39 }
 0x9c1   : > { %v3396_v63 = vadd.f32 %v3394_v46, %v3364_v3  ;;  %v3403_v11 = vpop.permute.xlu1 %3402  ;;  %3142 = vperm.xlu1 %4663, %v7004_v6   ;;  %v7492_v3 = vpop.permute.xlu0 %2580 }
 0x9c2   : > { %v3410_v0 = vmul.f32 %v7474_v12, %v3403_v11  ;;  %v8349_v12 = vld [vmem:[#allocation85_spill] sm:$0xff]  ;;  %v2591_v33 = vmul.f32 %v8352_v41, %v7492_v3 }
 0x9c5   : > { %v3417_v20 = vpop.permute.xlu1 %3416  ;;  %4666 = vset.pattern.permute.xlu1 %v8275_v35  ;;  %v3456_v35 = vmul.f32 %v7486_v53, %v3449_v8  ;;  %v7498_v11 = vpop.permute.xlu0 %2598 }
 0x9c6   : > { %v3424_v39 = vmul.f32 %v7478_v59, %v3417_v20  ;;  %3188 = vperm.xlu1 %4666, %v7010_v37   ;;  %v2609_v25 = vmul.f32 %v8355_v2, %v7498_v11 }
 0x9c8   : > { %v3426_v44 = vmin.f32 %v3410_v0, %v3424_v39 }
 0x9c9   : > { %v7504_v0 = vpop.permute.xlu0 %2644 }
 0x9ca   : > { %v3428_v19 = vadd.f32 %v3426_v44, %v3396_v63  ;;  %v3435_v4 = vpop.permute.xlu1 %3434  ;;  %4667 = vset.pattern.permute.xlu1 %v8296_v51  ;;  %v2655_v61 = vmul.f32 %v8357_v38, %v7504_v0 }
 0x9cb   : > { %v3442_v43 = vmul.f32 %v7490_v57, %v3435_v4  ;;  %3206 = vperm.xlu1 %4667, %v7004_v6  }
 0x9cd   : > { %v3458_v46 = vmin.f32 %v3442_v43, %v3456_v35 }
 0x9cf   : > { %v7500_v20 = vadd.f32 %v3458_v46, %v3428_v19  ;;  %4670 = vset.pattern.permute.xlu1 %v8277_v5  ;;  %v2468_v14 = vpop.permute.xlu1 %2467  ;;  %v7511_v19 = vpop.permute.xlu0 %2662 }
 0x9d0   : > { %3252 = vperm.xlu1 %4670, %v7010_v37   ;;  %v2479_v51 = vmul.f32 %v7091_v21, %v2468_v14 }
 0x9d1   : > { %8347 = vst [vmem:[#allocation67_spill] sm:$0xff] %v7500_v20 }
 0x9d3   : > { %v2484_v63 = vpop.permute.xlu1 %2483  ;;  %v7518_v21 = vpop.permute.xlu0 %2708 }
 0x9d4   : > { %v2495_v8 = vmul.f32 %v7073_v62, %v2484_v63  ;;  %4671 = vset.pattern.permute.xlu1 %v8301_v10 }
 0x9d5   : > { %3270 = vperm.xlu1 %4671, %v7004_v6  }
 0x9d6   : > { %v2497_v39 = vmin.f32 %v2479_v51, %v2495_v8 }
 0x9d8   : > { %v2503_v44 = vpop.permute.xlu1 %2502 }
 0x9d9   : > { %4674 = vset.pattern.permute.xlu1 %v8278_v24  ;;  %v2513_v4 = vmul.f32 %v7077_v22, %v2503_v44  ;;  %v7522_v24 = vpop.permute.xlu0 %2726 }
 0x9da   : > { %3316 = vperm.xlu1 %4674, %v7010_v37  }
 0x9dc   : > { %v2517_v5 = vpop.permute.xlu1 %2516 }
 0x9dd   : > { %v2527_v35 = vmul.f32 %v7066_v58, %v2517_v5  ;;  %v7526_v22 = vpop.permute.xlu0 %2772 }
 0x9de   : > { %4675 = vset.pattern.permute.xlu1 %v8306_v1 }
 0x9df   : > { %v2529_v62 = vmin.f32 %v2513_v4, %v2527_v35  ;;  %3334 = vperm.xlu1 %4675, %v7004_v6  }
 0x9e1   : > { %v2531_v10 = vadd.f32 %v2529_v62, %v2497_v39  ;;  %v2549_v43 = vpop.permute.xlu1 %2548  ;;  %v7530_v14 = vpop.permute.xlu0 %2790 }
 0x9e2   : > { %v2559_v28 = vmul.f32 %v8349_v12, %v2549_v43  ;;  %v8356_v12 = vld [vmem:[#allocation87_spill] sm:$0xff] }
 0x9e3   : > { %4678 = vset.pattern.permute.xlu1 %v8280_v9 }
 0x9e4   : > { %3380 = vperm.xlu1 %4678, %v7010_v37   ;;  %v2561_v60 = vmin.f32 %v2545_v30, %v2559_v28  ;;  %v8359_v30 = vld [vmem:[#allocation132_spill] sm:$0xff] }
 0x9e6   : > { %v2567_v46 = vpop.permute.xlu1 %2566 }
 0x9e7   : > { %v2577_v40 = vmul.f32 %v8351_v47, %v2567_v46  ;;  %v2563_v47 = vadd.f32 %v2561_v60, %v2531_v10  ;;  %v8362_v60 = vld [vmem:[#allocation73_spill] sm:$0xff] }
 0x9e8   : > { %4679 = vset.pattern.permute.xlu1 %v8311_v50  ;;  %v7535_v50 = vpop.permute.xlu0 %2836 }
 0x9e9   : > { %3398 = vperm.xlu1 %4679, %v7004_v6  }
 0x9eb   : > { %v2613_v58 = vpop.permute.xlu1 %2612 }
 0x9ec   : > { %v7538_v51 = vpop.permute.xlu0 %2854  ;;  %v2623_v13 = vmul.f32 %v8353_v48, %v2613_v58  ;;  %v2673_v48 = vmul.f32 %v8359_v30, %v7511_v19  ;;  %v8360_v58 = vld [vmem:[#allocation88_spill] sm:$0xff] }
 0x9ed   : > { %4682 = vset.pattern.permute.xlu1 %v8281_v29 }
 0x9ee   : > { %3444 = vperm.xlu1 %4682, %v7010_v37   ;;  %v2625_v46 = vmin.f32 %v2609_v25, %v2623_v13 }
 0x9f0   : > { %v2631_v1 = vpop.permute.xlu1 %2630  ;;  %v7540_v8 = vpop.permute.xlu0 %2900 }
 0x9f1   : > { %v2641_v43 = vmul.f32 %v8356_v12, %v2631_v1 }
 0x9f2   : > { %4683 = vset.pattern.permute.xlu1 %v8317_v55 }
 0x9f3   : > { %3462 = vperm.xlu1 %4683, %v7004_v6   ;;  %v2657_v3 = vmin.f32 %v2641_v43, %v2655_v61  ;;  %v8366_v61 = vld [vmem:[#allocation90_spill] sm:$0xff] }
 0x9f4   : > { %v7542_v44 = vpop.permute.xlu0 %2918 }
 0x9f5   : > { %v2677_v9 = vpop.permute.xlu1 %2676 }
 0x9f6   : > { %v2687_v41 = vmul.f32 %v8358_v15, %v2677_v9  ;;  %v8363_v15 = vld [vmem:[#allocation56_spill] sm:$0xff] }
 0x9f7   : > { %3466 = vperm.xlu1 %4683, %v6942_v16   ;;  %v2737_v13 = vmul.f32 %v8363_v15, %v7522_v24  ;;  %v8368_v24 = vld [vmem:[#allocation57_spill] sm:$0xff] }
 0x9f8   : > { %v7544_v5 = vpop.permute.xlu0 %2964  ;;  %v2689_v0 = vmin.f32 %v2673_v48, %v2687_v41 }
 0x9fa   : > { %v2695_v63 = vpop.permute.xlu1 %2694 }
 0x9fb   : > { %3480 = vperm.xlu1 %4683, %v6944_v56  }
 0x9fc   : > { %v7546_v4 = vpop.permute.xlu0 %2982 }
 0x9ff   : > { %v2741_v29 = vpop.permute.xlu1 %2740 }
 0xa00   : > { %v7548_v35 = vpop.permute.xlu0 %3028  ;;  %v2751_v25 = vmul.f32 %v8362_v60, %v2741_v29 }
 0xa02   : > { %v2753_v38 = vmin.f32 %v2737_v13, %v2751_v25  ;;  %v8372_v25 = vld [vmem:[#allocation76_spill] sm:$0xff] }
 0xa03   : > { %v8373_v13 = vld [vmem:[#allocation92_spill] sm:$0xff] }
 0xa04   : > { %v2759_v37 = vpop.permute.xlu1 %2758  ;;  %v7550_v56 = vpop.permute.xlu0 %3046 }
 0xa08   : > { %v7556_v57 = vpop.permute.xlu0 %3092 }
 0xa09   : > { %v2805_v39 = vpop.permute.xlu1 %2804 }
 0xa0c   : > { %v7560_v17 = vpop.permute.xlu0 %3110 }
 0xa0e   : > { %v2823_v55 = vpop.permute.xlu1 %2822 }
 0xa10   : > { %v7564_v59 = vpop.permute.xlu0 %3156 }
 0xa11   : > { %8348 = vst [vmem:[#allocation104_spill] sm:$0xff] %v7564_v59  ;;  %v2593_v59 = vmin.f32 %v2577_v40, %v2591_v33  ;;  %v8361_v40 = vld [vmem:[#allocation84_spill] sm:$0xff] }
 0xa12   : > { %v2719_v11 = vmul.f32 %v8361_v40, %v7518_v21 }
 0xa13   : > { %v2869_v6 = vpop.permute.xlu1 %2868  ;;  %v2595_v28 = vadd.f32 %v2593_v59, %v2563_v47  ;;  %v8364_v59 = vld [vmem:[#allocation86_spill] sm:$0xff]  ;;  %v2815_v47 = vmul.f32 %v8366_v61, %v2805_v39  ;;  %v8371_v39 = vld [vmem:[#allocation89_spill] sm:$0xff] }
 0xa14   : > { %v7575_v54 = vpop.permute.xlu0 %3174  ;;  %v2769_v9 = vmul.f32 %v8364_v59, %v2759_v37  ;;  %v2929_v59 = vmul.f32 %v7275_v42, %v7542_v44 }
 0xa15   : > { %8354 = vst [vmem:[#allocation105_spill] sm:$0xff] %v7575_v54  ;;  %v2705_v54 = vmul.f32 %v8360_v58, %v2695_v63  ;;  %v2627_v1 = vadd.f32 %v2625_v46, %v2595_v28  ;;  %v8365_v63 = vld [vmem:[#allocation138_spill] sm:$0xff]  ;;  %v8367_v46 = vld [vmem:[#allocation137_spill] sm:$0xff]  ;;  %v2833_v28 = vmul.f32 %v8368_v24, %v2823_v55 }
 0xa16   : > { %v2783_v12 = vmul.f32 %v8365_v63, %v7526_v22  ;;  %v2801_v29 = vmul.f32 %v8367_v46, %v7530_v14  ;;  %v8370_v22 = vld [vmem:[#allocation139_spill] sm:$0xff] }
 0xa17   : > { %v2659_v10 = vadd.f32 %v2657_v3, %v2627_v1  ;;  %v2721_v19 = vmin.f32 %v2705_v54, %v2719_v11  ;;  %v8369_v54 = vld [vmem:[#allocation55_spill] sm:$0xff]  ;;  %v2879_v40 = vmul.f32 %v8370_v22, %v2869_v6  ;;  %v2865_v1 = vmul.f32 %v8371_v39, %v7538_v51 }
 0xa18   : > { %v2887_v16 = vpop.permute.xlu1 %2886  ;;  %v7588_v2 = vpop.permute.xlu0 %3220  ;;  %v2785_v48 = vmin.f32 %v2769_v9, %v2783_v12  ;;  %v2847_v37 = vmul.f32 %v8369_v54, %v7535_v50  ;;  %v2817_v58 = vmin.f32 %v2801_v29, %v2815_v47  ;;  %v8374_v63 = vld [vmem:[#allocation91_spill] sm:$0xff]  ;;  %v8380_v22 = vld [vmem:[#allocation104_spill] sm:$0xff] }
 0xa19   : > { %v2691_v43 = vadd.f32 %v2689_v0, %v2659_v10  ;;  %v2897_v15 = vmul.f32 %v8372_v25, %v2887_v16  ;;  %v2911_v10 = vmul.f32 %v8373_v13, %v7540_v8 }
 0xa1a   : > { %v2849_v60 = vmin.f32 %v2833_v28, %v2847_v37 }
 0xa1b   : > { %v2723_v41 = vadd.f32 %v2721_v19, %v2691_v43  ;;  %v2881_v19 = vmin.f32 %v2865_v1, %v2879_v40  ;;  %v2913_v9 = vmin.f32 %v2897_v15, %v2911_v10  ;;  %v8375_v43 = vld [vmem:[#allocation136_spill] sm:$0xff] }
 0xa1c   : > { %v7601_v21 = vpop.permute.xlu0 %3238  ;;  %v2975_v16 = vmul.f32 %v8375_v43, %v7544_v5  ;;  %v8383_v25 = vld [vmem:[#allocation105_spill] sm:$0xff]  ;;  %v8389_v43 = vld [vmem:[#allocation144_spill] sm:$0xff] }
 0xa1d   : > { %v2933_v62 = vpop.permute.xlu1 %2932  ;;  %v2755_v3 = vadd.f32 %v2753_v38, %v2723_v41 }
 0xa1e   : > { %v2943_v50 = vmul.f32 %v7270_v52, %v2933_v62  ;;  %v2993_v52 = vmul.f32 %v7304_v45, %v7546_v4 }
 0xa1f   : > { %v2787_v0 = vadd.f32 %v2785_v48, %v2755_v3  ;;  %v8379_v3 = vld [vmem:[#allocation93_spill] sm:$0xff] }
 0xa20   : > { %v3285_v14 = vpop.permute.xlu0 %3284  ;;  %v2945_v61 = vmin.f32 %v2929_v59, %v2943_v50  ;;  %v8387_v59 = vld [vmem:[#allocation143_spill] sm:$0xff] }
 0xa21   : > { %v2819_v55 = vadd.f32 %v2817_v58, %v2787_v0 }
 0xa22   : > { %v7552_v20 = vpop.permute.xlu1 %2950 }
 0xa23   : > { %v2851_v6 = vadd.f32 %v2849_v60, %v2819_v55  ;;  %v2961_v51 = vmul.f32 %v8374_v63, %v7552_v20  ;;  %v3039_v20 = vmul.f32 %v7314_v34, %v7548_v35  ;;  %v8386_v55 = vld [vmem:[#allocation142_spill] sm:$0xff] }
 0xa24   : > { %v3303_v47 = vpop.permute.xlu0 %3302 }
 0xa25   : > { %v2883_v38 = vadd.f32 %v2881_v19, %v2851_v6  ;;  %v2977_v42 = vmin.f32 %v2961_v51, %v2975_v16  ;;  %v3231_v19 = vmul.f32 %v8386_v55, %v7588_v2  ;;  %v8392_v2 = vld [vmem:[#allocation61_spill] sm:$0xff] }
 0xa27   : > { %v7554_v49 = vpop.permute.xlu1 %2996  ;;  %v2915_v62 = vadd.f32 %v2913_v9, %v2883_v38  ;;  %v8388_v9 = vld [vmem:[#allocation62_spill] sm:$0xff] }
 0xa28   : > { %v3007_v8 = vmul.f32 %v7299_v27, %v7554_v49  ;;  %v8376_v27 = vld [vmem:[#allocation94_spill] sm:$0xff]  ;;  %v3349_v4 = vpop.permute.xlu0 %3348  ;;  %v3249_v63 = vmul.f32 %v8388_v9, %v7601_v21  ;;  %v8394_v21 = vld [vmem:[#allocation145_spill] sm:$0xff] }
 0xa29   : > { %v2947_v29 = vadd.f32 %v2945_v61, %v2915_v62  ;;  %v3057_v49 = vmul.f32 %v8376_v27, %v7550_v56 }
 0xa2a   : > { %v3009_v5 = vmin.f32 %v2993_v52, %v3007_v8  ;;  %v8390_v8 = vld [vmem:[#allocation97_spill] sm:$0xff] }
 0xa2b   : > { %v2979_v48 = vadd.f32 %v2977_v42, %v2947_v29  ;;  %v3295_v52 = vmul.f32 %v8390_v8, %v3285_v14  ;;  %v8391_v42 = vld [vmem:[#allocation99_spill] sm:$0xff] }
 0xa2c   : > { %v7558_v53 = vpop.permute.xlu1 %3014  ;;  %v3367_v0 = vpop.permute.xlu0 %3366 }
 0xa2d   : > { %v3025_v44 = vmul.f32 %v7318_v7, %v7558_v53  ;;  %v8377_v7 = vld [vmem:[#allocation140_spill] sm:$0xff]  ;;  %v3011_v28 = vadd.f32 %v3009_v5, %v2979_v48 }
 0xa2e   : > { %v3103_v53 = vmul.f32 %v8377_v7, %v7556_v57  ;;  %v8382_v57 = vld [vmem:[#allocation96_spill] sm:$0xff] }
 0xa2f   : > { %v3041_v24 = vmin.f32 %v3025_v44, %v3039_v20  ;;  %v3313_v20 = vmul.f32 %v8392_v2, %v3303_v47 }
 0xa30   : > { %v3413_v61 = vpop.permute.xlu0 %3412 }
 0xa31   : > { %v7562_v31 = vpop.permute.xlu1 %3060  ;;  %v3043_v37 = vadd.f32 %v3041_v24, %v3011_v28 }
 0xa32   : > { %v3071_v41 = vmul.f32 %v7325_v23, %v7562_v31  ;;  %v8378_v31 = vld [vmem:[#allocation59_spill] sm:$0xff] }
 0xa33   : > { %v3121_v23 = vmul.f32 %v8378_v31, %v7560_v17  ;;  %v8385_v17 = vld [vmem:[#allocation60_spill] sm:$0xff]  ;;  %v8398_v31 = vld [vmem:[#allocation102_spill] sm:$0xff] }
 0xa34   : > { %v3073_v54 = vmin.f32 %v3057_v49, %v3071_v41  ;;  %v3359_v49 = vmul.f32 %v8394_v21, %v3349_v4  ;;  %v3431_v7 = vpop.permute.xlu0 %3430  ;;  %v3423_v47 = vmul.f32 %v8398_v31, %v3413_v61  ;;  %v8401_v4 = vld [vmem:[#allocation103_spill] sm:$0xff] }
 0xa35   : > { %v8406_v61 = vld [vmem:[#allocation135_spill] sm:$0xff] }
 0xa36   : > { %v7567_v32 = vpop.permute.xlu1 %3078  ;;  %v3075_v40 = vadd.f32 %v3073_v54, %v3043_v37 }
 0xa37   : > { %v3089_v45 = vmul.f32 %v7344_v26, %v7567_v32  ;;  %v8381_v26 = vld [vmem:[#allocation141_spill] sm:$0xff] }
 0xa38   : > { %v3167_v32 = vmul.f32 %v8381_v26, %v8380_v22 }
 0xa39   : > { %v3105_v56 = vmin.f32 %v3089_v45, %v3103_v53  ;;  %v8396_v53 = vld [vmem:[#allocation101_spill] sm:$0xff] }
 0xa3a   : > { %v3377_v14 = vmul.f32 %v8396_v53, %v3367_v0  ;;  %v3633_v53 = vld [vmem:[#allocation19] sm:$0xff] }
 0xa3b   : > { %v7580_v36 = vpop.permute.xlu1 %3124  ;;  %v3107_v15 = vadd.f32 %v3105_v56, %v3075_v40 }
 0xa3c   : > { %v3135_v34 = vmul.f32 %v7351_v18, %v7580_v36  ;;  %v8384_v18 = vld [vmem:[#allocation58_spill] sm:$0xff] }
 0xa3d   : > { %v3185_v36 = vmul.f32 %v8384_v18, %v8383_v25 }
 0xa3e   : > { %v3137_v39 = vmin.f32 %v3121_v23, %v3135_v34  ;;  %v8397_v34 = vld [vmem:[#allocation65_spill] sm:$0xff] }
 0xa40   : > { %v7590_v33 = vpop.permute.xlu1 %3142 }
 0xa41   : > { %v3153_v58 = vmul.f32 %v8379_v3, %v7590_v33  ;;  %v3139_v33 = vadd.f32 %v3137_v39, %v3107_v15  ;;  %v8399_v3 = vld [vmem:[#allocation125_spill] sm:$0xff] }
 0xa43   : > { %v3169_v13 = vmin.f32 %v3153_v58, %v3167_v32  ;;  %v8400_v58 = vld [vmem:[#allocation95_spill] sm:$0xff]  ;;  %v8402_v32 = vld [vmem:[#allocation64_spill] sm:$0xff] }
 0xa44   : > { %v3486_v22 = vrot.slane %v8400_v58, %v8399_v3  ;;  %v3441_v40 = vmul.f32 %v8402_v32, %v3431_v7 }
 0xa45   : > { %v3189_v30 = vpop.permute.xlu1 %3188 }
 0xa46   : > { %v3199_v1 = vmul.f32 %v8382_v57, %v3189_v30  ;;  %v3171_v30 = vadd.f32 %v3169_v13, %v3139_v33 }
 0xa48   : > { %v3201_v50 = vmin.f32 %v3185_v36, %v3199_v1  ;;  %v8403_v1 = vld [vmem:[#allocation98_spill] sm:$0xff] }
 0xa49   : > { %v3472_v0 = vrot.slane %v8403_v1, %v8399_v3 }
 0xa4a   : > { %v3207_v11 = vpop.permute.xlu1 %3206  ;;  %v3203_v62 = vadd.f32 %v3201_v50, %v3171_v30  ;;  %v8404_v50 = vld [vmem:[#allocation50_spill] sm:$0xff] }
 0xa4b   : > { %v3217_v10 = vmul.f32 %v8385_v17, %v3207_v11 }
 0xa4d   : > { %v3233_v51 = vmin.f32 %v3217_v10, %v3231_v19 }
 0xa4f   : > { %v3253_v12 = vpop.permute.xlu1 %3252  ;;  %v3235_v29 = vadd.f32 %v3233_v51, %v3203_v62 }
 0xa50   : > { %v3263_v6 = vmul.f32 %v8387_v59, %v3253_v12  ;;  %v8393_v12 = vld [vmem:[#allocation63_spill] sm:$0xff] }
 0xa52   : > { %v3265_v11 = vmin.f32 %v3249_v63, %v3263_v6 }
 0xa54   : > { %v3271_v46 = vpop.permute.xlu1 %3270  ;;  %v3267_v48 = vadd.f32 %v3265_v11, %v3235_v29  ;;  %v3532_v11 = vld [vmem:[#allocation4 + $0x20] sm:$0xff]  ;;  %v3535_v29 = vld [vmem:[#allocation4 + $0x38] sm:$0xff] }
 0xa55   : > { %v3281_v16 = vmul.f32 %v8389_v43, %v3271_v46  ;;  %v8395_v46 = vld [vmem:[#allocation100_spill] sm:$0xff] }
 0xa57   : > { %v3297_v5 = vmin.f32 %v3281_v16, %v3295_v52  ;;  %v8405_v16 = vld [vmem:[#allocation67_spill] sm:$0xff] }
 0xa59   : > { %v3317_v35 = vpop.permute.xlu1 %3316  ;;  %v3299_v28 = vadd.f32 %v3297_v5, %v3267_v48 }
 0xa5a   : > { %v3327_v44 = vmul.f32 %v8391_v42, %v3317_v35  ;;  %v3533_v42 = vld [vmem:[#allocation4 + $0x28] sm:$0xff] }
 0xa5c   : > { %v3329_v24 = vmin.f32 %v3313_v20, %v3327_v44  ;;  %v4208_v44 = vpack.c.bf16 %v3533_v42, %v3532_v11  ;;  %v3534_v20 = vld [vmem:[#allocation4 + $0x30] sm:$0xff] }
 0xa5d   : > { %v4214_v5 = vpack.c.bf16 %v3535_v29, %v3534_v20 }
 0xa5e   : > { %v3335_v60 = vpop.permute.xlu1 %3334  ;;  %v3331_v23 = vadd.f32 %v3329_v24, %v3299_v28  ;;  %4210 = vmatprep.subr.msk.bf16.mxu0 %vm6919_vm4, %v4208_v44 }
 0xa5f   : > { %v3345_v41 = vmul.f32 %v8393_v12, %v3335_v60  ;;  %v3477_v60 = vpop.permute.xlu0 %3476  ;;  %4213 = vmatpush3.bf16.xpose.msk.msra.mxu0 %vm6919_vm4, %v4208_v44 }
 0xa60   : > { %v3487_v15 = vmul.f32 %v3486_v22, %v3477_v60  ;;  %4216 = vmatprep.subr.msk.bf16.mxu0 %vm6919_vm4, %v4214_v5 }
 0xa61   : > { %v3361_v54 = vmin.f32 %v3345_v41, %v3359_v49 }
 0xa63   : > { %v3381_v38 = vpop.permute.xlu1 %3380  ;;  %v3363_v39 = vadd.f32 %v3361_v54, %v3331_v23  ;;  %v3635_v54 = vld [vmem:[#allocation19 + $0x10] sm:$0xff] }
 0xa64   : > { %v3391_v45 = vmul.f32 %v8395_v46, %v3381_v38 }
 0xa66   : > { %v3393_v37 = vmin.f32 %v3377_v14, %v3391_v45  ;;  %v3634_v14 = vld [vmem:[#allocation19 + $0x8] sm:$0xff] }
 0xa67   : > { %4219 = vmatpush3.bf16.xpose.msk.msra.mxu0 %vm6919_vm4, %v4214_v5  ;;  %v4220_v28 = vpack.c.bf16 %v3634_v14, %v3633_v53 }
 0xa68   : > { %v3399_v27 = vpop.permute.xlu1 %3398  ;;  %v3395_v25 = vadd.f32 %v3393_v37, %v3363_v39 }
 0xa69   : > { %v3409_v35 = vmul.f32 %v8397_v34, %v3399_v27  ;;  %4221 = vmatprep.subr.bf16.mxu1 %v4220_v28  ;;  %v3636_v34 = vld [vmem:[#allocation19 + $0x18] sm:$0xff] }
 0xa6a   : > { %4223 = vmatpush3.bf16.msra.mxu1 %v4220_v28 }
 0xa6b   : > { %v3425_v57 = vmin.f32 %v3409_v35, %v3423_v47  ;;  %v4224_v35 = vpack.c.bf16 %v3636_v34, %v3635_v54 }
 0xa6d   : > { %v3445_v56 = vpop.permute.xlu1 %3444  ;;  %v3427_v13 = vadd.f32 %v3425_v57, %v3395_v25  ;;  %4225 = vmatprep.subr.bf16.mxu1 %v4224_v35 }
 0xa6e   : > { %v3455_v26 = vmul.f32 %v8401_v4, %v3445_v56  ;;  %4227 = vmatpush3.bf16.msra.mxu1 %v4224_v35  ;;  %v4025_v4 = vld [vmem:[#allocation20] ss:$0 sm:$0xff] }
 0xa70   : > { %v3457_v18 = vmin.f32 %v3441_v40, %v3455_v26 }
 0xa72   : > { %v3463_v36 = vpop.permute.xlu1 %3462  ;;  %v3459_v10 = vadd.f32 %v3457_v18, %v3427_v13 }
 0xa73   : > { %v3473_v17 = vmul.f32 %v3472_v0, %v3463_v36 }
 0xa75   : > { %v3489_v55 = vmin.f32 %v3473_v17, %v3487_v15 }
 0xa76   : > { %v3467_v19 = vpop.permute.xlu1 %3466 }
 0xa77   : > { %v3491_v33 = vadd.f32 %v3489_v55, %v3459_v10  ;;  %v3474_v9 = vmul.f32 %v3472_v0, %v3467_v19 }
 0xa79   : > { %v3509_v59 = vadd.f32 %v8404_v50, %v3491_v33 }
 0xa7a   : > { %v3481_v6 = vpop.permute.xlu1 %3480 }
 0xa7b   : > { %v3488_v63 = vmul.f32 %v3486_v22, %v3481_v6  ;;  %v3511_v30 = vmul.f32 0.03125, %v3509_v59 }
 0xa7d   : > { %v3490_v51 = vmin.f32 %v3474_v9, %v3488_v63  ;;  %v3513_v43 = vsel %vm2226_vm3, %v3511_v30, -inf }
 0xa7e   : > { %3514 = vmax.xlane.f32.xlu0 %v3513_v43 }
 0xa7f   : > { %v3492_v38 = vadd.f32 %v3490_v51, %v8405_v16 }
 0xa81   : > { %v3510_v8 = vadd.f32 %v8406_v61, %v3492_v38 }
 0xa83   : > { %v3512_v52 = vmul.f32 0.03125, %v3510_v8 }
 0xa85   : > { %v3516_v62 = vsel %vm2226_vm3, %v3512_v52, -inf }
 0xa86   : > { %3517 = vmax.xlane.f32.xlu1 %v3516_v62 }
 0xb0b   : > { %v3515_v12 = vpop.xlane.xlu0 %3514 }
 0xb0c   : > { %v3519_v41 = vsub.f32 %v3511_v30, %v3515_v12 }
 0xb0e   : > { %v3521_v27 = vmul.f32 1.442695, %v3519_v41 }
 0xb10   : > { %4721 = vpow2.f32 %v3521_v27 }
 0xb13   : > { %v3518_v21 = vpop.xlane.xlu1 %3517 }
 0xb14   : > { %v3520_v49 = vsub.f32 %v3512_v52, %v3518_v21 }
 0xb16   : > { %v3523_v48 = vmul.f32 1.442695, %v3520_v49 }
 0xb18   : > { %4723 = vpow2.f32 %v3523_v48 }
 0xb1a   : > { %v4722_v24 = vpop.eup %4721 }
 0xb1b   : > { %4158 = vmatprep.mubr.msk.f32.mxu0 %vm2226_vm3, %v4722_v24  ;;  %v3525_v46 = vsel %vm2226_vm3, %v4722_v24, 0.0 }
 0xb1c   : > { %3526 = vadd.xlane.f32.xlu0 %v3525_v46 }
 0xb22   : > { %v4724_v45 = vpop.eup %4723 }
 0xb23   : > { %4159 = vmatmul.mubr.msk.f32.vlgmr.msra.gmra.mrb[4].mxu0 %vm2226_vm3, %v4724_v45  ;;  %v3528_v7 = vsel %vm2226_vm3, %v4724_v45, 0.0 }
 0xb24   : > { %3529 = vadd.xlane.f32.xlu0 %v3528_v7 }
 0xba9   : > { %v3527_v31 = vpop.xlane.xlu0 %3526 }
 0xbaa   : > { %4725 = vrcp.f32 %v3527_v31 }
 0xbb1   : > { %v3530_v47 = vpop.xlane.xlu0 %3529 }
 0xbb2   : > { %4727 = vrcp.f32 %v3530_v47 }
 0xbb4   : > { %v4726_v37 = vpop.eup %4725 }
 0xbbc   : > { %v4728_v3 = vpop.eup %4727 }
 0xbf6   : > { %v4160_v23 = vpop.f32.mrb[4].mxu0 }
 0xbf7   : > { %v3620_v56 = vpop.f32.mrb[5].mxu0  ;;  %v3632_v22 = vmul.f32 %v4728_v3, %v4160_v23 }
 0xbf8   : > { %v3631_v58 = vmul.f32 %v4726_v37, %v3620_v56 }
 0xbfa   : > { %4169 = vmatprep.mubr.msk.f32.mxu1 %vm1066_vm2, %v3631_v58 }
 0xbfb   : > { %4170 = vmatmul.mubr.msk.f32.vlgmr.msra.gmra.mrb[2].mxu1 %vm1066_vm2, %v3632_v22 }
 0xcce   : > { %v4171_v26 = vpop.f32.mrb[2].mxu1 }
 0xccf   : > { %v3722_v32 = vadd.f32 %v4171_v26, %v4025_v4  ;;  %v3716_v40 = vpop.f32.mrb[3].mxu1 }
 0xcd0   : > { %v3717_v39 = vadd.f32 %v4025_v4, %v3716_v40 }
 0xcd1   : > { %3726 = vst.msk [vmem:[%s5713_s29 + $0x8] sm:$0xff] %vm1066_vm2, %v3722_v32 }
 0xcd2   : > { %3725 = vst.msk [vmem:[%s5713_s29] sm:$0xff] %vm1066_vm2, %v3717_v39 }
 0xcd3   : > { %4987 = shalt.err (!%p4984_p12)
}
 0xcd4   : > { %s4988_s29 = scalar_lea.hbm %s7695_s5, 256  ;;  %s4992_s25 = scalar_lea.hbm %s8411_s1, 2048 }
 0xcd5   : > { %p4989_p10 = scmp.ne.s32.totalorder %s7695_s5, %s4988_s29  ;;  %p4993_p6 = scmp.lt.u32.totalorder %s7695_s5, %s8411_s1 }
 0xcd6   : > { %p4994_p0 = scmp.lt.u32.totalorder %s4992_s25, %s4988_s29  ;;  %p4996_p5 = scmp.lt.u32.totalorder %s4988_s29, %s7695_s5 }
 0xcd7   : > { %p4990_p1 = pnand %p4989_p10, %p8412_p4 }
 0xcd8   : > { %p4995_p13 = por %p4994_p0, %p4993_p6 }
 0xcd9   : > { %p4991_p11 = pneg %p4990_p1 }
 0xcda   : > { %p4997_p8 = por %p4996_p5, %p4995_p13 }
 0xcdc   : > { %p4998_p9 = pnand %p4997_p8, %p4991_p11 }
 0xcde   : > { %5001 = shalt.err (!%p4998_p9)
}
 0xcdf   : > { %s5174_s21 = smov 128   ;;  %s5175_s23 = smov 8  }
 0xce0   : > { %4264 = dma.vmem_to_hbm [thread:$0]  (%p8412_p4), %s7697_s3, 256, %s7695_s5, %s3728_s2, %s5174_s21, %s5174_s21, %s5175_s23  }
 0xce1 PF: > { %s8413_s15 = sld [smem:[#allocation34_spill]]  ;;  %s8414_s27 = sld [smem:[#allocation44_spill]] }
 0xce2   : > { %p4310_p2 = scmp.ge.s32.totalorder %s5128_s19, 2 }
 0xce7   : > { %s3758_s12 = sand.u32 1, %s8413_s15   ;;  %p8415_p7 = scmp.ne.s32.totalorder %s8414_s27, 0 }
 0xce8   : > { %s3759_s9 = scalar_lea.sflag [#allocation8], %s3758_s12 }
 0xce9   : > { %p4296_p3 = pnand %p4310_p2, %p8415_p7 }
 0xceb   : > { %5083 = dma.done.wait (!%p4296_p3), %s3759_s9, 256  }
 0xcec   : > { %5085 = vsyncadd (!%p4296_p3), %s3759_s9, 4294967040  ;;  %s34_s19 = sadd.s32 1, %s5128_s19   ;;  %s8416_s12 = sld [smem:[#allocation35_spill]] }
 0xced   : > { %p31_p12 = scmp.ge.s32.totalorder %s34_s19, 10   ;;  %s8417_s16 = sld [smem:[#allocation45_spill]] }
 0xcee   : > { %s8418_s15 = sld [smem:[#allocation38_spill]]  ;;  %s8419_s17 = sld [smem:[#allocation40_spill]] }
 0xcef   : > { %s8420_s22 = sld [smem:[#allocation41_spill]]  ;;  %s8421_s30 = smov %s5092_s10 }
 0xcf0   : > { %s8422_s10 = smov %s5096_s11  ;;  %s8423_s11 = smov %s5571_s24 }
 0xcf1   : > { %s8424_s13 = smov %s5108_s14  ;;  %33 = sbr.rel (!%p31_p12) target bundleno = 23 (0x17), region = 173 }
 0xcf3   : > { %s8425_s14 = smov %s8417_s16  ;;  %s8426_s16 = smov %s5124_s18 }
 0xcf5   : > { %s8427_s18 = smov %s8420_s22 }
 0xcf8   :  { %3764 = vsyncpa [#allocation7], 1 }
 0xcf9   :  { %3766 = vsyncpa [#allocation7 + $0x1], 1 }
 0xcfa   :  { %3767 = vsyncpa [#allocation11], 1 }
 0xcfb   :  { %3769 = vsyncpa [#allocation11 + $0x1], 1 }
 0xcfc   :  { %3770 = vsyncpa [#allocation14], 1 }
 0xcfd   :  { %3772 = vsyncpa [#allocation14 + $0x1], 1 }
 0xcfe   :  { %3773 = vsyncpa [#allocation17], 1 }
 0xcff   :  { %3774 = vsyncpa [#allocation21], 1 }
 0xd00   :  { %3775 = vsyncpa [#allocation8], 1 }
 0xd01   :  { %3777 = vsyncpa [#allocation8 + $0x1], 1 }
 0xd02   :  { %3778 = vsyncpa [#allocation9], 1 }
 0xd03   :  { %3780 = vsyncpa [#allocation9 + $0x1], 1 }

</bundles_post_ra>
